<compile_context>
chip_gen: v7x
topology: tpu7x:2x2x1
jax: 0.10.0
libtpu: 0.0.40
codegen_flags: <defaults>
</compile_context>

<pallas_src>
import math
import functools

import jax
import jax.numpy as jnp
import numpy as np
from jax import lax
from jax.experimental import pallas as pl
from jax.experimental.pallas import tpu as pltpu


# ------------------------------- helpers ------------------------------------

def _layernorm(x, gamma, beta, eps):
    mean = jnp.mean(x, axis=-1, keepdims=True)
    var = jnp.mean((x - mean) ** 2, axis=-1, keepdims=True)
    return (x - mean) * lax.rsqrt(var + eps) * gamma + beta


def _gelu_exact(x):
    # Matches the reference `gelu`: x * 0.5 * (1 + erf(x / sqrt(2)))
    return x * 0.5 * (1.0 + lax.erf(x / math.sqrt(2.0)))


# ------------------------------- kernel -------------------------------------

def albert_layer_kernel(x_ref,
                        wqkv_ref, bqkv_ref,
                        wo_ref, bo_ref, g1_ref, b1_ref,
                        wf_ref, bf_ref, wfo_ref, bfo_ref, g2_ref, b2_ref,
                        o_ref, *, num_heads, eps):
    Bt, S, H = x_ref.shape
    nh = num_heads
    d = H // nh
    R = Bt * S
    bf16, f32 = jnp.bfloat16, jnp.float32

    # activations in f32 (residual / LN path); bf16 casts only at matmul use
    x2 = x_ref[...].astype(f32).reshape(R, H)

    # --- fused QKV projection: one big MXU matmul (K=H, N=3H) ---
    qkv = jnp.dot(x2.astype(bf16), wqkv_ref[...],
                  preferred_element_type=f32) + bqkv_ref[...]     # (R, 3H) f32

    # --- head-major regroup: nh static lane slices + stack, then one sublane
    #     reshape (nh, Bt*S, d) -> (nh*Bt, S, d); group index g = h*Bt + b ---
    def to_heads(base):
        cols = [qkv[:, base + h * d: base + (h + 1) * d] for h in range(nh)]
        return jnp.stack(cols, axis=0).reshape(nh * Bt, S, d).astype(bf16)

    q_hm = to_heads(0)
    k_hm = to_heads(H)
    v_hm = to_heads(2 * H)

    # --- batched attention over all (head, batch) groups at once ---
    scores = jnp.einsum("gqd,gkd->gqk", q_hm, k_hm,
                        preferred_element_type=f32)
    scores = scores * (1.0 / math.sqrt(d))
    scores = scores - jnp.max(scores, axis=-1, keepdims=True)
    e = jnp.exp(scores)
    probs = e * pl.reciprocal(jnp.sum(e, axis=-1, keepdims=True), approx=True)
    ctx = jnp.einsum("gqk,gkd->gqd", probs.astype(bf16), v_hm,
                     preferred_element_type=f32)                  # (nh*Bt, S, d)

    # --- back to token-major rows with head-major columns, then ONE K=H
    #     output-projection matmul against the un-split dense weight ---
    ctx3 = ctx.reshape(nh, R, d)
    ctx2 = jnp.concatenate([ctx3[h] for h in range(nh)], axis=-1).astype(bf16)
    proj = jnp.dot(ctx2, wo_ref[...], preferred_element_type=f32) + bo_ref[...]

    # --- residual + LayerNorm (attention block) ---
    attn = _layernorm(x2 + proj, g1_ref[...], b1_ref[...], eps)   # (R, H) f32

    # --- FFN: linear -> exact-erf GELU -> linear, residual + LayerNorm ---
    h1 = jnp.dot(attn.astype(bf16), wf_ref[...],
                 preferred_element_type=f32) + bf_ref[...]
    h1 = _gelu_exact(h1)
    h2 = jnp.dot(h1.astype(bf16), wfo_ref[...],
                 preferred_element_type=f32) + bfo_ref[...]
    out = _layernorm(h2 + attn, g2_ref[...], b2_ref[...], eps)

    o_ref[...] = out.reshape(Bt, S, H).astype(o_ref.dtype)


# ------------------------------- wrapper ------------------------------------

def albert_layer(x, params, *, num_heads, eps=1e-12, block_b=None, max_rows=512):
    B, S, H = x.shape
    I = params["wf"].shape[1]
    assert H % num_heads == 0

    # Batch tile: <= max_rows rows per step, and keep grid_b >= 2 when B >= 2
    # so both v7x TensorCores get a share of the "parallel" batch grid.
    if block_b is None:
        block_b = 1
        for cand in range(1, B + 1):
            if B % cand:
                continue
            if cand * S > max_rows:
                continue
            if B >= 2 and B // cand < 2:
                continue
            block_b = cand
    grid_b = B // block_b

    bf16, f32 = jnp.bfloat16, jnp.float32

    # Pack/convert weights once in the wrapper (bf16 MXU operands, f32 biases/LN).
    wqkv = jnp.concatenate([params["wq"], params["wk"], params["wv"]], axis=1).astype(bf16)
    bqkv = jnp.concatenate([params["bq"], params["bk"], params["bv"]], axis=1).astype(f32)
    wo = params["wo"].astype(bf16)                 # un-split (H, H) for the K=H matmul
    bo = params["bo"].astype(f32)
    g1, b1 = params["g1"].astype(f32), params["b1"].astype(f32)
    wf_w, bf_b = params["wf"].astype(bf16), params["bf"].astype(f32)
    wfo_w, bfo_b = params["wfo"].astype(bf16), params["bfo"].astype(f32)
    g2, b2 = params["g2"].astype(f32), params["b2"].astype(f32)
    args = (x, wqkv, bqkv, wo, bo, g1, b1, wf_w, bf_b, wfo_w, bfo_b, g2, b2)

    # Derived VMEM budget (review: never request the full physical VMEM of a
    # v7x core); ~25% headroom for compiler scratch / double buffers.
    try:
        vmem_cap = int(pltpu.get_tpu_info().vmem_capacity_bytes)
    except Exception:
        vmem_cap = 128 * 1024 * 1024
    vmem_limit = int(min(vmem_cap * 3 // 4, 112 * 1024 * 1024))

    d = H // num_heads
    flops = (2 * B * S * H * 3 * H                      # fused QKV projection
             + 4 * B * num_heads * S * S * d            # scores + probs@V
             + 2 * B * S * H * H                        # output projection
             + 2 * B * S * H * I + 2 * B * S * I * H)   # FFN
    transcendentals = B * num_heads * S * S + B * S * I
    weight_bytes = sum(int(a.size) * a.dtype.itemsize for a in args[1:])
    bytes_accessed = int(x.size) * x.dtype.itemsize * 2 + weight_bytes

    kernel = functools.partial(albert_layer_kernel, num_heads=num_heads, eps=eps)

    def build_and_call(single_buffer_weights):
        pm = None
        if single_buffer_weights and hasattr(pl, "Buffered"):
            try:
                pm = pl.Buffered(buffer_count=1)
            except TypeError:
                pm = pl.Buffered(1)

        def rep(shape):
            zeros = (0,) * len(shape)
            if pm is None:
                return pl.BlockSpec(shape, lambda i, z=zeros: z)
            return pl.BlockSpec(shape, lambda i, z=zeros: z, pipeline_mode=pm)

        in_specs = [
            pl.BlockSpec((block_b, S, H), lambda i: (i, 0, 0)),   # x
            rep((H, 3 * H)), rep((1, 3 * H)),                     # wqkv, bqkv
            rep((H, H)), rep((1, H)),                             # wo, bo
            rep((1, H)), rep((1, H)),                             # ln1 gamma, beta
            rep((H, I)), rep((1, I)),                             # wf, bf
            rep((I, H)), rep((1, H)),                             # wfo, bfo
            rep((1, H)), rep((1, H)),                             # ln2 gamma, beta
        ]
        return pl.pallas_call(
            kernel,
            out_shape=jax.ShapeDtypeStruct((B, S, H), x.dtype),
            grid_spec=pltpu.PrefetchScalarGridSpec(
                num_scalar_prefetch=0,
                grid=(grid_b,),
                in_specs=in_specs,
                out_specs=pl.BlockSpec((block_b, S, H), lambda i: (i, 0, 0)),
            ),
            compiler_params=pltpu.CompilerParams(
                dimension_semantics=("parallel",),
                vmem_limit_bytes=vmem_limit),
            cost_estimate=pl.CostEstimate(flops=flops,
                                          transcendentals=transcendentals,
                                          bytes_accessed=bytes_accessed),
        )(*args)

    try:
        return build_and_call(True)
    except Exception:
        # Fallback: default double-buffered weights (older jax without
        # pipeline_mode / Buffered support on BlockSpec).
        return build_and_call(False)


# ------------------------------- reference ----------------------------------

def albert_layer_ref(x, params, *, num_heads, eps=1e-12):
    B, S, H = x.shape
    d = H // num_heads
    q = x @ params["wq"] + params["bq"][0]
    k = x @ params["wk"] + params["bk"][0]
    v = x @ params["wv"] + params["bv"][0]
    q = q.reshape(B, S, num_heads, d).transpose(0, 2, 1, 3)
    k = k.reshape(B, S, num_heads, d).transpose(0, 2, 1, 3)
    v = v.reshape(B, S, num_heads, d).transpose(0, 2, 1, 3)
    scores = jnp.einsum("bnsd,bntd->bnst", q, k) / math.sqrt(d)
    probs = jax.nn.softmax(scores, axis=-1)
    ctx = jnp.einsum("bnst,bntd->bnsd", probs, v).transpose(0, 2, 1, 3).reshape(B, S, H)
    proj = ctx @ params["wo"] + params["bo"][0]

    def ln(t, g, b):
        m = t.mean(-1, keepdims=True)
        var = ((t - m) ** 2).mean(-1, keepdims=True)
        return (t - m) / jnp.sqrt(var + eps) * g[0] + b[0]

    attn_out = ln(x + proj, params["g1"], params["b1"])
    ffn = attn_out @ params["wf"] + params["bf"][0]
    ffn = ffn * 0.5 * (1.0 + lax.erf(ffn / math.sqrt(2.0)))
    ffn_out = ffn @ params["wfo"] + params["bfo"][0]
    return ln(ffn_out + attn_out, params["g2"], params["b2"])


# --------------------------------- main --------------------------------------

if __name__ == "__main__":
    B, S, H, NH, I = 2, 16, 64, 4, 256   # batch, seq, hidden, heads, intermediate
    key = jax.random.PRNGKey(0)
    ks = jax.random.split(key, 16)

    def w(k, shape):
        return jax.random.normal(k, shape, jnp.float32) * 0.02

    params = {
        "wq": w(ks[0], (H, H)),  "bq": w(ks[1], (1, H)),
        "wk": w(ks[2], (H, H)),  "bk": w(ks[3], (1, H)),
        "wv": w(ks[4], (H, H)),  "bv": w(ks[5], (1, H)),
        "wo": w(ks[6], (H, H)),  "bo": w(ks[7], (1, H)),
        "g1": jnp.ones((1, H), jnp.float32), "b1": jnp.zeros((1, H), jnp.float32),
        "wf": w(ks[8], (H, I)),  "bf": w(ks[9], (1, I)),
        "wfo": w(ks[10], (I, H)), "bfo": w(ks[11], (1, H)),
        "g2": jnp.ones((1, H), jnp.float32), "b2": jnp.zeros((1, H), jnp.float32),
    }

    x = jax.random.normal(ks[12], (B, S, H), jnp.float32)

    out = albert_layer(x, params, num_heads=NH)
    out = jax.block_until_ready(out)

    ref = albert_layer_ref(x, params, num_heads=NH)
    # Tolerance accounts for bf16 MXU operands (f32 accumulation kept) and the
    # EUP-approximate softmax reciprocal.
    np.testing.assert_allclose(np.asarray(out), np.asarray(ref), rtol=2e-2, atol=2e-2)

    print("KERNEL_OK")
</pallas_src>

<mosaic_0001>
module attributes {stable_mosaic.version = 11 : i64} {
  func.func @albert_layer_kernel(%arg0: i32, %arg1: memref<1x16x64xf32, #tpu.memory_space<vmem>>, %arg2: memref<64x192xbf16, #tpu.memory_space<vmem>>, %arg3: memref<1x192xf32, #tpu.memory_space<vmem>>, %arg4: memref<64x64xbf16, #tpu.memory_space<vmem>>, %arg5: memref<1x64xf32, #tpu.memory_space<vmem>>, %arg6: memref<1x64xf32, #tpu.memory_space<vmem>>, %arg7: memref<1x64xf32, #tpu.memory_space<vmem>>, %arg8: memref<64x256xbf16, #tpu.memory_space<vmem>>, %arg9: memref<1x256xf32, #tpu.memory_space<vmem>>, %arg10: memref<256x64xbf16, #tpu.memory_space<vmem>>, %arg11: memref<1x64xf32, #tpu.memory_space<vmem>>, %arg12: memref<1x64xf32, #tpu.memory_space<vmem>>, %arg13: memref<1x64xf32, #tpu.memory_space<vmem>>, %arg14: memref<1x16x64xf32, #tpu.memory_space<vmem>>) attributes {dimension_semantics = [#tpu.dimension_semantics<parallel>], iteration_bounds = array<i64: 2>, scalar_prefetch = 0 : i64, scratch_operands = 0 : i64, tpu.core_type = #tpu.core_type<tc>, window_params = [{transform_indices = @transform_0, window_bounds = array<i64: 1, 16, 64>}, {pipeline_mode = #tpu.pipeline_mode<synchronous>, transform_indices = @transform_1, window_bounds = array<i64: 64, 192>}, {pipeline_mode = #tpu.pipeline_mode<synchronous>, transform_indices = @transform_2, window_bounds = array<i64: 1, 192>}, {pipeline_mode = #tpu.pipeline_mode<synchronous>, transform_indices = @transform_3, window_bounds = array<i64: 64, 64>}, {pipeline_mode = #tpu.pipeline_mode<synchronous>, transform_indices = @transform_4, window_bounds = array<i64: 1, 64>}, {pipeline_mode = #tpu.pipeline_mode<synchronous>, transform_indices = @transform_5, window_bounds = array<i64: 1, 64>}, {pipeline_mode = #tpu.pipeline_mode<synchronous>, transform_indices = @transform_6, window_bounds = array<i64: 1, 64>}, {pipeline_mode = #tpu.pipeline_mode<synchronous>, transform_indices = @transform_7, window_bounds = array<i64: 64, 256>}, {pipeline_mode = #tpu.pipeline_mode<synchronous>, transform_indices = @transform_8, window_bounds = array<i64: 1, 256>}, {pipeline_mode = #tpu.pipeline_mode<synchronous>, transform_indices = @transform_9, window_bounds = array<i64: 256, 64>}, {pipeline_mode = #tpu.pipeline_mode<synchronous>, transform_indices = @transform_10, window_bounds = array<i64: 1, 64>}, {pipeline_mode = #tpu.pipeline_mode<synchronous>, transform_indices = @transform_11, window_bounds = array<i64: 1, 64>}, {pipeline_mode = #tpu.pipeline_mode<synchronous>, transform_indices = @transform_12, window_bounds = array<i64: 1, 64>}, {transform_indices = @transform_13, window_bounds = array<i64: 1, 16, 64>}]} {
    %c0 = arith.constant 0 : index
    %c0_0 = arith.constant 0 : index
    %c0_1 = arith.constant 0 : index
    %0 = vector.load %arg1[%c0, %c0_0, %c0_1] : memref<1x16x64xf32, #tpu.memory_space<vmem>>, vector<1x16x64xf32>
    %1 = vector.shape_cast %0 : vector<1x16x64xf32> to vector<16x64xf32>
    %2 = arith.truncf %1 : vector<16x64xf32> to vector<16x64xbf16>
    %c0_2 = arith.constant 0 : index
    %c0_3 = arith.constant 0 : index
    %3 = vector.load %arg2[%c0_2, %c0_3] : memref<64x192xbf16, #tpu.memory_space<vmem>>, vector<64x192xbf16>
    %cst = arith.constant dense<0.000000e+00> : vector<16x192xf32>
    %4 = tpu.matmul %2, %3, %cst {dimension_numbers = #tpu.dot_dimension_numbers<[1], [0], [0], [1], [0, 0, 1, 1], [], []>} : vector<16x64xbf16>, vector<64x192xbf16>, vector<16x192xf32> -> vector<16x192xf32>
    %c0_4 = arith.constant 0 : index
    %c0_5 = arith.constant 0 : index
    %5 = vector.load %arg3[%c0_4, %c0_5] : memref<1x192xf32, #tpu.memory_space<vmem>>, vector<1x192xf32>
    %6 = vector.broadcast %5 : vector<1x192xf32> to vector<16x192xf32>
    %7 = arith.addf %4, %6 : vector<16x192xf32>
    %8 = vector.extract_strided_slice %7 {offsets = [0, 0], sizes = [16, 16], strides = [1, 1]} : vector<16x192xf32> to vector<16x16xf32>
    %9 = vector.extract_strided_slice %7 {offsets = [0, 16], sizes = [16, 16], strides = [1, 1]} : vector<16x192xf32> to vector<16x16xf32>
    %10 = vector.extract_strided_slice %7 {offsets = [0, 32], sizes = [16, 16], strides = [1, 1]} : vector<16x192xf32> to vector<16x16xf32>
    %11 = vector.extract_strided_slice %7 {offsets = [0, 48], sizes = [16, 16], strides = [1, 1]} : vector<16x192xf32> to vector<16x16xf32>
    %12 = vector.shape_cast %8 : vector<16x16xf32> to vector<1x16x16xf32>
    %13 = vector.shape_cast %9 : vector<16x16xf32> to vector<1x16x16xf32>
    %14 = vector.shape_cast %10 : vector<16x16xf32> to vector<1x16x16xf32>
    %15 = vector.shape_cast %11 : vector<16x16xf32> to vector<1x16x16xf32>
    %16 = tpu.concatenate %12, %13, %14, %15 in 0 : vector<1x16x16xf32>, vector<1x16x16xf32>, vector<1x16x16xf32>, vector<1x16x16xf32> -> vector<4x16x16xf32>
    %17 = arith.truncf %16 : vector<4x16x16xf32> to vector<4x16x16xbf16>
    %18 = vector.extract_strided_slice %7 {offsets = [0, 64], sizes = [16, 16], strides = [1, 1]} : vector<16x192xf32> to vector<16x16xf32>
    %19 = vector.extract_strided_slice %7 {offsets = [0, 80], sizes = [16, 16], strides = [1, 1]} : vector<16x192xf32> to vector<16x16xf32>
    %20 = vector.extract_strided_slice %7 {offsets = [0, 96], sizes = [16, 16], strides = [1, 1]} : vector<16x192xf32> to vector<16x16xf32>
    %21 = vector.extract_strided_slice %7 {offsets = [0, 112], sizes = [16, 16], strides = [1, 1]} : vector<16x192xf32> to vector<16x16xf32>
    %22 = vector.shape_cast %18 : vector<16x16xf32> to vector<1x16x16xf32>
    %23 = vector.shape_cast %19 : vector<16x16xf32> to vector<1x16x16xf32>
    %24 = vector.shape_cast %20 : vector<16x16xf32> to vector<1x16x16xf32>
    %25 = vector.shape_cast %21 : vector<16x16xf32> to vector<1x16x16xf32>
    %26 = tpu.concatenate %22, %23, %24, %25 in 0 : vector<1x16x16xf32>, vector<1x16x16xf32>, vector<1x16x16xf32>, vector<1x16x16xf32> -> vector<4x16x16xf32>
    %27 = arith.truncf %26 : vector<4x16x16xf32> to vector<4x16x16xbf16>
    %28 = vector.extract_strided_slice %7 {offsets = [0, 128], sizes = [16, 16], strides = [1, 1]} : vector<16x192xf32> to vector<16x16xf32>
    %29 = vector.extract_strided_slice %7 {offsets = [0, 144], sizes = [16, 16], strides = [1, 1]} : vector<16x192xf32> to vector<16x16xf32>
    %30 = vector.extract_strided_slice %7 {offsets = [0, 160], sizes = [16, 16], strides = [1, 1]} : vector<16x192xf32> to vector<16x16xf32>
    %31 = vector.extract_strided_slice %7 {offsets = [0, 176], sizes = [16, 16], strides = [1, 1]} : vector<16x192xf32> to vector<16x16xf32>
    %32 = vector.shape_cast %28 : vector<16x16xf32> to vector<1x16x16xf32>
    %33 = vector.shape_cast %29 : vector<16x16xf32> to vector<1x16x16xf32>
    %34 = vector.shape_cast %30 : vector<16x16xf32> to vector<1x16x16xf32>
    %35 = vector.shape_cast %31 : vector<16x16xf32> to vector<1x16x16xf32>
    %36 = tpu.concatenate %32, %33, %34, %35 in 0 : vector<1x16x16xf32>, vector<1x16x16xf32>, vector<1x16x16xf32>, vector<1x16x16xf32> -> vector<4x16x16xf32>
    %37 = arith.truncf %36 : vector<4x16x16xf32> to vector<4x16x16xbf16>
    "tpu.trace_start"() <{level = 10 : i32, message = "gqd,gkd->gqk"}> : () -> ()
    %cst_6 = arith.constant dense<0.000000e+00> : vector<4x16x16xf32>
    %38 = tpu.matmul %17, %27, %cst_6 {dimension_numbers = #tpu.dot_dimension_numbers<[2], [2], [1], [1], [0, 0, 0, 1, 1, 1], [0], [0]>} : vector<4x16x16xbf16>, vector<4x16x16xbf16>, vector<4x16x16xf32> -> vector<4x16x16xf32>
    "tpu.trace_stop"() : () -> ()
    %cst_7 = arith.constant 2.500000e-01 : f32
    %39 = vector.broadcast %cst_7 : f32 to vector<4x16x16xf32>
    %40 = arith.mulf %38, %39 : vector<4x16x16xf32>
    %cst_8 = arith.constant dense<0xFF800000> : vector<4x16xf32>
    %41 = vector.multi_reduction <maximumf>, %40, %cst_8 [2] : vector<4x16x16xf32> to vector<4x16xf32>
    %42 = vector.shape_cast %41 : vector<4x16xf32> to vector<4x16x1xf32>
    %43 = vector.broadcast %42 : vector<4x16x1xf32> to vector<4x16x16xf32>
    %44 = arith.subf %40, %43 : vector<4x16x16xf32>
    %45 = math.exp %44 : vector<4x16x16xf32>
    %cst_9 = arith.constant dense<0.000000e+00> : vector<4x16xf32>
    %46 = vector.multi_reduction <add>, %45, %cst_9 [2] : vector<4x16x16xf32> to vector<4x16xf32>
    %47 = vector.shape_cast %46 : vector<4x16xf32> to vector<4x16x1xf32>
    %48 = tpu.reciprocal %47 {approx = true} : vector<4x16x1xf32> -> vector<4x16x1xf32>
    %49 = vector.broadcast %48 : vector<4x16x1xf32> to vector<4x16x16xf32>
    %50 = arith.mulf %45, %49 : vector<4x16x16xf32>
    %51 = arith.truncf %50 : vector<4x16x16xf32> to vector<4x16x16xbf16>
    "tpu.trace_start"() <{level = 10 : i32, message = "gqk,gkd->gqd"}> : () -> ()
    %cst_10 = arith.constant dense<0.000000e+00> : vector<4x16x16xf32>
    %52 = tpu.matmul %51, %37, %cst_10 {dimension_numbers = #tpu.dot_dimension_numbers<[2], [1], [1], [2], [0, 0, 0, 1, 1, 2], [0], [0]>} : vector<4x16x16xbf16>, vector<4x16x16xbf16>, vector<4x16x16xf32> -> vector<4x16x16xf32>
    "tpu.trace_stop"() : () -> ()
    %53 = vector.extract_strided_slice %52 {offsets = [0, 0, 0], sizes = [1, 16, 16], strides = [1, 1, 1]} : vector<4x16x16xf32> to vector<1x16x16xf32>
    %54 = vector.shape_cast %53 : vector<1x16x16xf32> to vector<16x16xf32>
    %55 = vector.extract_strided_slice %52 {offsets = [1, 0, 0], sizes = [1, 16, 16], strides = [1, 1, 1]} : vector<4x16x16xf32> to vector<1x16x16xf32>
    %56 = vector.shape_cast %55 : vector<1x16x16xf32> to vector<16x16xf32>
    %57 = vector.extract_strided_slice %52 {offsets = [2, 0, 0], sizes = [1, 16, 16], strides = [1, 1, 1]} : vector<4x16x16xf32> to vector<1x16x16xf32>
    %58 = vector.shape_cast %57 : vector<1x16x16xf32> to vector<16x16xf32>
    %59 = vector.extract_strided_slice %52 {offsets = [3, 0, 0], sizes = [1, 16, 16], strides = [1, 1, 1]} : vector<4x16x16xf32> to vector<1x16x16xf32>
    %60 = vector.shape_cast %59 : vector<1x16x16xf32> to vector<16x16xf32>
    %61 = tpu.concatenate %54, %56, %58, %60 in 1 : vector<16x16xf32>, vector<16x16xf32>, vector<16x16xf32>, vector<16x16xf32> -> vector<16x64xf32>
    %62 = arith.truncf %61 : vector<16x64xf32> to vector<16x64xbf16>
    %c0_11 = arith.constant 0 : index
    %c0_12 = arith.constant 0 : index
    %63 = vector.load %arg4[%c0_11, %c0_12] : memref<64x64xbf16, #tpu.memory_space<vmem>>, vector<64x64xbf16>
    %cst_13 = arith.constant dense<0.000000e+00> : vector<16x64xf32>
    %64 = tpu.matmul %62, %63, %cst_13 {dimension_numbers = #tpu.dot_dimension_numbers<[1], [0], [0], [1], [0, 0, 1, 1], [], []>} : vector<16x64xbf16>, vector<64x64xbf16>, vector<16x64xf32> -> vector<16x64xf32>
    %c0_14 = arith.constant 0 : index
    %c0_15 = arith.constant 0 : index
    %65 = vector.load %arg5[%c0_14, %c0_15] : memref<1x64xf32, #tpu.memory_space<vmem>>, vector<1x64xf32>
    %66 = vector.broadcast %65 : vector<1x64xf32> to vector<16x64xf32>
    %67 = arith.addf %64, %66 : vector<16x64xf32>
    %68 = arith.addf %1, %67 : vector<16x64xf32>
    %c0_16 = arith.constant 0 : index
    %c0_17 = arith.constant 0 : index
    %69 = vector.load %arg6[%c0_16, %c0_17] : memref<1x64xf32, #tpu.memory_space<vmem>>, vector<1x64xf32>
    %c0_18 = arith.constant 0 : index
    %c0_19 = arith.constant 0 : index
    %70 = vector.load %arg7[%c0_18, %c0_19] : memref<1x64xf32, #tpu.memory_space<vmem>>, vector<1x64xf32>
    %cst_20 = arith.constant dense<0.000000e+00> : vector<16xf32>
    %71 = vector.multi_reduction <add>, %68, %cst_20 [1] : vector<16x64xf32> to vector<16xf32>
    %72 = vector.shape_cast %71 : vector<16xf32> to vector<16x1xf32>
    %cst_21 = arith.constant 6.400000e+01 : f32
    %73 = vector.broadcast %cst_21 : f32 to vector<16x1xf32>
    %74 = arith.divf %72, %73 : vector<16x1xf32>
    %75 = vector.broadcast %74 : vector<16x1xf32> to vector<16x64xf32>
    %76 = arith.subf %68, %75 : vector<16x64xf32>
    %77 = arith.mulf %76, %76 : vector<16x64xf32>
    %cst_22 = arith.constant dense<0.000000e+00> : vector<16xf32>
    %78 = vector.multi_reduction <add>, %77, %cst_22 [1] : vector<16x64xf32> to vector<16xf32>
    %79 = vector.shape_cast %78 : vector<16xf32> to vector<16x1xf32>
    %cst_23 = arith.constant 6.400000e+01 : f32
    %80 = vector.broadcast %cst_23 : f32 to vector<16x1xf32>
    %81 = arith.divf %79, %80 : vector<16x1xf32>
    %82 = vector.broadcast %74 : vector<16x1xf32> to vector<16x64xf32>
    %83 = arith.subf %68, %82 : vector<16x64xf32>
    %cst_24 = arith.constant 9.99999996E-13 : f32
    %84 = vector.broadcast %cst_24 : f32 to vector<16x1xf32>
    %85 = arith.addf %81, %84 : vector<16x1xf32>
    %86 = math.rsqrt %85 : vector<16x1xf32>
    %87 = vector.broadcast %86 : vector<16x1xf32> to vector<16x64xf32>
    %88 = arith.mulf %83, %87 : vector<16x64xf32>
    %89 = vector.broadcast %69 : vector<1x64xf32> to vector<16x64xf32>
    %90 = arith.mulf %88, %89 : vector<16x64xf32>
    %91 = vector.broadcast %70 : vector<1x64xf32> to vector<16x64xf32>
    %92 = arith.addf %90, %91 : vector<16x64xf32>
    %93 = arith.truncf %92 : vector<16x64xf32> to vector<16x64xbf16>
    %c0_25 = arith.constant 0 : index
    %c0_26 = arith.constant 0 : index
    %94 = vector.load %arg8[%c0_25, %c0_26] : memref<64x256xbf16, #tpu.memory_space<vmem>>, vector<64x256xbf16>
    %cst_27 = arith.constant dense<0.000000e+00> : vector<16x256xf32>
    %95 = tpu.matmul %93, %94, %cst_27 {dimension_numbers = #tpu.dot_dimension_numbers<[1], [0], [0], [1], [0, 0, 1, 1], [], []>} : vector<16x64xbf16>, vector<64x256xbf16>, vector<16x256xf32> -> vector<16x256xf32>
    %c0_28 = arith.constant 0 : index
    %c0_29 = arith.constant 0 : index
    %96 = vector.load %arg9[%c0_28, %c0_29] : memref<1x256xf32, #tpu.memory_space<vmem>>, vector<1x256xf32>
    %97 = vector.broadcast %96 : vector<1x256xf32> to vector<16x256xf32>
    %98 = arith.addf %95, %97 : vector<16x256xf32>
    %cst_30 = arith.constant 5.000000e-01 : f32
    %99 = vector.broadcast %cst_30 : f32 to vector<16x256xf32>
    %100 = arith.mulf %98, %99 : vector<16x256xf32>
    %cst_31 = arith.constant 1.41421354 : f32
    %101 = vector.broadcast %cst_31 : f32 to vector<16x256xf32>
    %102 = arith.divf %98, %101 : vector<16x256xf32>
    %103 = math.erf %102 : vector<16x256xf32>
    %cst_32 = arith.constant 1.000000e+00 : f32
    %104 = vector.broadcast %cst_32 : f32 to vector<16x256xf32>
    %105 = arith.addf %104, %103 : vector<16x256xf32>
    %106 = arith.mulf %100, %105 : vector<16x256xf32>
    %107 = arith.truncf %106 : vector<16x256xf32> to vector<16x256xbf16>
    %c0_33 = arith.constant 0 : index
    %c0_34 = arith.constant 0 : index
    %108 = vector.load %arg10[%c0_33, %c0_34] : memref<256x64xbf16, #tpu.memory_space<vmem>>, vector<256x64xbf16>
    %cst_35 = arith.constant dense<0.000000e+00> : vector<16x64xf32>
    %109 = tpu.matmul %107, %108, %cst_35 {dimension_numbers = #tpu.dot_dimension_numbers<[1], [0], [0], [1], [0, 0, 1, 1], [], []>} : vector<16x256xbf16>, vector<256x64xbf16>, vector<16x64xf32> -> vector<16x64xf32>
    %c0_36 = arith.constant 0 : index
    %c0_37 = arith.constant 0 : index
    %110 = vector.load %arg11[%c0_36, %c0_37] : memref<1x64xf32, #tpu.memory_space<vmem>>, vector<1x64xf32>
    %111 = vector.broadcast %110 : vector<1x64xf32> to vector<16x64xf32>
    %112 = arith.addf %109, %111 : vector<16x64xf32>
    %113 = arith.addf %112, %92 : vector<16x64xf32>
    %c0_38 = arith.constant 0 : index
    %c0_39 = arith.constant 0 : index
    %114 = vector.load %arg12[%c0_38, %c0_39] : memref<1x64xf32, #tpu.memory_space<vmem>>, vector<1x64xf32>
    %c0_40 = arith.constant 0 : index
    %c0_41 = arith.constant 0 : index
    %115 = vector.load %arg13[%c0_40, %c0_41] : memref<1x64xf32, #tpu.memory_space<vmem>>, vector<1x64xf32>
    %cst_42 = arith.constant dense<0.000000e+00> : vector<16xf32>
    %116 = vector.multi_reduction <add>, %113, %cst_42 [1] : vector<16x64xf32> to vector<16xf32>
    %117 = vector.shape_cast %116 : vector<16xf32> to vector<16x1xf32>
    %cst_43 = arith.constant 6.400000e+01 : f32
    %118 = vector.broadcast %cst_43 : f32 to vector<16x1xf32>
    %119 = arith.divf %117, %118 : vector<16x1xf32>
    %120 = vector.broadcast %119 : vector<16x1xf32> to vector<16x64xf32>
    %121 = arith.subf %113, %120 : vector<16x64xf32>
    %122 = arith.mulf %121, %121 : vector<16x64xf32>
    %cst_44 = arith.constant dense<0.000000e+00> : vector<16xf32>
    %123 = vector.multi_reduction <add>, %122, %cst_44 [1] : vector<16x64xf32> to vector<16xf32>
    %124 = vector.shape_cast %123 : vector<16xf32> to vector<16x1xf32>
    %cst_45 = arith.constant 6.400000e+01 : f32
    %125 = vector.broadcast %cst_45 : f32 to vector<16x1xf32>
    %126 = arith.divf %124, %125 : vector<16x1xf32>
    %127 = vector.broadcast %119 : vector<16x1xf32> to vector<16x64xf32>
    %128 = arith.subf %113, %127 : vector<16x64xf32>
    %cst_46 = arith.constant 9.99999996E-13 : f32
    %129 = vector.broadcast %cst_46 : f32 to vector<16x1xf32>
    %130 = arith.addf %126, %129 : vector<16x1xf32>
    %131 = math.rsqrt %130 : vector<16x1xf32>
    %132 = vector.broadcast %131 : vector<16x1xf32> to vector<16x64xf32>
    %133 = arith.mulf %128, %132 : vector<16x64xf32>
    %134 = vector.broadcast %114 : vector<1x64xf32> to vector<16x64xf32>
    %135 = arith.mulf %133, %134 : vector<16x64xf32>
    %136 = vector.broadcast %115 : vector<1x64xf32> to vector<16x64xf32>
    %137 = arith.addf %135, %136 : vector<16x64xf32>
    %138 = vector.shape_cast %137 : vector<16x64xf32> to vector<1x16x64xf32>
    %c0_47 = arith.constant 0 : index
    %c0_48 = arith.constant 0 : index
    %c0_49 = arith.constant 0 : index
    %139 = vector.load %arg14[%c0_47, %c0_48, %c0_49] : memref<1x16x64xf32, #tpu.memory_space<vmem>>, vector<1x16x64xf32>
    tpu.vector_store %arg14[%c0_47, %c0_48, %c0_49], %138 {strides = array<i32>} : memref<1x16x64xf32, #tpu.memory_space<vmem>>, vector<1x16x64xf32>,
    return
  }
  func.func @transform_0(%arg0: i32) -> (i32, i32, i32) {
    %c0_i32 = arith.constant 0 : i32
    %c0_i32_0 = arith.constant 0 : i32
    %c0_i32_1 = arith.constant 0 : i32
    return %arg0, %c0_i32, %c0_i32_0 : i32, i32, i32
  }
  func.func @transform_1(%arg0: i32) -> (i32, i32) {
    %c0_i32 = arith.constant 0 : i32
    %c0_i32_0 = arith.constant 0 : i32
    %c0_i32_1 = arith.constant 0 : i32
    return %c0_i32, %c0_i32_0 : i32, i32
  }
  func.func @transform_2(%arg0: i32) -> (i32, i32) {
    %c0_i32 = arith.constant 0 : i32
    %c0_i32_0 = arith.constant 0 : i32
    %c0_i32_1 = arith.constant 0 : i32
    return %c0_i32, %c0_i32_0 : i32, i32
  }
  func.func @transform_3(%arg0: i32) -> (i32, i32) {
    %c0_i32 = arith.constant 0 : i32
    %c0_i32_0 = arith.constant 0 : i32
    %c0_i32_1 = arith.constant 0 : i32
    return %c0_i32, %c0_i32_0 : i32, i32
  }
  func.func @transform_4(%arg0: i32) -> (i32, i32) {
    %c0_i32 = arith.constant 0 : i32
    %c0_i32_0 = arith.constant 0 : i32
    %c0_i32_1 = arith.constant 0 : i32
    return %c0_i32, %c0_i32_0 : i32, i32
  }
  func.func @transform_5(%arg0: i32) -> (i32, i32) {
    %c0_i32 = arith.constant 0 : i32
    %c0_i32_0 = arith.constant 0 : i32
    %c0_i32_1 = arith.constant 0 : i32
    return %c0_i32, %c0_i32_0 : i32, i32
  }
  func.func @transform_6(%arg0: i32) -> (i32, i32) {
    %c0_i32 = arith.constant 0 : i32
    %c0_i32_0 = arith.constant 0 : i32
    %c0_i32_1 = arith.constant 0 : i32
    return %c0_i32, %c0_i32_0 : i32, i32
  }
  func.func @transform_7(%arg0: i32) -> (i32, i32) {
    %c0_i32 = arith.constant 0 : i32
    %c0_i32_0 = arith.constant 0 : i32
    %c0_i32_1 = arith.constant 0 : i32
    return %c0_i32, %c0_i32_0 : i32, i32
  }
  func.func @transform_8(%arg0: i32) -> (i32, i32) {
    %c0_i32 = arith.constant 0 : i32
    %c0_i32_0 = arith.constant 0 : i32
    %c0_i32_1 = arith.constant 0 : i32
    return %c0_i32, %c0_i32_0 : i32, i32
  }
  func.func @transform_9(%arg0: i32) -> (i32, i32) {
    %c0_i32 = arith.constant 0 : i32
    %c0_i32_0 = arith.constant 0 : i32
    %c0_i32_1 = arith.constant 0 : i32
    return %c0_i32, %c0_i32_0 : i32, i32
  }
  func.func @transform_10(%arg0: i32) -> (i32, i32) {
    %c0_i32 = arith.constant 0 : i32
    %c0_i32_0 = arith.constant 0 : i32
    %c0_i32_1 = arith.constant 0 : i32
    return %c0_i32, %c0_i32_0 : i32, i32
  }
  func.func @transform_11(%arg0: i32) -> (i32, i32) {
    %c0_i32 = arith.constant 0 : i32
    %c0_i32_0 = arith.constant 0 : i32
    %c0_i32_1 = arith.constant 0 : i32
    return %c0_i32, %c0_i32_0 : i32, i32
  }
  func.func @transform_12(%arg0: i32) -> (i32, i32) {
    %c0_i32 = arith.constant 0 : i32
    %c0_i32_0 = arith.constant 0 : i32
    %c0_i32_1 = arith.constant 0 : i32
    return %c0_i32, %c0_i32_0 : i32, i32
  }
  func.func @transform_13(%arg0: i32) -> (i32, i32, i32) {
    %c0_i32 = arith.constant 0 : i32
    %c0_i32_0 = arith.constant 0 : i32
    %c0_i32_1 = arith.constant 0 : i32
    return %arg0, %c0_i32, %c0_i32_0 : i32, i32, i32
  }
}

module attributes {stable_mosaic.version = 11 : i64} {
  func.func @albert_layer_kernel(%arg0: i32, %arg1: memref<1x16x64xf32, #tpu.memory_space<vmem>>, %arg2: memref<64x192xbf16, #tpu.memory_space<vmem>>, %arg3: memref<1x192xf32, #tpu.memory_space<vmem>>, %arg4: memref<64x64xbf16, #tpu.memory_space<vmem>>, %arg5: memref<1x64xf32, #tpu.memory_space<vmem>>, %arg6: memref<1x64xf32, #tpu.memory_space<vmem>>, %arg7: memref<1x64xf32, #tpu.memory_space<vmem>>, %arg8: memref<64x256xbf16, #tpu.memory_space<vmem>>, %arg9: memref<1x256xf32, #tpu.memory_space<vmem>>, %arg10: memref<256x64xbf16, #tpu.memory_space<vmem>>, %arg11: memref<1x64xf32, #tpu.memory_space<vmem>>, %arg12: memref<1x64xf32, #tpu.memory_space<vmem>>, %arg13: memref<1x64xf32, #tpu.memory_space<vmem>>, %arg14: memref<1x16x64xf32, #tpu.memory_space<vmem>>) attributes {dimension_semantics = [#tpu.dimension_semantics<parallel>], iteration_bounds = array<i64: 2>, scalar_prefetch = 0 : i64, scratch_operands = 0 : i64, tpu.core_type = #tpu.core_type<tc>, window_params = [{transform_indices = @transform_0, window_bounds = array<i64: 1, 16, 64>}, {pipeline_mode = #tpu.pipeline_mode<synchronous>, transform_indices = @transform_1, window_bounds = array<i64: 64, 192>}, {pipeline_mode = #tpu.pipeline_mode<synchronous>, transform_indices = @transform_2, window_bounds = array<i64: 1, 192>}, {pipeline_mode = #tpu.pipeline_mode<synchronous>, transform_indices = @transform_3, window_bounds = array<i64: 64, 64>}, {pipeline_mode = #tpu.pipeline_mode<synchronous>, transform_indices = @transform_4, window_bounds = array<i64: 1, 64>}, {pipeline_mode = #tpu.pipeline_mode<synchronous>, transform_indices = @transform_5, window_bounds = array<i64: 1, 64>}, {pipeline_mode = #tpu.pipeline_mode<synchronous>, transform_indices = @transform_6, window_bounds = array<i64: 1, 64>}, {pipeline_mode = #tpu.pipeline_mode<synchronous>, transform_indices = @transform_7, window_bounds = array<i64: 64, 256>}, {pipeline_mode = #tpu.pipeline_mode<synchronous>, transform_indices = @transform_8, window_bounds = array<i64: 1, 256>}, {pipeline_mode = #tpu.pipeline_mode<synchronous>, transform_indices = @transform_9, window_bounds = array<i64: 256, 64>}, {pipeline_mode = #tpu.pipeline_mode<synchronous>, transform_indices = @transform_10, window_bounds = array<i64: 1, 64>}, {pipeline_mode = #tpu.pipeline_mode<synchronous>, transform_indices = @transform_11, window_bounds = array<i64: 1, 64>}, {pipeline_mode = #tpu.pipeline_mode<synchronous>, transform_indices = @transform_12, window_bounds = array<i64: 1, 64>}, {transform_indices = @transform_13, window_bounds = array<i64: 1, 16, 64>}]} {
    %c0 = arith.constant 0 : index
    %c0_0 = arith.constant 0 : index
    %c0_1 = arith.constant 0 : index
    %0 = vector.load %arg1[%c0, %c0_0, %c0_1] : memref<1x16x64xf32, #tpu.memory_space<vmem>>, vector<1x16x64xf32>
    %1 = vector.shape_cast %0 : vector<1x16x64xf32> to vector<16x64xf32>
    %2 = arith.truncf %1 : vector<16x64xf32> to vector<16x64xbf16>
    %c0_2 = arith.constant 0 : index
    %c0_3 = arith.constant 0 : index
    %3 = vector.load %arg2[%c0_2, %c0_3] : memref<64x192xbf16, #tpu.memory_space<vmem>>, vector<64x192xbf16>
    %cst = arith.constant dense<0.000000e+00> : vector<16x192xf32>
    %4 = tpu.matmul %2, %3, %cst {dimension_numbers = #tpu.dot_dimension_numbers<[1], [0], [0], [1], [0, 0, 1, 1], [], []>} : vector<16x64xbf16>, vector<64x192xbf16>, vector<16x192xf32> -> vector<16x192xf32>
    %c0_4 = arith.constant 0 : index
    %c0_5 = arith.constant 0 : index
    %5 = vector.load %arg3[%c0_4, %c0_5] : memref<1x192xf32, #tpu.memory_space<vmem>>, vector<1x192xf32>
    %6 = vector.broadcast %5 : vector<1x192xf32> to vector<16x192xf32>
    %7 = arith.addf %4, %6 : vector<16x192xf32>
    %8 = vector.extract_strided_slice %7 {offsets = [0, 0], sizes = [16, 16], strides = [1, 1]} : vector<16x192xf32> to vector<16x16xf32>
    %9 = vector.extract_strided_slice %7 {offsets = [0, 16], sizes = [16, 16], strides = [1, 1]} : vector<16x192xf32> to vector<16x16xf32>
    %10 = vector.extract_strided_slice %7 {offsets = [0, 32], sizes = [16, 16], strides = [1, 1]} : vector<16x192xf32> to vector<16x16xf32>
    %11 = vector.extract_strided_slice %7 {offsets = [0, 48], sizes = [16, 16], strides = [1, 1]} : vector<16x192xf32> to vector<16x16xf32>
    %12 = vector.shape_cast %8 : vector<16x16xf32> to vector<1x16x16xf32>
    %13 = vector.shape_cast %9 : vector<16x16xf32> to vector<1x16x16xf32>
    %14 = vector.shape_cast %10 : vector<16x16xf32> to vector<1x16x16xf32>
    %15 = vector.shape_cast %11 : vector<16x16xf32> to vector<1x16x16xf32>
    %16 = tpu.concatenate %12, %13, %14, %15 in 0 : vector<1x16x16xf32>, vector<1x16x16xf32>, vector<1x16x16xf32>, vector<1x16x16xf32> -> vector<4x16x16xf32>
    %17 = arith.truncf %16 : vector<4x16x16xf32> to vector<4x16x16xbf16>
    %18 = vector.extract_strided_slice %7 {offsets = [0, 64], sizes = [16, 16], strides = [1, 1]} : vector<16x192xf32> to vector<16x16xf32>
    %19 = vector.extract_strided_slice %7 {offsets = [0, 80], sizes = [16, 16], strides = [1, 1]} : vector<16x192xf32> to vector<16x16xf32>
    %20 = vector.extract_strided_slice %7 {offsets = [0, 96], sizes = [16, 16], strides = [1, 1]} : vector<16x192xf32> to vector<16x16xf32>
    %21 = vector.extract_strided_slice %7 {offsets = [0, 112], sizes = [16, 16], strides = [1, 1]} : vector<16x192xf32> to vector<16x16xf32>
    %22 = vector.shape_cast %18 : vector<16x16xf32> to vector<1x16x16xf32>
    %23 = vector.shape_cast %19 : vector<16x16xf32> to vector<1x16x16xf32>
    %24 = vector.shape_cast %20 : vector<16x16xf32> to vector<1x16x16xf32>
    %25 = vector.shape_cast %21 : vector<16x16xf32> to vector<1x16x16xf32>
    %26 = tpu.concatenate %22, %23, %24, %25 in 0 : vector<1x16x16xf32>, vector<1x16x16xf32>, vector<1x16x16xf32>, vector<1x16x16xf32> -> vector<4x16x16xf32>
    %27 = arith.truncf %26 : vector<4x16x16xf32> to vector<4x16x16xbf16>
    %28 = vector.extract_strided_slice %7 {offsets = [0, 128], sizes = [16, 16], strides = [1, 1]} : vector<16x192xf32> to vector<16x16xf32>
    %29 = vector.extract_strided_slice %7 {offsets = [0, 144], sizes = [16, 16], strides = [1, 1]} : vector<16x192xf32> to vector<16x16xf32>
    %30 = vector.extract_strided_slice %7 {offsets = [0, 160], sizes = [16, 16], strides = [1, 1]} : vector<16x192xf32> to vector<16x16xf32>
    %31 = vector.extract_strided_slice %7 {offsets = [0, 176], sizes = [16, 16], strides = [1, 1]} : vector<16x192xf32> to vector<16x16xf32>
    %32 = vector.shape_cast %28 : vector<16x16xf32> to vector<1x16x16xf32>
    %33 = vector.shape_cast %29 : vector<16x16xf32> to vector<1x16x16xf32>
    %34 = vector.shape_cast %30 : vector<16x16xf32> to vector<1x16x16xf32>
    %35 = vector.shape_cast %31 : vector<16x16xf32> to vector<1x16x16xf32>
    %36 = tpu.concatenate %32, %33, %34, %35 in 0 : vector<1x16x16xf32>, vector<1x16x16xf32>, vector<1x16x16xf32>, vector<1x16x16xf32> -> vector<4x16x16xf32>
    %37 = arith.truncf %36 : vector<4x16x16xf32> to vector<4x16x16xbf16>
    "tpu.trace_start"() <{level = 10 : i32, message = "gqd,gkd->gqk"}> : () -> ()
    %cst_6 = arith.constant dense<0.000000e+00> : vector<4x16x16xf32>
    %38 = tpu.matmul %17, %27, %cst_6 {dimension_numbers = #tpu.dot_dimension_numbers<[2], [2], [1], [1], [0, 0, 0, 1, 1, 1], [0], [0]>} : vector<4x16x16xbf16>, vector<4x16x16xbf16>, vector<4x16x16xf32> -> vector<4x16x16xf32>
    "tpu.trace_stop"() : () -> ()
    %cst_7 = arith.constant 2.500000e-01 : f32
    %39 = vector.broadcast %cst_7 : f32 to vector<4x16x16xf32>
    %40 = arith.mulf %38, %39 : vector<4x16x16xf32>
    %cst_8 = arith.constant dense<0xFF800000> : vector<4x16xf32>
    %41 = vector.multi_reduction <maximumf>, %40, %cst_8 [2] : vector<4x16x16xf32> to vector<4x16xf32>
    %42 = vector.shape_cast %41 : vector<4x16xf32> to vector<4x16x1xf32>
    %43 = vector.broadcast %42 : vector<4x16x1xf32> to vector<4x16x16xf32>
    %44 = arith.subf %40, %43 : vector<4x16x16xf32>
    %45 = math.exp %44 : vector<4x16x16xf32>
    %cst_9 = arith.constant dense<0.000000e+00> : vector<4x16xf32>
    %46 = vector.multi_reduction <add>, %45, %cst_9 [2] : vector<4x16x16xf32> to vector<4x16xf32>
    %47 = vector.shape_cast %46 : vector<4x16xf32> to vector<4x16x1xf32>
    %48 = tpu.reciprocal %47 {approx = true} : vector<4x16x1xf32> -> vector<4x16x1xf32>
    %49 = vector.broadcast %48 : vector<4x16x1xf32> to vector<4x16x16xf32>
    %50 = arith.mulf %45, %49 : vector<4x16x16xf32>
    %51 = arith.truncf %50 : vector<4x16x16xf32> to vector<4x16x16xbf16>
    "tpu.trace_start"() <{level = 10 : i32, message = "gqk,gkd->gqd"}> : () -> ()
    %cst_10 = arith.constant dense<0.000000e+00> : vector<4x16x16xf32>
    %52 = tpu.matmul %51, %37, %cst_10 {dimension_numbers = #tpu.dot_dimension_numbers<[2], [1], [1], [2], [0, 0, 0, 1, 1, 2], [0], [0]>} : vector<4x16x16xbf16>, vector<4x16x16xbf16>, vector<4x16x16xf32> -> vector<4x16x16xf32>
    "tpu.trace_stop"() : () -> ()
    %53 = vector.extract_strided_slice %52 {offsets = [0, 0, 0], sizes = [1, 16, 16], strides = [1, 1, 1]} : vector<4x16x16xf32> to vector<1x16x16xf32>
    %54 = vector.shape_cast %53 : vector<1x16x16xf32> to vector<16x16xf32>
    %55 = vector.extract_strided_slice %52 {offsets = [1, 0, 0], sizes = [1, 16, 16], strides = [1, 1, 1]} : vector<4x16x16xf32> to vector<1x16x16xf32>
    %56 = vector.shape_cast %55 : vector<1x16x16xf32> to vector<16x16xf32>
    %57 = vector.extract_strided_slice %52 {offsets = [2, 0, 0], sizes = [1, 16, 16], strides = [1, 1, 1]} : vector<4x16x16xf32> to vector<1x16x16xf32>
    %58 = vector.shape_cast %57 : vector<1x16x16xf32> to vector<16x16xf32>
    %59 = vector.extract_strided_slice %52 {offsets = [3, 0, 0], sizes = [1, 16, 16], strides = [1, 1, 1]} : vector<4x16x16xf32> to vector<1x16x16xf32>
    %60 = vector.shape_cast %59 : vector<1x16x16xf32> to vector<16x16xf32>
    %61 = tpu.concatenate %54, %56, %58, %60 in 1 : vector<16x16xf32>, vector<16x16xf32>, vector<16x16xf32>, vector<16x16xf32> -> vector<16x64xf32>
    %62 = arith.truncf %61 : vector<16x64xf32> to vector<16x64xbf16>
    %c0_11 = arith.constant 0 : index
    %c0_12 = arith.constant 0 : index
    %63 = vector.load %arg4[%c0_11, %c0_12] : memref<64x64xbf16, #tpu.memory_space<vmem>>, vector<64x64xbf16>
    %cst_13 = arith.constant dense<0.000000e+00> : vector<16x64xf32>
    %64 = tpu.matmul %62, %63, %cst_13 {dimension_numbers = #tpu.dot_dimension_numbers<[1], [0], [0], [1], [0, 0, 1, 1], [], []>} : vector<16x64xbf16>, vector<64x64xbf16>, vector<16x64xf32> -> vector<16x64xf32>
    %c0_14 = arith.constant 0 : index
    %c0_15 = arith.constant 0 : index
    %65 = vector.load %arg5[%c0_14, %c0_15] : memref<1x64xf32, #tpu.memory_space<vmem>>, vector<1x64xf32>
    %66 = vector.broadcast %65 : vector<1x64xf32> to vector<16x64xf32>
    %67 = arith.addf %64, %66 : vector<16x64xf32>
    %68 = arith.addf %1, %67 : vector<16x64xf32>
    %c0_16 = arith.constant 0 : index
    %c0_17 = arith.constant 0 : index
    %69 = vector.load %arg6[%c0_16, %c0_17] : memref<1x64xf32, #tpu.memory_space<vmem>>, vector<1x64xf32>
    %c0_18 = arith.constant 0 : index
    %c0_19 = arith.constant 0 : index
    %70 = vector.load %arg7[%c0_18, %c0_19] : memref<1x64xf32, #tpu.memory_space<vmem>>, vector<1x64xf32>
    %cst_20 = arith.constant dense<0.000000e+00> : vector<16xf32>
    %71 = vector.multi_reduction <add>, %68, %cst_20 [1] : vector<16x64xf32> to vector<16xf32>
    %72 = vector.shape_cast %71 : vector<16xf32> to vector<16x1xf32>
    %cst_21 = arith.constant 6.400000e+01 : f32
    %73 = vector.broadcast %cst_21 : f32 to vector<16x1xf32>
    %74 = arith.divf %72, %73 : vector<16x1xf32>
    %75 = vector.broadcast %74 : vector<16x1xf32> to vector<16x64xf32>
    %76 = arith.subf %68, %75 : vector<16x64xf32>
    %77 = arith.mulf %76, %76 : vector<16x64xf32>
    %cst_22 = arith.constant dense<0.000000e+00> : vector<16xf32>
    %78 = vector.multi_reduction <add>, %77, %cst_22 [1] : vector<16x64xf32> to vector<16xf32>
    %79 = vector.shape_cast %78 : vector<16xf32> to vector<16x1xf32>
    %cst_23 = arith.constant 6.400000e+01 : f32
    %80 = vector.broadcast %cst_23 : f32 to vector<16x1xf32>
    %81 = arith.divf %79, %80 : vector<16x1xf32>
    %82 = vector.broadcast %74 : vector<16x1xf32> to vector<16x64xf32>
    %83 = arith.subf %68, %82 : vector<16x64xf32>
    %cst_24 = arith.constant 9.99999996E-13 : f32
    %84 = vector.broadcast %cst_24 : f32 to vector<16x1xf32>
    %85 = arith.addf %81, %84 : vector<16x1xf32>
    %86 = math.rsqrt %85 : vector<16x1xf32>
    %87 = vector.broadcast %86 : vector<16x1xf32> to vector<16x64xf32>
    %88 = arith.mulf %83, %87 : vector<16x64xf32>
    %89 = vector.broadcast %69 : vector<1x64xf32> to vector<16x64xf32>
    %90 = arith.mulf %88, %89 : vector<16x64xf32>
    %91 = vector.broadcast %70 : vector<1x64xf32> to vector<16x64xf32>
    %92 = arith.addf %90, %91 : vector<16x64xf32>
    %93 = arith.truncf %92 : vector<16x64xf32> to vector<16x64xbf16>
    %c0_25 = arith.constant 0 : index
    %c0_26 = arith.constant 0 : index
    %94 = vector.load %arg8[%c0_25, %c0_26] : memref<64x256xbf16, #tpu.memory_space<vmem>>, vector<64x256xbf16>
    %cst_27 = arith.constant dense<0.000000e+00> : vector<16x256xf32>
    %95 = tpu.matmul %93, %94, %cst_27 {dimension_numbers = #tpu.dot_dimension_numbers<[1], [0], [0], [1], [0, 0, 1, 1], [], []>} : vector<16x64xbf16>, vector<64x256xbf16>, vector<16x256xf32> -> vector<16x256xf32>
    %c0_28 = arith.constant 0 : index
    %c0_29 = arith.constant 0 : index
    %96 = vector.load %arg9[%c0_28, %c0_29] : memref<1x256xf32, #tpu.memory_space<vmem>>, vector<1x256xf32>
    %97 = vector.broadcast %96 : vector<1x256xf32> to vector<16x256xf32>
    %98 = arith.addf %95, %97 : vector<16x256xf32>
    %cst_30 = arith.constant 5.000000e-01 : f32
    %99 = vector.broadcast %cst_30 : f32 to vector<16x256xf32>
    %100 = arith.mulf %98, %99 : vector<16x256xf32>
    %cst_31 = arith.constant 1.41421354 : f32
    %101 = vector.broadcast %cst_31 : f32 to vector<16x256xf32>
    %102 = arith.divf %98, %101 : vector<16x256xf32>
    %103 = math.erf %102 : vector<16x256xf32>
    %cst_32 = arith.constant 1.000000e+00 : f32
    %104 = vector.broadcast %cst_32 : f32 to vector<16x256xf32>
    %105 = arith.addf %104, %103 : vector<16x256xf32>
    %106 = arith.mulf %100, %105 : vector<16x256xf32>
    %107 = arith.truncf %106 : vector<16x256xf32> to vector<16x256xbf16>
    %c0_33 = arith.constant 0 : index
    %c0_34 = arith.constant 0 : index
    %108 = vector.load %arg10[%c0_33, %c0_34] : memref<256x64xbf16, #tpu.memory_space<vmem>>, vector<256x64xbf16>
    %cst_35 = arith.constant dense<0.000000e+00> : vector<16x64xf32>
    %109 = tpu.matmul %107, %108, %cst_35 {dimension_numbers = #tpu.dot_dimension_numbers<[1], [0], [0], [1], [0, 0, 1, 1], [], []>} : vector<16x256xbf16>, vector<256x64xbf16>, vector<16x64xf32> -> vector<16x64xf32>
    %c0_36 = arith.constant 0 : index
    %c0_37 = arith.constant 0 : index
    %110 = vector.load %arg11[%c0_36, %c0_37] : memref<1x64xf32, #tpu.memory_space<vmem>>, vector<1x64xf32>
    %111 = vector.broadcast %110 : vector<1x64xf32> to vector<16x64xf32>
    %112 = arith.addf %109, %111 : vector<16x64xf32>
    %113 = arith.addf %112, %92 : vector<16x64xf32>
    %c0_38 = arith.constant 0 : index
    %c0_39 = arith.constant 0 : index
    %114 = vector.load %arg12[%c0_38, %c0_39] : memref<1x64xf32, #tpu.memory_space<vmem>>, vector<1x64xf32>
    %c0_40 = arith.constant 0 : index
    %c0_41 = arith.constant 0 : index
    %115 = vector.load %arg13[%c0_40, %c0_41] : memref<1x64xf32, #tpu.memory_space<vmem>>, vector<1x64xf32>
    %cst_42 = arith.constant dense<0.000000e+00> : vector<16xf32>
    %116 = vector.multi_reduction <add>, %113, %cst_42 [1] : vector<16x64xf32> to vector<16xf32>
    %117 = vector.shape_cast %116 : vector<16xf32> to vector<16x1xf32>
    %cst_43 = arith.constant 6.400000e+01 : f32
    %118 = vector.broadcast %cst_43 : f32 to vector<16x1xf32>
    %119 = arith.divf %117, %118 : vector<16x1xf32>
    %120 = vector.broadcast %119 : vector<16x1xf32> to vector<16x64xf32>
    %121 = arith.subf %113, %120 : vector<16x64xf32>
    %122 = arith.mulf %121, %121 : vector<16x64xf32>
    %cst_44 = arith.constant dense<0.000000e+00> : vector<16xf32>
    %123 = vector.multi_reduction <add>, %122, %cst_44 [1] : vector<16x64xf32> to vector<16xf32>
    %124 = vector.shape_cast %123 : vector<16xf32> to vector<16x1xf32>
    %cst_45 = arith.constant 6.400000e+01 : f32
    %125 = vector.broadcast %cst_45 : f32 to vector<16x1xf32>
    %126 = arith.divf %124, %125 : vector<16x1xf32>
    %127 = vector.broadcast %119 : vector<16x1xf32> to vector<16x64xf32>
    %128 = arith.subf %113, %127 : vector<16x64xf32>
    %cst_46 = arith.constant 9.99999996E-13 : f32
    %129 = vector.broadcast %cst_46 : f32 to vector<16x1xf32>
    %130 = arith.addf %126, %129 : vector<16x1xf32>
    %131 = math.rsqrt %130 : vector<16x1xf32>
    %132 = vector.broadcast %131 : vector<16x1xf32> to vector<16x64xf32>
    %133 = arith.mulf %128, %132 : vector<16x64xf32>
    %134 = vector.broadcast %114 : vector<1x64xf32> to vector<16x64xf32>
    %135 = arith.mulf %133, %134 : vector<16x64xf32>
    %136 = vector.broadcast %115 : vector<1x64xf32> to vector<16x64xf32>
    %137 = arith.addf %135, %136 : vector<16x64xf32>
    %138 = vector.shape_cast %137 : vector<16x64xf32> to vector<1x16x64xf32>
    %c0_47 = arith.constant 0 : index
    %c0_48 = arith.constant 0 : index
    %c0_49 = arith.constant 0 : index
    %139 = vector.load %arg14[%c0_47, %c0_48, %c0_49] : memref<1x16x64xf32, #tpu.memory_space<vmem>>, vector<1x16x64xf32>
    tpu.vector_store %arg14[%c0_47, %c0_48, %c0_49], %138 {strides = array<i32>} : memref<1x16x64xf32, #tpu.memory_space<vmem>>, vector<1x16x64xf32>,
    return
  }
  func.func @transform_0(%arg0: i32) -> (i32, i32, i32) {
    %c0_i32 = arith.constant 0 : i32
    %c0_i32_0 = arith.constant 0 : i32
    %c0_i32_1 = arith.constant 0 : i32
    return %arg0, %c0_i32, %c0_i32_0 : i32, i32, i32
  }
  func.func @transform_1(%arg0: i32) -> (i32, i32) {
    %c0_i32 = arith.constant 0 : i32
    %c0_i32_0 = arith.constant 0 : i32
    %c0_i32_1 = arith.constant 0 : i32
    return %c0_i32, %c0_i32_0 : i32, i32
  }
  func.func @transform_2(%arg0: i32) -> (i32, i32) {
    %c0_i32 = arith.constant 0 : i32
    %c0_i32_0 = arith.constant 0 : i32
    %c0_i32_1 = arith.constant 0 : i32
    return %c0_i32, %c0_i32_0 : i32, i32
  }
  func.func @transform_3(%arg0: i32) -> (i32, i32) {
    %c0_i32 = arith.constant 0 : i32
    %c0_i32_0 = arith.constant 0 : i32
    %c0_i32_1 = arith.constant 0 : i32
    return %c0_i32, %c0_i32_0 : i32, i32
  }
  func.func @transform_4(%arg0: i32) -> (i32, i32) {
    %c0_i32 = arith.constant 0 : i32
    %c0_i32_0 = arith.constant 0 : i32
    %c0_i32_1 = arith.constant 0 : i32
    return %c0_i32, %c0_i32_0 : i32, i32
  }
  func.func @transform_5(%arg0: i32) -> (i32, i32) {
    %c0_i32 = arith.constant 0 : i32
    %c0_i32_0 = arith.constant 0 : i32
    %c0_i32_1 = arith.constant 0 : i32
    return %c0_i32, %c0_i32_0 : i32, i32
  }
  func.func @transform_6(%arg0: i32) -> (i32, i32) {
    %c0_i32 = arith.constant 0 : i32
    %c0_i32_0 = arith.constant 0 : i32
    %c0_i32_1 = arith.constant 0 : i32
    return %c0_i32, %c0_i32_0 : i32, i32
  }
  func.func @transform_7(%arg0: i32) -> (i32, i32) {
    %c0_i32 = arith.constant 0 : i32
    %c0_i32_0 = arith.constant 0 : i32
    %c0_i32_1 = arith.constant 0 : i32
    return %c0_i32, %c0_i32_0 : i32, i32
  }
  func.func @transform_8(%arg0: i32) -> (i32, i32) {
    %c0_i32 = arith.constant 0 : i32
    %c0_i32_0 = arith.constant 0 : i32
    %c0_i32_1 = arith.constant 0 : i32
    return %c0_i32, %c0_i32_0 : i32, i32
  }
  func.func @transform_9(%arg0: i32) -> (i32, i32) {
    %c0_i32 = arith.constant 0 : i32
    %c0_i32_0 = arith.constant 0 : i32
    %c0_i32_1 = arith.constant 0 : i32
    return %c0_i32, %c0_i32_0 : i32, i32
  }
  func.func @transform_10(%arg0: i32) -> (i32, i32) {
    %c0_i32 = arith.constant 0 : i32
    %c0_i32_0 = arith.constant 0 : i32
    %c0_i32_1 = arith.constant 0 : i32
    return %c0_i32, %c0_i32_0 : i32, i32
  }
  func.func @transform_11(%arg0: i32) -> (i32, i32) {
    %c0_i32 = arith.constant 0 : i32
    %c0_i32_0 = arith.constant 0 : i32
    %c0_i32_1 = arith.constant 0 : i32
    return %c0_i32, %c0_i32_0 : i32, i32
  }
  func.func @transform_12(%arg0: i32) -> (i32, i32) {
    %c0_i32 = arith.constant 0 : i32
    %c0_i32_0 = arith.constant 0 : i32
    %c0_i32_1 = arith.constant 0 : i32
    return %c0_i32, %c0_i32_0 : i32, i32
  }
  func.func @transform_13(%arg0: i32) -> (i32, i32, i32) {
    %c0_i32 = arith.constant 0 : i32
    %c0_i32_0 = arith.constant 0 : i32
    %c0_i32_1 = arith.constant 0 : i32
    return %arg0, %c0_i32, %c0_i32_0 : i32, i32, i32
  }
}

</mosaic_0001>

<bundles_post_ra>
// kernel: tpu_custom_call.1
= control target key start
LH: loop header
LB: loop body
LE: loop exit
PB: predicated region body
PF: predicated region fallthrough
CT: control target
= control target key end

     0   :  { %s3631_s0 = inlined_call_operand.hbm [shape: f32[2,16,64], index: 0, kind: input, shape index: {}]   ;;  %s3632_s1 = inlined_call_operand.hbm [shape: bf16[64,192], index: 1, kind: input, shape index: {}]   ;;  %s3633_s2 = inlined_call_operand.hbm [shape: f32[1,192], index: 2, kind: input, shape index: {}]   ;;  %s3634_s3 = inlined_call_operand.hbm [shape: bf16[64,64], index: 3, kind: input, shape index: {}]   ;;  %s3635_s4 = inlined_call_operand.hbm [shape: f32[1,64], index: 4, kind: input, shape index: {}]   ;;  %s3636_s5 = inlined_call_operand.hbm [shape: f32[1,64], index: 5, kind: input, shape index: {}]   ;;  %s3637_s6 = inlined_call_operand.hbm [shape: f32[1,64], index: 6, kind: input, shape index: {}]   ;;  %s3638_s7 = inlined_call_operand.hbm [shape: bf16[64,256], index: 7, kind: input, shape index: {}]   ;;  %s3639_s8 = inlined_call_operand.hbm [shape: f32[1,256], index: 8, kind: input, shape index: {}]   ;;  %s3640_s9 = inlined_call_operand.hbm [shape: bf16[256,64], index: 9, kind: input, shape index: {}]   ;;  %s3641_s10 = inlined_call_operand.hbm [shape: f32[1,64], index: 10, kind: input, shape index: {}]   ;;  %s3642_s11 = inlined_call_operand.hbm [shape: f32[1,64], index: 11, kind: input, shape index: {}]   ;;  %s3643_s12 = inlined_call_operand.hbm [shape: f32[1,64], index: 12, kind: input, shape index: {}]   ;;  %s3644_s13 = inlined_call_operand.hbm [shape: f32[2,16,64], index: 13, kind: output, shape index: {}]  }
   0x1   :  { %3659 = sst [smem:[#allocation35_spill]] %s3631_s0 }
   0x2   :  { %3660 = sst [smem:[#allocation36_spill]] %s3632_s1 }
   0x3   :  { %3661 = sst [smem:[#allocation37_spill]] %s3634_s3 }
   0x4   :  { %3662 = sst [smem:[#allocation38_spill]] %s3644_s13 }
   0x5   :  { %18 = vsyncpa [#allocation3], 0 }
   0x6   :  { %20 = vsyncpa [#allocation3 + $0x1], 0 }
   0x7   :  { %21 = vsyncpa [#allocation6], 0 }
   0x8   :  { %22 = vsyncpa [#allocation9], 0 }
   0x9   :  { %23 = vsyncpa [#allocation12], 0 }
   0xa   :  { %24 = vsyncpa [#allocation15], 0 }
   0xb   :  { %25 = vsyncpa [#allocation18], 0 }
   0xc   :  { %26 = vsyncpa [#allocation21], 0 }
   0xd   :  { %27 = vsyncpa [#allocation4], 0 }
   0xe   :  { %29 = vsyncpa [#allocation4 + $0x1], 0  ;;  %s3045_s25 = smov 0   ;;  %s3047_s26 = smov 0  }
   0xf   :  { %s3049_s27 = smov 0   ;;  %s3051_s28 = smov 0  }
  0x10 LB: > { %3663 = sst [smem:[#allocation32_spill]] %s2931_s25  ;;  %s2945_s29 = smov [#allocation5]   ;;  %s2943_s28 = sphi %s3051_s28, %s3707_s28   ;;  %s2939_s27 = sphi %s3049_s27, %s3706_s27   ;;  %s2935_s26 = sphi %s3047_s26, %s3705_s26   ;;  %s2931_s25 = sphi %s3045_s25, %s3704_s25  }
  0x11   : > { %s356_s30 = sshll.u32 %s2945_s29, 4  ;;  %s3066_s14 = sadd.s32 4294967295, %s2943_s28   ;;  %s3071_s30 = int_to_ptr.vmem [resolvable:$true] %s356_s30 }
  0x12   : > { %3664 = sst [smem:[#allocation33_spill]] %s3066_s14  ;;  %p1972_p0 = scmp.ge.s32.totalorder %s2943_s28, 1 }
  0x13   : > { %p3653_p1 = scmp.eq.s32.totalorder %s3066_s14, 0  ;;  %p344_p2 = scmp.lt.s32.totalorder %s2943_s28, 3 }
  0x14   : > { %s2946_s16 = smov [#allocation8]   ;;  %s2947_s19 = smov [#allocation11]  }
  0x15   : > { %p3073_p3 = pnand %p1972_p0, %p344_p2  ;;  %s380_s17 = sshll.u32 %s2946_s16, 4  ;;  %s3086_s17 = int_to_ptr.vmem [resolvable:$true] %s380_s17 }
  0x16   : > { %s3088_s20 = sshll.u32 %s2947_s19, 4  ;;  %s3668_s1 = sld [smem:[#allocation36_spill]]  ;;  %s406_s20 = int_to_ptr.vmem [resolvable:$true] %s3088_s20 }
  0x17   : > { %s3665_s15 = scalar_select %p3073_p3, 1, 0 }
  0x18   : > { %p2219_p5 = pneg %p3073_p3 }
  0x19   : > { %3666 = sst [smem:[#allocation34_spill]] %s3665_s15 }
  0x1a   : > { %p3082_p6 = pnand %p2219_p5, %p3653_p1 }
  0x1c   : > { %s2487_s23 = scalar_lea.hbm %s3668_s1, 1024  ;;  %p3098_p8 = pneg %p3082_p6 }
  0x1d   : > { %p2488_p7 = scmp.ne.s32.totalorder %s3668_s1, %s2487_s23  ;;  %p2494_p11 = scmp.lt.u32.totalorder %s2487_s23, %s3668_s1 }
  0x1f   : > { %p2490_p9 = pnand %p3098_p8, %p2488_p7 }
  0x21   : > { %p2491_p10 = pneg %p2490_p9 }
  0x23   : > { %p2496_p12 = pnand %p2494_p11, %p2491_p10 }
  0x25   : > { %2499 = shalt.err (!%p2496_p12)
}
  0x26   : > { %s2500_s21 = scalar_lea.vmem %s3071_s30, 1024  ;;  %p2508_p5 = scmp.lt.s32.totalorder %s3071_s30, %s3071_s30 }
  0x27   : > { %p2501_p13 = scmp.ne.s32.totalorder %s3071_s30, %s2500_s21  ;;  %p2509_p4 = scmp.lt.s32.totalorder %s2500_s21, %s2500_s21 }
  0x29   : > { %p2503_p0 = pnand %p2501_p13, %p3098_p8  ;;  %p2510_p7 = por %p2509_p4, %p2508_p5 }
  0x2b   : > { %p2504_p2 = pneg %p2503_p0 }
  0x2d   : > { %p2511_p9 = pnand %p2510_p7, %p2504_p2 }
  0x2f   : > { %2514 = shalt.err (!%p2511_p9)
}
  0x30   : > { %s3651_s22 = smov 128   ;;  %s3657_s13 = smov 8  }
  0x31   : > { %2222 = dma.hbm_to_vmem [thread:$0]  (!%p3082_p6), %s3668_s1, 1024, %s3071_s30, [#allocation6], %s3651_s22, %s3651_s22, %s3657_s13  }
  0x32   : > { %s3670_s3 = sld [smem:[#allocation37_spill]] }
  0x38   : > { %s2515_s21 = scalar_lea.hbm %s3670_s3, 512 }
  0x39   : > { %p2516_p4 = scmp.ne.s32.totalorder %s3670_s3, %s2515_s21  ;;  %p2522_p12 = scmp.lt.u32.totalorder %s2515_s21, %s3670_s3 }
  0x3b   : > { %p2518_p10 = pnand %p2516_p4, %p3098_p8 }
  0x3d   : > { %p2519_p11 = pneg %p2518_p10 }
  0x3f   : > { %p2524_p13 = pnand %p2522_p12, %p2519_p11 }
  0x41   : > { %2527 = shalt.err (!%p2524_p13)
}
  0x42   : > { %s2528_s30 = scalar_lea.vmem %s3086_s17, 512  ;;  %p2536_p7 = scmp.lt.s32.totalorder %s3086_s17, %s3086_s17 }
  0x43   : > { %p2529_p0 = scmp.ne.s32.totalorder %s3086_s17, %s2528_s30  ;;  %p2537_p9 = scmp.lt.s32.totalorder %s2528_s30, %s2528_s30 }
  0x45   : > { %p2531_p2 = pnand %p2529_p0, %p3098_p8  ;;  %p2538_p4 = por %p2537_p9, %p2536_p7 }
  0x47   : > { %p2532_p5 = pneg %p2531_p2 }
  0x49   : > { %p2539_p10 = pnand %p2538_p4, %p2532_p5 }
  0x4b   : > { %2542 = shalt.err (!%p2539_p10)
}
  0x4c   : > { %s3655_s0 = smov 64   ;;  %s3656_s25 = smov 4  }
  0x4d   : > { %2228 = dma.hbm_to_vmem [thread:$0]  (!%p3082_p6), %s3670_s3, 512, %s3086_s17, [#allocation9], %s3655_s0, %s3655_s0, %s3656_s25  }
  0x4e   : > { %s2543_s29 = scalar_lea.hbm %s3636_s5, 16 }
  0x4f   : > { %p2544_p11 = scmp.ne.s32.totalorder %s3636_s5, %s2543_s29  ;;  %p2550_p0 = scmp.lt.u32.totalorder %s2543_s29, %s3636_s5 }
  0x51   : > { %p2546_p12 = pnand %p2544_p11, %p3098_p8 }
  0x53   : > { %p2547_p13 = pneg %p2546_p12 }
  0x55   : > { %p2552_p2 = pnand %p2550_p0, %p2547_p13 }
  0x57   : > { %2555 = shalt.err (!%p2552_p2)
}
  0x58   : > { %s2556_s14 = scalar_lea.vmem %s406_s20, 16  ;;  %s2563_s17 = scalar_lea.vmem %s406_s20, 32 }
  0x59   : > { %p2557_p5 = scmp.ne.s32.totalorder %s406_s20, %s2556_s14  ;;  %p2564_p4 = scmp.lt.s32.totalorder %s406_s20, %s406_s20 }
  0x5a   : > { %p2565_p10 = scmp.lt.s32.totalorder %s2563_s17, %s2556_s14 }
  0x5b   : > { %p2559_p7 = pnand %p2557_p5, %p3098_p8 }
  0x5c   : > { %p2566_p1 = por %p2565_p10, %p2564_p4 }
  0x5d   : > { %p2560_p9 = pneg %p2559_p7 }
  0x5f   : > { %p2567_p3 = pnand %p2566_p1, %p2560_p9 }
  0x61   : > { %2570 = shalt.err (!%p2567_p3)
}
  0x62   : > { %2234 = dma.hbm_to_vmem [thread:$0]  (!%p3082_p6), %s3636_s5, 16, %s406_s20, [#allocation12]  }
  0x63   : > { %s2952_s22 = smov [#allocation14]   ;;  %s2953_s29 = smov [#allocation17]  }
  0x64   : > { %s426_s24 = sshll.u32 %s2952_s22, 4  ;;  %s450_s19 = sshll.u32 %s2953_s29, 4  ;;  %s427_s24 = int_to_ptr.vmem [resolvable:$true] %s426_s24  ;;  %s451_s19 = int_to_ptr.vmem [resolvable:$true] %s450_s19 }
  0x65   : > { %s2571_s0 = scalar_lea.hbm %s3638_s7, 1024 }
  0x66   : > { %p2572_p1 = scmp.ne.s32.totalorder %s3638_s7, %s2571_s0  ;;  %p2578_p12 = scmp.lt.u32.totalorder %s2571_s0, %s3638_s7 }
  0x68   : > { %p2574_p3 = pnand %p2572_p1, %p3098_p8 }
  0x6a   : > { %p2575_p11 = pneg %p2574_p3 }
  0x6c   : > { %p2580_p13 = pnand %p2578_p12, %p2575_p11 }
  0x6e   : > { %2583 = shalt.err (!%p2580_p13)
}
  0x6f   : > { %s2584_s20 = scalar_lea.vmem %s427_s24, 1024  ;;  %p2592_p7 = scmp.lt.s32.totalorder %s427_s24, %s427_s24 }
  0x70   : > { %p2585_p0 = scmp.ne.s32.totalorder %s427_s24, %s2584_s20  ;;  %p2593_p9 = scmp.lt.s32.totalorder %s2584_s20, %s2584_s20 }
  0x72   : > { %p2587_p2 = pnand %p2585_p0, %p3098_p8  ;;  %p2594_p4 = por %p2593_p9, %p2592_p7 }
  0x74   : > { %p2588_p5 = pneg %p2587_p2 }
  0x76   : > { %p2595_p10 = pnand %p2594_p4, %p2588_p5 }
  0x78   : > { %2598 = shalt.err (!%p2595_p10)
}
  0x79   : > { %s3671_s23 = smov 128   ;;  %s2599_s21 = scalar_lea.hbm %s3640_s9, 2048 }
  0x7a   : > { %2240 = dma.hbm_to_vmem [thread:$0]  (!%p3082_p6), %s3638_s7, 1024, %s427_s24, [#allocation15], %s3671_s23, %s3671_s23, %s3657_s13  }
  0x7b   : > { %p2600_p1 = scmp.ne.s32.totalorder %s3640_s9, %s2599_s21  ;;  %p2606_p12 = scmp.lt.u32.totalorder %s2599_s21, %s3640_s9 }
  0x7d   : > { %p2602_p3 = pnand %p2600_p1, %p3098_p8 }
  0x7f   : > { %p2603_p11 = pneg %p2602_p3 }
  0x81   : > { %p2608_p13 = pnand %p2606_p12, %p2603_p11 }
  0x83   : > { %2611 = shalt.err (!%p2608_p13)
}
  0x84   : > { %s2612_s20 = scalar_lea.vmem %s451_s19, 2048  ;;  %p2620_p7 = scmp.lt.s32.totalorder %s451_s19, %s451_s19 }
  0x85   : > { %p2613_p0 = scmp.ne.s32.totalorder %s451_s19, %s2612_s20  ;;  %p2621_p9 = scmp.lt.s32.totalorder %s2612_s20, %s2612_s20 }
  0x87   : > { %p2615_p2 = pnand %p2613_p0, %p3098_p8  ;;  %p2622_p4 = por %p2621_p9, %p2620_p7 }
  0x89   : > { %p2616_p5 = pneg %p2615_p2 }
  0x8b   : > { %p2623_p10 = pnand %p2622_p4, %p2616_p5 }
  0x8d   : > { %2626 = shalt.err (!%p2623_p10)
}
  0x8e   : > { %s3672_s24 = smov 4   ;;  %s3673_s25 = smov 64  }
  0x8f   : > { %2246 = dma.hbm_to_vmem [thread:$0]  (!%p3082_p6), %s3640_s9, 2048, %s451_s19, [#allocation18], %s3673_s25, %s3673_s25, %s3672_s24  }
  0x90   : > { %s2954_s29 = smov [#allocation20]   ;;  %s2955_s30 = smov [#allocation7]  }
  0x91   : > { %s475_s21 = sshll.u32 %s2954_s29, 4  ;;  %s370_s14 = sshll.u32 %s2955_s30, 4  ;;  %s476_s21 = int_to_ptr.vmem [resolvable:$true] %s475_s21  ;;  %s371_s14 = int_to_ptr.vmem [resolvable:$true] %s370_s14 }
  0x92   : > { %s2627_s20 = scalar_lea.hbm %s3642_s11, 16 }
  0x93   : > { %p2628_p1 = scmp.ne.s32.totalorder %s3642_s11, %s2627_s20  ;;  %p2634_p12 = scmp.lt.u32.totalorder %s2627_s20, %s3642_s11 }
  0x95   : > { %p2630_p3 = pnand %p2628_p1, %p3098_p8 }
  0x97   : > { %p2631_p11 = pneg %p2630_p3 }
  0x99   : > { %p2636_p13 = pnand %p2634_p12, %p2631_p11 }
  0x9b   : > { %2639 = shalt.err (!%p2636_p13)
}
  0x9c   : > { %s2640_s19 = scalar_lea.vmem %s476_s21, 16  ;;  %s2647_s24 = scalar_lea.vmem %s476_s21, 32 }
  0x9d   : > { %p2641_p0 = scmp.ne.s32.totalorder %s476_s21, %s2640_s19  ;;  %p2648_p7 = scmp.lt.s32.totalorder %s476_s21, %s476_s21 }
  0x9e   : > { %p2649_p9 = scmp.lt.s32.totalorder %s2647_s24, %s2640_s19 }
  0x9f   : > { %p2643_p2 = pnand %p2641_p0, %p3098_p8 }
  0xa0   : > { %p2650_p4 = por %p2649_p9, %p2648_p7 }
  0xa1   : > { %p2644_p5 = pneg %p2643_p2 }
  0xa3   : > { %p2651_p10 = pnand %p2650_p4, %p2644_p5 }
  0xa5   : > { %2654 = shalt.err (!%p2651_p10)
}
  0xa6   : > { %2252 = dma.hbm_to_vmem [thread:$0]  (!%p3082_p6), %s3642_s11, 16, %s476_s21, [#allocation21]  }
  0xa7   : > { %s2655_s22 = scalar_lea.hbm %s3633_s2, 32 }
  0xa8   : > { %p2656_p1 = scmp.ne.s32.totalorder %s3633_s2, %s2655_s22  ;;  %p2662_p12 = scmp.lt.u32.totalorder %s2655_s22, %s3633_s2 }
  0xaa   : > { %p2658_p3 = pnand %p2656_p1, %p3098_p8 }
  0xac   : > { %p2659_p11 = pneg %p2658_p3 }
  0xae   : > { %p2664_p13 = pnand %p2662_p12, %p2659_p11 }
  0xb0   : > { %2667 = shalt.err (!%p2664_p13)
}
  0xb1   : > { %s2668_s20 = scalar_lea.vmem %s371_s14, 32  ;;  %p2676_p7 = scmp.lt.s32.totalorder %s371_s14, %s371_s14 }
  0xb2   : > { %p2669_p0 = scmp.ne.s32.totalorder %s371_s14, %s2668_s20  ;;  %p2677_p9 = scmp.lt.s32.totalorder %s2668_s20, %s2668_s20 }
  0xb4   : > { %p2671_p2 = pnand %p2669_p0, %p3098_p8  ;;  %p2678_p4 = por %p2677_p9, %p2676_p7 }
  0xb6   : > { %p2672_p5 = pneg %p2671_p2 }
  0xb8   : > { %p2679_p10 = pnand %p2678_p4, %p2672_p5 }
  0xba   : > { %2682 = shalt.err (!%p2679_p10)
}
  0xbb   : > { %2225 = dma.hbm_to_vmem [thread:$0]  (!%p3082_p6), %s3633_s2, 32, %s371_s14, [#allocation6]  }
  0xbc   : > { %s2956_s19 = smov [#allocation10]   ;;  %s2957_s1 = smov [#allocation13]  }
  0xbd   : > { %s394_s24 = sshll.u32 %s2956_s19, 4  ;;  %s416_s13 = sshll.u32 %s2957_s1, 4  ;;  %s395_s24 = int_to_ptr.vmem [resolvable:$true] %s394_s24  ;;  %s417_s13 = int_to_ptr.vmem [resolvable:$true] %s416_s13 }
  0xbe   : > { %s2683_s22 = scalar_lea.hbm %s3635_s4, 16 }
  0xbf   : > { %p2684_p1 = scmp.ne.s32.totalorder %s3635_s4, %s2683_s22  ;;  %p2690_p12 = scmp.lt.u32.totalorder %s2683_s22, %s3635_s4 }
  0xc1   : > { %p2686_p3 = pnand %p2684_p1, %p3098_p8 }
  0xc3   : > { %p2687_p11 = pneg %p2686_p3 }
  0xc5   : > { %p2692_p13 = pnand %p2690_p12, %p2687_p11 }
  0xc7   : > { %2695 = shalt.err (!%p2692_p13)
}
  0xc8   : > { %s2696_s14 = scalar_lea.vmem %s395_s24, 16  ;;  %s2703_s20 = scalar_lea.vmem %s395_s24, 32 }
  0xc9   : > { %p2697_p0 = scmp.ne.s32.totalorder %s395_s24, %s2696_s14  ;;  %p2704_p7 = scmp.lt.s32.totalorder %s395_s24, %s395_s24 }
  0xca   : > { %p2705_p9 = scmp.lt.s32.totalorder %s2703_s20, %s2696_s14 }
  0xcb   : > { %p2699_p2 = pnand %p2697_p0, %p3098_p8 }
  0xcc   : > { %p2706_p4 = por %p2705_p9, %p2704_p7 }
  0xcd   : > { %p2700_p5 = pneg %p2699_p2 }
  0xcf   : > { %p2707_p10 = pnand %p2706_p4, %p2700_p5 }
  0xd1   : > { %2710 = shalt.err (!%p2707_p10)
}
  0xd2   : > { %2231 = dma.hbm_to_vmem [thread:$0]  (!%p3082_p6), %s3635_s4, 16, %s395_s24, [#allocation9]  }
  0xd3   : > { %s2711_s3 = scalar_lea.hbm %s3637_s6, 16 }
  0xd4   : > { %p2712_p1 = scmp.ne.s32.totalorder %s3637_s6, %s2711_s3  ;;  %p2718_p12 = scmp.lt.u32.totalorder %s2711_s3, %s3637_s6 }
  0xd6   : > { %p2714_p3 = pnand %p2712_p1, %p3098_p8 }
  0xd8   : > { %p2715_p11 = pneg %p2714_p3 }
  0xda   : > { %p2720_p13 = pnand %p2718_p12, %p2715_p11 }
  0xdc   : > { %2723 = shalt.err (!%p2720_p13)
}
  0xdd   : > { %s2724_s17 = scalar_lea.vmem %s417_s13, 16  ;;  %s2731_s24 = scalar_lea.vmem %s417_s13, 32 }
  0xde   : > { %p2725_p0 = scmp.ne.s32.totalorder %s417_s13, %s2724_s17  ;;  %p2732_p7 = scmp.lt.s32.totalorder %s417_s13, %s417_s13 }
  0xdf   : > { %p2733_p9 = scmp.lt.s32.totalorder %s2731_s24, %s2724_s17 }
  0xe0   : > { %p2727_p2 = pnand %p2725_p0, %p3098_p8 }
  0xe1   : > { %p2734_p4 = por %p2733_p9, %p2732_p7 }
  0xe2   : > { %p2728_p5 = pneg %p2727_p2 }
  0xe4   : > { %p2735_p10 = pnand %p2734_p4, %p2728_p5 }
  0xe6   : > { %2738 = shalt.err (!%p2735_p10)
}
  0xe7   : > { %2237 = dma.hbm_to_vmem [thread:$0]  (!%p3082_p6), %s3637_s6, 16, %s417_s13, [#allocation12]  }
  0xe8   : > { %s2958_s20 = smov [#allocation16]   ;;  %s2959_s0 = smov [#allocation19]  }
  0xe9   : > { %s440_s21 = sshll.u32 %s2958_s20, 4  ;;  %s464_s19 = sshll.u32 %s2959_s0, 4  ;;  %s441_s21 = int_to_ptr.vmem [resolvable:$true] %s440_s21  ;;  %s465_s19 = int_to_ptr.vmem [resolvable:$true] %s464_s19 }
  0xea   : > { %s2739_s25 = scalar_lea.hbm %s3639_s8, 32 }
  0xeb   : > { %p2740_p1 = scmp.ne.s32.totalorder %s3639_s8, %s2739_s25  ;;  %p2746_p12 = scmp.lt.u32.totalorder %s2739_s25, %s3639_s8 }
  0xed   : > { %p2742_p3 = pnand %p2740_p1, %p3098_p8 }
  0xef   : > { %p2743_p11 = pneg %p2742_p3 }
  0xf1   : > { %p2748_p13 = pnand %p2746_p12, %p2743_p11 }
  0xf3   : > { %2751 = shalt.err (!%p2748_p13)
}
  0xf4   : > { %s2752_s13 = scalar_lea.vmem %s441_s21, 32  ;;  %p2760_p7 = scmp.lt.s32.totalorder %s441_s21, %s441_s21 }
  0xf5   : > { %p2753_p0 = scmp.ne.s32.totalorder %s441_s21, %s2752_s13  ;;  %p2761_p9 = scmp.lt.s32.totalorder %s2752_s13, %s2752_s13 }
  0xf7   : > { %p2755_p2 = pnand %p2753_p0, %p3098_p8  ;;  %p2762_p4 = por %p2761_p9, %p2760_p7 }
  0xf9   : > { %p2756_p5 = pneg %p2755_p2 }
  0xfb   : > { %p2763_p10 = pnand %p2762_p4, %p2756_p5 }
  0xfd   : > { %2766 = shalt.err (!%p2763_p10)
}
  0xfe   : > { %2243 = dma.hbm_to_vmem [thread:$0]  (!%p3082_p6), %s3639_s8, 32, %s441_s21, [#allocation15]  }
  0xff   : > { %s2767_s0 = scalar_lea.hbm %s3641_s10, 16 }
 0x100   : > { %p2768_p1 = scmp.ne.s32.totalorder %s3641_s10, %s2767_s0  ;;  %p2774_p12 = scmp.lt.u32.totalorder %s2767_s0, %s3641_s10 }
 0x102   : > { %p2770_p3 = pnand %p2768_p1, %p3098_p8 }
 0x104   : > { %p2771_p11 = pneg %p2770_p3 }
 0x106   : > { %p2776_p13 = pnand %p2774_p12, %p2771_p11 }
 0x108   : > { %2779 = shalt.err (!%p2776_p13)
}
 0x109   : > { %s2780_s29 = scalar_lea.vmem %s465_s19, 16  ;;  %s2787_s21 = scalar_lea.vmem %s465_s19, 32 }
 0x10a   : > { %p2781_p0 = scmp.ne.s32.totalorder %s465_s19, %s2780_s29  ;;  %p2788_p7 = scmp.lt.s32.totalorder %s465_s19, %s465_s19 }
 0x10b   : > { %p2789_p9 = scmp.lt.s32.totalorder %s2787_s21, %s2780_s29 }
 0x10c   : > { %p2783_p2 = pnand %p2781_p0, %p3098_p8 }
 0x10d   : > { %p2790_p4 = por %p2789_p9, %p2788_p7 }
 0x10e   : > { %p2784_p5 = pneg %p2783_p2 }
 0x110   : > { %p2791_p10 = pnand %p2790_p4, %p2784_p5 }
 0x112   : > { %2794 = shalt.err (!%p2791_p10)
}
 0x113   : > { %2249 = dma.hbm_to_vmem [thread:$0]  (!%p3082_p6), %s3641_s10, 16, %s465_s19, [#allocation18]  }
 0x114   : > { %s2960_s13 = smov [#allocation22]   ;;  %s2795_s20 = scalar_lea.hbm %s3643_s12, 16 }
 0x115   : > { %s486_s24 = sshll.u32 %s2960_s13, 4  ;;  %p2796_p1 = scmp.ne.s32.totalorder %s3643_s12, %s2795_s20  ;;  %s487_s24 = int_to_ptr.vmem [resolvable:$true] %s486_s24 }
 0x116   : > { %p2802_p12 = scmp.lt.u32.totalorder %s2795_s20, %s3643_s12 }
 0x117   : > { %p2798_p3 = pnand %p2796_p1, %p3098_p8 }
 0x119   : > { %p2799_p11 = pneg %p2798_p3 }
 0x11b   : > { %p2804_p13 = pnand %p2802_p12, %p2799_p11 }
 0x11d   : > { %2807 = shalt.err (!%p2804_p13)
}
 0x11e   : > { %s2808_s19 = scalar_lea.vmem %s487_s24, 16  ;;  %s2815_s22 = scalar_lea.vmem %s487_s24, 32 }
 0x11f   : > { %p2809_p0 = scmp.ne.s32.totalorder %s487_s24, %s2808_s19  ;;  %p2816_p7 = scmp.lt.s32.totalorder %s487_s24, %s487_s24 }
 0x120   : > { %p2817_p9 = scmp.lt.s32.totalorder %s2815_s22, %s2808_s19 }
 0x121   : > { %p2811_p2 = pnand %p2809_p0, %p3098_p8 }
 0x122   : > { %p2818_p4 = por %p2817_p9, %p2816_p7 }
 0x123   : > { %p2812_p5 = pneg %p2811_p2 }
 0x125   : > { %p2819_p10 = pnand %p2818_p4, %p2812_p5 }
 0x127   : > { %2822 = shalt.err (!%p2819_p10)
}
 0x128   : > { %s3674_s16 = sld [smem:[#allocation32_spill]]  ;;  %s3675_s30 = sld [smem:[#allocation33_spill]] }
 0x129   : > { %2255 = dma.hbm_to_vmem [thread:$0]  (!%p3082_p6), %s3643_s12, 16, %s487_s24, [#allocation21]  }
 0x12a   : > { %s1971_s17 = sadd.s32 4294967294, %s2943_s28   ;;  %s3337_s18 = sadd.s32 1, %s2943_s28  }
 0x12b   : > { %s39_s13 = ssub.s32 %s2943_s28, %s3337_s18  ;;  %s42_s15 = sadd.s32 1, %s2939_s27 }
 0x12c   : > { %p40_p8 = scmp.eq.s32.totalorder %s39_s13, 0  ;;  %p49_p1 = scmp.ne.s32.totalorder %s2939_s27, %s2935_s26 }
 0x12d   : > { %p50_p3 = scmp.eq.s32.totalorder %s2943_s28, 0  ;;  %p337_p2 = scmp.eq.s32.totalorder %s1971_s17, 1 }
 0x12e   : > { %p55_p11 = scmp.ne.s32.totalorder %s2935_s26, %s3674_s16  ;;  %p3677_p13 = scmp.eq.s32.totalorder %s3675_s30, 0 }
 0x12f   : > { %s3348_s14 = scalar_select %p40_p8, %s2939_s27, %s42_s15  }
 0x130   : > { %p3350_p12 = por %p50_p3, %p49_p1  ;;  %p3356_p6 = por %p3677_p13, %p55_p11 }
 0x131   : > { %p331_p0 = scmp.eq.s32.totalorder %s3675_s30, 1  ;;  %p2276_p5 = scmp.lt.s32.totalorder %s2943_s28, 2 }
 0x132   : > { %s497_s0 = sand.u32 1, %s2939_s27   ;;  %p3367_p9 = por %p337_p2, %p55_p11 }
 0x133   : > { %p3363_p7 = por %p331_p0, %p49_p1  ;;  %s1986_s25 = sshll.u32 %s497_s0, 4 }
 0x134   : > { %s3680_s3 = scalar_select %p3367_p9, 1, 0 }
 0x135   : > { %s3679_s1 = scalar_select %p3363_p7, 1, 0 }
 0x136   : > { %s2062_s19 = sshll.u32 %s2943_s28, 8  ;;  %s3681_s21 = sld [smem:[#allocation35_spill]] }
 0x137   : > { %s501_s30 = scalar_lea.vmem [#allocation2], %s1986_s25  ;;  %p3381_p4 = pnand %p2276_p5, %p3350_p12 }
 0x138   : > { %s508_s17 = sshll.u32 %s501_s30, 4  ;;  %s3385_s15 = scalar_lea.sflag [#allocation3], %s497_s0  ;;  %s3377_s17 = int_to_ptr.vmem [resolvable:$true] %s508_s17 }
 0x139   : > { %p2825_p8 = pneg %p3381_p4 }
 0x13c   : > { %s3375_s16 = scalar_lea.hbm %s3681_s21, %s2062_s19  ;;  %s2828_s20 = scalar_lea.hbm %s3681_s21, 512 }
 0x13d   : > { %s2823_s22 = scalar_lea.hbm %s3375_s16, 256  ;;  %p2829_p11 = scmp.lt.u32.totalorder %s3375_s16, %s3681_s21 }
 0x13e   : > { %p2824_p10 = scmp.ne.s32.totalorder %s3375_s16, %s2823_s22  ;;  %p2830_p12 = scmp.lt.u32.totalorder %s2828_s20, %s2823_s22 }
 0x13f   : > { %p2832_p0 = scmp.lt.u32.totalorder %s2823_s22, %s3375_s16 }
 0x140   : > { %p2826_p1 = pnand %p2825_p8, %p2824_p10  ;;  %p2831_p13 = por %p2830_p12, %p2829_p11 }
 0x142   : > { %p2827_p3 = pneg %p2826_p1  ;;  %p2833_p2 = por %p2832_p0, %p2831_p13 }
 0x144   : > { %p2834_p5 = pnand %p2833_p2, %p2827_p3 }
 0x146   : > { %2837 = shalt.err (!%p2834_p5)
}
 0x147   : > { %s2838_s0 = scalar_lea.vmem %s3377_s17, 256  ;;  %s2961_s25 = smov [#allocation2]  }
 0x148   : > { %p2839_p10 = scmp.ne.s32.totalorder %s3377_s17, %s2838_s0  ;;  %s2843_s19 = sshll.u32 %s2961_s25, 4  ;;  %s2844_s19 = int_to_ptr.vmem [resolvable:$false] %s2843_s19 }
 0x149   : > { %s2845_s29 = scalar_lea.vmem %s2844_s19, 512  ;;  %p2846_p7 = scmp.lt.s32.totalorder %s3377_s17, %s2844_s19 }
 0x14a   : > { %p2841_p1 = pnand %p2839_p10, %p2825_p8  ;;  %p2847_p11 = scmp.lt.s32.totalorder %s2845_s29, %s2838_s0 }
 0x14c   : > { %p2842_p9 = pneg %p2841_p1  ;;  %p2848_p12 = por %p2847_p11, %p2846_p7 }
 0x14e   : > { %p2849_p13 = pnand %p2848_p12, %p2842_p9 }
 0x150   : > { %2852 = shalt.err (!%p2849_p13)
}
 0x151   : > { %s3683_s22 = smov 8   ;;  %s3684_s20 = sld [smem:[#allocation34_spill]] }
 0x152   : > { %2259 = dma.hbm_to_vmem [thread:$0]  (!%p3381_p4), %s3375_s16, 256, %s3377_s17, %s3385_s15, %s3671_s23, %s3671_s23, %s3683_s22  }
 0x157   : > { %p3685_p8 = scmp.ne.s32.totalorder %s3684_s20, 0 }
 0x158   : > { %s3419_s30 = sand.u32 (!%p3685_p8), 1, %s2935_s26  }
 0x159   : > { %520 = sbr.rel (%p3685_p8) target bundleno = 3099 (0xc1b), region = 72  ;;  %s1990_s0 = sshll.u32 (!%p3685_p8), %s3419_s30, 4 }
 0x15a   : > { %s523_s25 = scalar_lea.sflag (!%p3685_p8), [#allocation3], %s3419_s30  ;;  %s3425_s13 = scalar_lea.vmem (!%p3685_p8), [#allocation2], %s1990_s0 }
 0x160   : > { %2898 = dma.done.wait (%p3356_p6), %s523_s25, 256  }
 0x161   : > { %2900 = vsyncadd (%p3356_p6), %s523_s25, 4294967040  ;;  %s3686_s23 = sld [smem:[#allocation33_spill]] }
 0x167   : > { %p3687_p7 = scmp.eq.s32.totalorder %s3686_s23, 0 }
 0x169   : > { %2902 = dma.done.wait (%p3687_p7), [#allocation6], 1056   ;;  %p3688_p9 = pmov %p3687_p7 }
 0x16a   : > { %p3689_p4 = pmov %p3687_p7 }
 0x16b   : > { %2904 = vsyncadd (%p3688_p9), [#allocation6], 4294966240 }
 0x16c   : > { %2906 = dma.done.wait (%p3689_p4), [#allocation9], 528   ;;  %p3690_p3 = pmov %p3689_p4 }
 0x16e   : > { %2908 = vsyncadd (%p3690_p3), [#allocation9], 4294966768  ;;  %p3691_p0 = pmov %p3690_p3 }
 0x170   : > { %2910 = dma.done.wait (%p3691_p0), [#allocation12], 32   ;;  %p3692_p2 = pmov %p3691_p0 }
 0x171   : > { %p3693_p6 = pmov %p3691_p0 }
 0x172   : > { %2912 = vsyncadd (%p3692_p2), [#allocation12], 4294967264 }
 0x173   : > { %2914 = dma.done.wait (%p3693_p6), [#allocation15], 1056   ;;  %p3694_p5 = pmov %p3691_p0 }
 0x174   : > { %p3695_p10 = pmov %p3691_p0 }
 0x175   : > { %2916 = vsyncadd (%p3694_p5), [#allocation15], 4294966240 }
 0x176   : > { %2918 = dma.done.wait (%p3695_p10), [#allocation18], 2064   ;;  %p3696_p1 = pmov %p3691_p0 }
 0x177   : > { %p3697_p11 = pmov %p3691_p0 }
 0x178   : > { %2920 = vsyncadd (%p3696_p1), [#allocation18], 4294965232 }
 0x179   : > { %2922 = dma.done.wait (%p3697_p11), [#allocation21], 32   ;;  %p3698_p12 = pmov %p3691_p0 }
 0x17a   : > { %v2962_v0 = vmov 0   ;;  %v2395_v1 = vld [vmem:[#allocation5 + $0x4] ss:$8 sps:$4 sm:$0xff]   ;;  %v2397_v2 = vld [vmem:[#allocation5] ss:$8 sps:$4 sm:$0xff]   ;;  %vm681_vm0 = vcmask 523264   ;;  %v631_v12 = vlaneseq }
 0x17b   : > { %2924 = vsyncadd (%p3698_p12), [#allocation21], 4294967264  ;;  %717 = vmatprep.mubr.bf16.mxu1 %v2962_v0  ;;  %685 = vmatprep.subr.bf16.mxu1 %v2395_v1  ;;  %v2398_v3 = vld [vmem:[#allocation5 + $0x14] ss:$8 sps:$4 sm:$0xff]   ;;  %v2400_v4 = vld [vmem:[#allocation5 + $0x10] ss:$8 sps:$4 sm:$0xff]  }
 0x17c   : > { %686 = vmatpush1.bf16.msra.mxu1 %v2397_v2  ;;  %v2401_v5 = vld [vmem:[#allocation5 + $0x24] ss:$8 sps:$4 sm:$0xff]   ;;  %v2403_v6 = vld [vmem:[#allocation5 + $0x20] ss:$8 sps:$4 sm:$0xff]   ;;  %v2404_v7 = vld [vmem:[#allocation5 + $0x34] ss:$8 sps:$4 sm:$0xff]  }
 0x17d   : > { %687 = vmatprep.subr.bf16.mxu1 %v2398_v3  ;;  %v2406_v8 = vld [vmem:[#allocation5 + $0x30] ss:$8 sps:$4 sm:$0xff]   ;;  %v3465_v13 = vshrl.u32 %v631_v12, 7  ;;  %v629_v15 = vld [vmem:[#allocation7] sm:$0x3]  ;;  %v2963_v17 = vmov 0.0  }
 0x17e   : > { %v3457_v9 = vld [vmem:[%s3425_s13] sm:$0xff]  ;;  %v3460_v10 = vld [vmem:[%s3425_s13 + $0x8] sm:$0xff]  ;;  %2119 = vmatprep.subr.bf16.mxu0 %v2963_v17  ;;  %vm2964_vm1 = vmmov 0   ;;  %s2965_s24 = smov 80   ;;  %s2966_s16 = smov 112   ;;  %vm779_vm2 = vcmask 130048  }
 0x17f   : > { %v620_v11 = vpack.c.bf16 %v3460_v10, %v3457_v9  ;;  %v633_v14 = vsub.s32 0, %v3465_v13  ;;  %v637_v16 = vsub.s32 1, %v3465_v13  ;;  %2121 = vmatprep.mubr.msk.bf16.mxu0 %vm2964_vm1, %v2963_v17  ;;  %s2967_s17 = smov 96   ;;  %s2968_s15 = smov 64   ;;  %vm1279_vm3 = vcmask 261120  }
 0x180   : > { %688 = vmatpush1.bf16.msra.mxu1 %v2400_v4  ;;  %s2969_s19 = smov 16   ;;  %s2970_s29 = smov 32   ;;  %vm1282_vm4 = vcmask 392192  }
 0x181   : > { %689 = vmatprep.subr.bf16.mxu1 %v2401_v5  ;;  %v634_v18 = vrot.slane %v629_v15, %v633_v14  ;;  %v638_v20 = vrot.slane %v629_v15, %v637_v16  ;;  %s2971_s22 = smov 48   ;;  %s2063_s20 = sshll.u32 %s3686_s23, 8 }
 0x182   : > { %s616_s25 = scalar_lea.vmem [#allocation23], %s1990_s0  ;;  %s1771_s23 = scalar_lea.sflag [#allocation4], %s3419_s30 }
 0x183   : > { %s1784_s13 = sshll.u32 %s616_s25, 4  ;;  %p3700_p8 = scmp.ne.s32.totalorder %s3679_s1, 0  ;;  %s3585_s13 = int_to_ptr.vmem [resolvable:$true] %s1784_s13 }
 0x184   : > { %690 = vmatpush1.bf16.msra.mxu1 %v2403_v6  ;;  %s2853_s0 = scalar_lea.vmem %s3585_s13, 256 }
 0x185   : > { %691 = vmatprep.subr.bf16.mxu1 %v2404_v7  ;;  %p2854_p13 = scmp.ne.s32.totalorder %s3585_s13, %s2853_s0 }
 0x187   : > { %p2855_p7 = pnand %p2854_p13, %p3700_p8 }
 0x188   : > { %692 = vmatpush1.bf16.msra.mxu1 %v2406_v8 }
 0x189   : > { %2107 = vmatprep.subr.bf16.mxu1 %v2963_v17  ;;  %p2856_p9 = pneg %p2855_p7 }
 0x18b   : > { %2012 = vmatmul.mubr.msk.bf16.vlgmr.msra.gmra.mrb[0].mxu1 %vm681_vm0, %v620_v11 }
 0x18c   : > { %2109 = vmatprep.mubr.msk.bf16.mxu1 %vm2964_vm1, %v2963_v17 }
 0x25e   : > { %v719_v19 = vpop.f32.mrb[0].mxu1 }
 0x25f   : > { %v721_v21 = vpop.f32.mrb[1].mxu1  ;;  %v720_v23 = vadd.f32 %v719_v19, %v634_v18 }
 0x260   : > { %v723_v22 = vpop.f32.mrb[2].mxu1  ;;  %v722_v26 = vadd.f32 %v721_v21, %v638_v20 }
 0x261   : > { %v724_v24 = vadd.f32 %v723_v22, %v634_v18  ;;  %v725_v25 = vpop.f32.mrb[3].mxu1 }
 0x262   : > { %v726_v27 = vadd.f32 %v725_v25, %v638_v20 }
 0x263   : > { %v2360_v28 = vpack.i.bf16 %v724_v24, %v720_v23  ;;  %v748_v29 = vpack.c.bf16 %v724_v24, %v720_v23 }
 0x264   : > { %v772_v30 = vpack.c.bf16 %v726_v27, %v722_v26  ;;  %v3479_v31 = vpack.i.bf16 %v726_v27, %v722_v26 }
 0x265   : > { %2361 = vrot.lane.b32.xlu1 %v2360_v28, %s2965_s24  ;;  %2351 = vrot.lane.b32.xlu0 %v2360_v28, %s2966_s16 }
 0x269   : > { %2356 = vrot.lane.b32.xlu0 %v2360_v28, %s2967_s17  ;;  %777 = vrot.lane.b32.xlu1 %v748_v29, %s2968_s15 }
 0x2d7   : > { %v2362_v32 = vpop.permute.xlu1 %2361  ;;  %v2352_v33 = vpop.permute.xlu0 %2351 }
 0x2d8   : > { %v2354_v34 = vunpack.i.h.bf16 %v2352_v33  ;;  %v2353_v35 = vunpack.i.l.bf16 %v2352_v33  ;;  %v2364_v36 = vunpack.i.h.bf16 %v2362_v32  ;;  %v2363_v37 = vunpack.i.l.bf16 %v2362_v32 }
 0x2da   : > { %v749_v38 = vpack.c.bf16 %v2354_v34, %v2353_v35  ;;  %v751_v44 = vpack.c.bf16 %v2364_v36, %v2363_v37 }
 0x2db   : > { %v2357_v39 = vpop.permute.xlu0 %2356  ;;  %v778_v40 = vpop.permute.xlu1 %777 }
 0x2dc   : > { %v2359_v41 = vunpack.i.h.bf16 %v2357_v39  ;;  %v2358_v42 = vunpack.i.l.bf16 %v2357_v39  ;;  %v784_v43 = vsel %vm779_vm2, %v778_v40, 0  ;;  %828 = vrot.lane.b32.xlu0 %v749_v38, %s2968_s15 }
 0x2dd   : > { %2108 = vmatpush3.bf16.xpose.msra.mxu1 %v784_v43 }
 0x2de   : > { %v750_v45 = vpack.c.bf16 %v2359_v41, %v2358_v42  ;;  %2113 = vmatprep.subr.bf16.mxu1 %v2963_v17 }
 0x2e0   : > { %928 = vrot.lane.b32.xlu0 %v751_v44, %s2968_s15  ;;  %878 = vrot.lane.b32.xlu1 %v750_v45, %s2968_s15 }
 0x2e4   : > { %2110 = vmatmul.mubr.msk.bf16.vlgmr.msra.gmra.mrb[4].mxu1 %vm779_vm2, %v748_v29 }
 0x2e5   : > { %2115 = vmatprep.mubr.msk.bf16.mxu1 %vm2964_vm1, %v2963_v17 }
 0x34e   : > { %v829_v46 = vpop.permute.xlu0 %828 }
 0x34f   : > { %v834_v47 = vsel %vm779_vm2, %v829_v46, 0 }
 0x350   : > { %2114 = vmatpush3.bf16.xpose.msra.mxu1 %v834_v47 }
 0x351   : > { %2125 = vmatprep.subr.bf16.mxu1 %v2963_v17 }
 0x352   : > { %v879_v48 = vpop.permute.xlu1 %878  ;;  %v929_v50 = vpop.permute.xlu0 %928 }
 0x353   : > { %v884_v49 = vsel %vm779_vm2, %v879_v48, 0  ;;  %v934_v51 = vsel %vm779_vm2, %v929_v50, 0 }
 0x354   : > { %2120 = vmatpush3.bf16.xpose.msra.mxu0 %v884_v49 }
 0x355   : > { %2131 = vmatprep.subr.bf16.mxu0 %v2963_v17 }
 0x357   : > { %2116 = vmatmul.mubr.msk.bf16.vlgmr.msra.gmra.mrb[8].mxu1 %vm779_vm2, %v749_v38 }
 0x358   : > { %2126 = vmatpush3.bf16.xpose.msra.mxu1 %v934_v51  ;;  %2127 = vmatprep.mubr.msk.bf16.mxu1 %vm2964_vm1, %v2963_v17 }
 0x359   : > { %2137 = vmatprep.subr.bf16.mxu1 %v2963_v17 }
 0x35b   : > { %2122 = vmatmul.mubr.msk.bf16.vlgmr.msra.gmra.mrb[0].mxu0 %vm779_vm2, %v750_v45 }
 0x35c   : > { %2132 = vmatpush3.bf16.msra.mxu0 %v772_v30  ;;  %2133 = vmatprep.mubr.msk.bf16.mxu0 %vm2964_vm1, %v2963_v17 }
 0x35d   : > { %2143 = vmatprep.subr.bf16.mxu0 %v2963_v17 }
 0x35f   : > { %2128 = vmatmul.mubr.msk.bf16.vlgmr.msra.gmra.mrb[12].mxu1 %vm779_vm2, %v751_v44 }
 0x360   : > { %2139 = vmatprep.mubr.msk.bf16.mxu1 %vm2964_vm1, %v2963_v17 }
 0x3b7   : > { %v820_v52 = vpop.f32.mrb[4].mxu1 }
 0x3b8   : > { %v977_v53 = vmul.f32 0.25, %v820_v52  ;;  %v2111_v54 = vpop.f32.mrb[5].mxu1 }
 0x3b9   : > { %v823_v55 = vpop.f32.mrb[6].mxu1 }
 0x3ba   : > { %v978_v56 = vmul.f32 0.25, %v823_v55  ;;  %v2112_v57 = vpop.f32.mrb[7].mxu1  ;;  %v985_v58 = vsel %vm779_vm2, %v977_v53, -inf }
 0x3bb   : > { %986 = vmax.xlane.f32.xlu1 %v985_v58 }
 0x3bc   : > { %v988_v59 = vsel %vm779_vm2, %v978_v56, -inf }
 0x3bd   : > { %989 = vmax.xlane.f32.xlu0 %v988_v59 }
 0x42a   : > { %v870_v60 = vpop.f32.mrb[8].mxu1 }
 0x42b   : > { %v979_v61 = vmul.f32 0.25, %v870_v60  ;;  %v2117_v62 = vpop.f32.mrb[9].mxu1 }
 0x42c   : > { %v873_v63 = vpop.f32.mrb[10].mxu1 }
 0x42d   : > { %v980_v1 = vmul.f32 0.25, %v873_v63  ;;  %v2118_v2 = vpop.f32.mrb[11].mxu1  ;;  %v991_v3 = vsel %vm779_vm2, %v979_v61, -inf }
 0x42e   : > { %992 = vmax.xlane.f32.xlu0 %v991_v3  ;;  %v920_v4 = vpop.f32.mrb[0].mxu0 }
 0x42f   : > { %v981_v5 = vmul.f32 0.25, %v920_v4  ;;  %v2123_v6 = vpop.f32.mrb[1].mxu0  ;;  %v994_v7 = vsel %vm779_vm2, %v980_v1, -inf }
 0x430   : > { %995 = vmax.xlane.f32.xlu1 %v994_v7  ;;  %v923_v8 = vpop.f32.mrb[2].mxu0 }
 0x431   : > { %v982_v11 = vmul.f32 0.25, %v923_v8  ;;  %v2124_v12 = vpop.f32.mrb[3].mxu0  ;;  %v997_v15 = vsel %vm779_vm2, %v981_v5, -inf }
 0x432   : > { %v970_v18 = vpop.f32.mrb[12].mxu1  ;;  %998 = vmax.xlane.f32.xlu0 %v997_v15 }
 0x433   : > { %v983_v19 = vmul.f32 0.25, %v970_v18  ;;  %v2129_v20 = vpop.f32.mrb[13].mxu1  ;;  %v1000_v21 = vsel %vm779_vm2, %v982_v11, -inf }
 0x434   : > { %v973_v22 = vpop.f32.mrb[14].mxu1  ;;  %1001 = vmax.xlane.f32.xlu1 %v1000_v21 }
 0x435   : > { %v3511_v23 = vmul.f32 0.25, %v973_v22  ;;  %v2130_v24 = vpop.f32.mrb[15].mxu1  ;;  %v1003_v25 = vsel %vm779_vm2, %v983_v19, -inf }
 0x436   : > { %1004 = vmax.xlane.f32.xlu0 %v1003_v25 }
 0x437   : > { %v1006_v26 = vsel %vm779_vm2, %v3511_v23, -inf }
 0x438   : > { %1007 = vmax.xlane.f32.xlu1 %v1006_v26 }
 0x448   : > { %v987_v27 = vpop.xlane.xlu1 %986 }
 0x449   : > { %v1009_v28 = vsub.f32 %v977_v53, %v987_v27 }
 0x44a   : > { %v990_v29 = vpop.xlane.xlu0 %989 }
 0x44b   : > { %v1017_v30 = vmul.f32 1.442695, %v1009_v28  ;;  %v1010_v32 = vsub.f32 %v978_v56, %v990_v29 }
 0x44d   : > { %2439 = vpow2.f32 %v1017_v30  ;;  %v1019_v33 = vmul.f32 1.442695, %v1010_v32 }
 0x44f   : > { %2441 = vpow2.f32 %v1019_v33 }
 0x457   : > { %v2440_v34 = vpop.eup %2439 }
 0x458   : > { %v1033_v35 = vsel %vm779_vm2, %v2440_v34, 0.0 }
 0x459   : > { %v2442_v36 = vpop.eup %2441  ;;  %1034 = vadd.xlane.f32.xlu0 %v1033_v35 }
 0x45a   : > { %v1036_v37 = vsel %vm779_vm2, %v2442_v36, 0.0 }
 0x45b   : > { %1037 = vadd.xlane.f32.xlu1 %v1036_v37 }
 0x4bb   : > { %v993_v38 = vpop.xlane.xlu0 %992 }
 0x4bc   : > { %v1011_v39 = vsub.f32 %v979_v61, %v993_v38 }
 0x4bd   : > { %v996_v40 = vpop.xlane.xlu1 %995 }
 0x4be   : > { %v1021_v41 = vmul.f32 1.442695, %v1011_v39  ;;  %v1012_v42 = vsub.f32 %v980_v1, %v996_v40 }
 0x4bf   : > { %v999_v43 = vpop.xlane.xlu0 %998 }
 0x4c0   : > { %2443 = vpow2.f32 %v1021_v41  ;;  %v1023_v44 = vmul.f32 1.442695, %v1012_v42  ;;  %v1013_v45 = vsub.f32 %v981_v5, %v999_v43 }
 0x4c1   : > { %v1002_v46 = vpop.xlane.xlu1 %1001 }
 0x4c2   : > { %2445 = vpow2.f32 %v1023_v44  ;;  %v1025_v47 = vmul.f32 1.442695, %v1013_v45  ;;  %v1014_v48 = vsub.f32 %v982_v11, %v1002_v46 }
 0x4c3   : > { %v1005_v49 = vpop.xlane.xlu0 %1004 }
 0x4c4   : > { %2447 = vpow2.f32 %v1025_v47  ;;  %v1027_v50 = vmul.f32 1.442695, %v1014_v48  ;;  %v1015_v51 = vsub.f32 %v983_v19, %v1005_v49 }
 0x4c5   : > { %v1008_v63 = vpop.xlane.xlu1 %1007 }
 0x4c6   : > { %2449 = vpow2.f32 %v1027_v50  ;;  %v1029_v52 = vmul.f32 1.442695, %v1015_v51  ;;  %v1016_v4 = vsub.f32 %v3511_v23, %v1008_v63 }
 0x4c8   : > { %2451 = vpow2.f32 %v1029_v52  ;;  %v1031_v8 = vmul.f32 1.442695, %v1016_v4  ;;  %v2410_v4 = vld [vmem:[#allocation8 + $0x18] sm:$0xff]  }
 0x4ca   : > { %v2444_v53 = vpop.eup %2443 }
 0x4cb   : > { %v1039_v54 = vsel %vm779_vm2, %v2444_v53, 0.0 }
 0x4cc   : > { %v2446_v55 = vpop.eup %2445  ;;  %1040 = vadd.xlane.f32.xlu0 %v1039_v54 }
 0x4cd   : > { %v1042_v56 = vsel %vm779_vm2, %v2446_v55, 0.0 }
 0x4ce   : > { %v2448_v57 = vpop.eup %2447  ;;  %1043 = vadd.xlane.f32.xlu1 %v1042_v56  ;;  %v2408_v56 = vld [vmem:[#allocation8 + $0x8] sm:$0xff]  }
 0x4cf   : > { %v1045_v58 = vsel %vm779_vm2, %v2448_v57, 0.0 }
 0x4d0   : > { %v2450_v59 = vpop.eup %2449  ;;  %1046 = vadd.xlane.f32.xlu0 %v1045_v58 }
 0x4d1   : > { %v1048_v60 = vsel %vm779_vm2, %v2450_v59, 0.0 }
 0x4d2   : > { %v3522_v61 = vpop.eup %2451  ;;  %1049 = vadd.xlane.f32.xlu1 %v1048_v60 }
 0x4d3   : > { %v1051_v62 = vsel %vm779_vm2, %v3522_v61, 0.0 }
 0x4d4   : > { %1052 = vadd.xlane.f32.xlu0 %v1051_v62 }
 0x4e3   : > { %2371 = vrot.lane.b32.xlu1 %v3479_v31, %s2967_s17  ;;  %s3699_s17 = sld [smem:[#allocation38_spill]] }
 0x4e6   : > { %v1035_v1 = vpop.xlane.xlu0 %1034 }
 0x4e7   : > { %2453 = vrcp.f32 %v1035_v1 }
 0x4e8   : > { %v1038_v2 = vpop.xlane.xlu1 %1037 }
 0x4e9   : > { %2455 = vrcp.f32 %v1038_v2  ;;  %s3583_s15 = scalar_lea.hbm %s3699_s17, %s2063_s20 }
 0x4ea   : > { %2366 = vrot.lane.b32.xlu0 %v3479_v31, %s2966_s16  ;;  %2457 = vpow2.f32 %v1031_v8 }
 0x4f1   : > { %v2454_v3 = vpop.eup %2453 }
 0x4f2   : > { %v1065_v6 = vmul.f32 %v2454_v3, %v2440_v34 }
 0x4f3   : > { %v2456_v5 = vpop.eup %2455 }
 0x4f4   : > { %v1066_v7 = vmul.f32 %v2456_v5, %v2442_v36  ;;  %v2458_v12 = vpop.eup %2457 }
 0x4f5   : > { %v1054_v15 = vsel %vm779_vm2, %v2458_v12, 0.0 }
 0x4f6   : > { %v1073_v11 = vpack.c.bf16 %v1066_v7, %v1065_v6 }
 0x4f8   : > { %2134 = vmatmul.mubr.msk.bf16.vlgmr.msra.gmra.mrb[4].mxu0 %vm779_vm2, %v1073_v11 }
 0x4f9   : > { %2145 = vmatprep.mubr.msk.bf16.mxu0 %vm2964_vm1, %v2963_v17 }
 0x507   : > { %1055 = vadd.xlane.f32.xlu1 %v1054_v15 }
 0x518   : > { %2376 = vrot.lane.b32.xlu1 %v3479_v31, %s2965_s24 }
 0x559   : > { %v1041_v18 = vpop.xlane.xlu0 %1040 }
 0x55a   : > { %2459 = vrcp.f32 %v1041_v18 }
 0x55b   : > { %v1044_v19 = vpop.xlane.xlu1 %1043 }
 0x55c   : > { %2461 = vrcp.f32 %v1044_v19 }
 0x55d   : > { %v1047_v20 = vpop.xlane.xlu0 %1046 }
 0x55e   : > { %2463 = vrcp.f32 %v1047_v20 }
 0x55f   : > { %v1050_v21 = vpop.xlane.xlu1 %1049 }
 0x560   : > { %2465 = vrcp.f32 %v1050_v21 }
 0x561   : > { %v1053_v22 = vpop.xlane.xlu0 %1052 }
 0x562   : > { %2467 = vrcp.f32 %v1053_v22 }
 0x563   : > { %v2372_v23 = vpop.permute.xlu1 %2371 }
 0x564   : > { %v2374_v24 = vunpack.i.h.bf16 %v2372_v23  ;;  %v2373_v25 = vunpack.i.l.bf16 %v2372_v23  ;;  %v2460_v26 = vpop.eup %2459 }
 0x565   : > { %v2367_v27 = vpop.permute.xlu0 %2366  ;;  %v1067_v35 = vmul.f32 %v2460_v26, %v2444_v53 }
 0x566   : > { %v2462_v28 = vpop.eup %2461  ;;  %v774_v29 = vpack.c.bf16 %v2374_v24, %v2373_v25  ;;  %v2369_v30 = vunpack.i.h.bf16 %v2367_v27  ;;  %v2368_v32 = vunpack.i.l.bf16 %v2367_v27 }
 0x567   : > { %v1068_v33 = vmul.f32 %v2462_v28, %v2446_v55  ;;  %v2407_v55 = vld [vmem:[#allocation8] sm:$0xff]  }
 0x568   : > { %v2464_v31 = vpop.eup %2463  ;;  %v773_v34 = vpack.c.bf16 %v2369_v30, %v2368_v32  ;;  %2144 = vmatpush3.bf16.msra.mxu0 %v774_v29  ;;  %v2021_v32 = vld [vmem:[#allocation10] ss:$0 sm:$0xff] }
 0x569   : > { %2155 = vmatprep.subr.bf16.mxu0 %v2963_v17  ;;  %v1069_v37 = vmul.f32 %v2464_v31, %v2448_v57  ;;  %v1074_v39 = vpack.c.bf16 %v1068_v33, %v1067_v35 }
 0x56a   : > { %v2466_v36 = vpop.eup %2465  ;;  %2138 = vmatpush3.bf16.msra.mxu1 %v773_v34 }
 0x56b   : > { %v1070_v38 = vmul.f32 %v2466_v36, %v2450_v59  ;;  %2149 = vmatprep.subr.bf16.mxu1 %v2963_v17 }
 0x56c   : > { %v2468_v46 = vpop.eup %2467 }
 0x56d   : > { %2140 = vmatmul.mubr.msk.bf16.vlgmr.msra.gmra.mrb[16].mxu1 %vm779_vm2, %v1074_v39  ;;  %v1075_v40 = vpack.c.bf16 %v1070_v38, %v1069_v37  ;;  %v1071_v48 = vmul.f32 %v2468_v46, %v3522_v61  ;;  %v2409_v61 = vld [vmem:[#allocation8 + $0x10] sm:$0xff]  }
 0x56e   : > { %2151 = vmatprep.mubr.msk.bf16.mxu1 %vm2964_vm1, %v2963_v17 }
 0x56f   : > { %2146 = vmatmul.mubr.msk.bf16.vlgmr.msra.gmra.mrb[8].mxu0 %vm779_vm2, %v1075_v40 }
 0x570   : > { %2163 = vmatprep.mubr.msk.bf16.mxu0 %vm2964_vm1, %v2963_v17  ;;  %2156 = vmatpush3.bf16.msra.mxu0 %v2407_v55  ;;  %v2417_v55 = vld [vmem:[#allocation14 + $0x20] ss:$8 sps:$4 sm:$0xff]  }
 0x571   : > { %2157 = vmatprep.subr.bf16.mxu0 %v2963_v17 }
 0x574   : > { %2158 = vmatpush3.bf16.msra.mxu0 %v2408_v56  ;;  %v2420_v56 = vld [vmem:[#allocation14 + $0x30] ss:$8 sps:$4 sm:$0xff]  }
 0x575   : > { %2159 = vmatprep.subr.bf16.mxu0 %v2963_v17 }
 0x578   : > { %2160 = vmatpush3.bf16.msra.mxu0 %v2409_v61  ;;  %v2426_v61 = vld [vmem:[#allocation17 + $0x8] sm:$0xff]  }
 0x579   : > { %2161 = vmatprep.subr.bf16.mxu0 %v2963_v17 }
 0x57c   : > { %2162 = vmatpush3.bf16.msra.mxu0 %v2410_v4 }
 0x594   : > { %v1056_v41 = vpop.xlane.xlu1 %1055 }
 0x595   : > { %2469 = vrcp.f32 %v1056_v41 }
 0x598   : > { %v2377_v42 = vpop.permute.xlu1 %2376 }
 0x599   : > { %v2379_v43 = vunpack.i.h.bf16 %v2377_v42  ;;  %v2378_v44 = vunpack.i.l.bf16 %v2377_v42 }
 0x59b   : > { %v775_v45 = vpack.c.bf16 %v2379_v43, %v2378_v44 }
 0x59d   : > { %2150 = vmatpush3.bf16.msra.mxu1 %v775_v45 }
 0x59f   : > { %v2470_v47 = vpop.eup %2469 }
 0x5a0   : > { %v1072_v49 = vmul.f32 %v2470_v47, %v2458_v12 }
 0x5a2   : > { %v1076_v50 = vpack.c.bf16 %v1072_v49, %v1071_v48 }
 0x5a4   : > { %2152 = vmatmul.mubr.msk.bf16.vlgmr.msra.gmra.mrb[20].mxu1 %vm779_vm2, %v1076_v50 }
 0x5a5   : > { %1512 = vmatprep.mubr.bf16.mxu1 %v2962_v0 }
 0x5cb   : > { %v1114_v51 = vpop.f32.mrb[4].mxu0 }
 0x5cc   : > { %v2135_v52 = vpop.f32.mrb[5].mxu0 }
 0x5cd   : > { %v1117_v53 = vpop.f32.mrb[6].mxu0  ;;  %v2416_v52 = vld [vmem:[#allocation14 + $0x14] ss:$8 sps:$4 sm:$0xff]  }
 0x5ce   : > { %v2136_v54 = vpop.f32.mrb[7].mxu0 }
 0x5cf   : > { %v2419_v54 = vld [vmem:[#allocation14 + $0x24] ss:$8 sps:$4 sm:$0xff]  }
 0x640   : > { %v1158_v57 = vpop.f32.mrb[16].mxu1 }
 0x641   : > { %v2141_v58 = vpop.f32.mrb[17].mxu1 }
 0x642   : > { %v1161_v59 = vpop.f32.mrb[18].mxu1  ;;  %v1202_v60 = vpop.f32.mrb[8].mxu0  ;;  %v2423_v58 = vld [vmem:[#allocation17 + $0x40] sm:$0xff]  }
 0x643   : > { %v2380_v62 = vpack.i.bf16 %v1161_v59, %v1158_v57  ;;  %v2142_v63 = vpop.f32.mrb[19].mxu1  ;;  %v2147_v1 = vpop.f32.mrb[9].mxu0  ;;  %v2422_v57 = vld [vmem:[#allocation14 + $0x34] ss:$8 sps:$4 sm:$0xff]   ;;  %v2424_v59 = vld [vmem:[#allocation17] sm:$0xff]   ;;  %2085 = vmatprep.subr.bf16.mxu0 %v2423_v58 }
 0x644   : > { %v1205_v0 = vpop.f32.mrb[10].mxu0 }
 0x645   : > { %v2385_v2 = vpack.i.bf16 %v1205_v0, %v1202_v60  ;;  %2381 = vrot.lane.b32.xlu0 %v2380_v62, %s2969_s19  ;;  %v2148_v3 = vpop.f32.mrb[11].mxu0  ;;  %v2425_v60 = vld [vmem:[#allocation17 + $0x48] sm:$0xff]   ;;  %s2972_s19 = smov [#allocation23]  }
 0x647   : > { %2386 = vrot.lane.b32.xlu1 %v2385_v2, %s2970_s29  ;;  %s2857_s29 = sshll.u32 %s2972_s19, 4  ;;  %s2858_s29 = int_to_ptr.vmem [resolvable:$false] %s2857_s29 }
 0x648   : > { %p2860_p4 = scmp.lt.s32.totalorder %s3585_s13, %s2858_s29 }
 0x677   : > { %v1246_v5 = vpop.f32.mrb[20].mxu1 }
 0x678   : > { %v2153_v6 = vpop.f32.mrb[21].mxu1 }
 0x679   : > { %v1249_v7 = vpop.f32.mrb[22].mxu1 }
 0x67a   : > { %v2390_v8 = vpack.i.bf16 %v1249_v7, %v1246_v5  ;;  %v2154_v11 = vpop.f32.mrb[23].mxu1  ;;  %v2027_v5 = vld [vmem:[#allocation11] ss:$0 sm:$0xff] }
 0x67c   : > { %2391 = vrot.lane.b32.xlu0 %v2390_v8, %s2971_s22  ;;  %s2859_s22 = scalar_lea.vmem %s2858_s29, 512 }
 0x67d   : > { %p2861_p3 = scmp.lt.s32.totalorder %s2859_s22, %s2853_s0 }
 0x67f   : > { %p2862_p0 = por %p2861_p3, %p2860_p4 }
 0x681   : > { %p2863_p2 = pnand %p2862_p0, %p2856_p9 }
 0x6b7   : > { %v2382_v12 = vpop.permute.xlu0 %2381 }
 0x6b8   : > { %v2384_v15 = vunpack.i.h.bf16 %v2382_v12  ;;  %v2383_v18 = vunpack.i.l.bf16 %v2382_v12  ;;  %v2028_v12 = vld [vmem:[#allocation13] ss:$0 sm:$0xff] }
 0x6b9   : > { %v2387_v19 = vpop.permute.xlu1 %2386 }
 0x6ba   : > { %v2389_v20 = vunpack.i.h.bf16 %v2387_v19  ;;  %v2388_v21 = vunpack.i.l.bf16 %v2387_v19  ;;  %v1278_v22 = vsel %vm779_vm2, %v1117_v53, %v2384_v15  ;;  %v1277_v23 = vsel %vm779_vm2, %v1114_v51, %v2383_v18  ;;  %v2413_v51 = vld [vmem:[#allocation14 + $0x4] ss:$8 sps:$4 sm:$0xff]   ;;  %v2414_v53 = vld [vmem:[#allocation14 + $0x10] ss:$8 sps:$4 sm:$0xff]  }
 0x6bb   : > { %1480 = vmatprep.subr.bf16.mxu1 %v2413_v51 }
 0x6bc   : > { %v1281_v26 = vsel %vm1279_vm3, %v1278_v22, %v2389_v20  ;;  %v1280_v27 = vsel %vm1279_vm3, %v1277_v23, %v2388_v21  ;;  %v2427_v21 = vld [vmem:[#allocation17 + $0x50] sm:$0xff]   ;;  %v2429_v23 = vld [vmem:[#allocation17 + $0x58] sm:$0xff]  }
 0x6bd   : > { %v2428_v22 = vld [vmem:[#allocation17 + $0x10] sm:$0xff]  }
 0x6ee   : > { %v2392_v17 = vpop.permute.xlu0 %2391 }
 0x6ef   : > { %v2394_v24 = vunpack.i.h.bf16 %v2392_v17  ;;  %v2393_v25 = vunpack.i.l.bf16 %v2392_v17  ;;  %v2430_v17 = vld [vmem:[#allocation17 + $0x18] sm:$0xff]  }
 0x6f1   : > { %v1283_v28 = vsel %vm1282_vm4, %v1280_v27, %v2393_v25  ;;  %v1284_v29 = vsel %vm1282_vm4, %v1281_v26, %v2394_v24  ;;  %v2431_v24 = vld [vmem:[#allocation17 + $0x60] sm:$0xff]   ;;  %v2433_v26 = vld [vmem:[#allocation17 + $0x68] sm:$0xff]  }
 0x6f2   : > { %v1285_v30 = vpack.c.bf16 %v1284_v29, %v1283_v28  ;;  %v2432_v25 = vld [vmem:[#allocation17 + $0x20] sm:$0xff]   ;;  %v2434_v27 = vld [vmem:[#allocation17 + $0x28] sm:$0xff]   ;;  %v2435_v28 = vld [vmem:[#allocation17 + $0x70] sm:$0xff]  }
 0x6f3   : > { %v2436_v29 = vld [vmem:[#allocation17 + $0x30] sm:$0xff]  }
 0x6f4   : > { %2164 = vmatmul.mubr.msk.bf16.vlgmr.msra.gmra.mrb[12].mxu0 %vm681_vm0, %v1285_v30  ;;  %v2437_v30 = vld [vmem:[#allocation17 + $0x78] sm:$0xff]  }
 0x6f5   : > { %2086 = vmatpush3.bf16.msra.mxu0 %v2424_v59 }
 0x6f6   : > { %2087 = vmatprep.subr.bf16.mxu0 %v2425_v60 }
 0x6f9   : > { %2088 = vmatpush3.bf16.msra.mxu0 %v2426_v61  ;;  %v2038_v61 = vld [vmem:[#allocation19] ss:$0 sm:$0xff] }
 0x6fa   : > { %2089 = vmatprep.subr.bf16.mxu0 %v2427_v21 }
 0x6fd   : > { %2090 = vmatpush3.bf16.msra.mxu0 %v2428_v22 }
 0x6fe   : > { %2091 = vmatprep.subr.bf16.mxu0 %v2429_v23 }
 0x701   : > { %2092 = vmatpush3.bf16.msra.mxu0 %v2430_v17 }
 0x702   : > { %2093 = vmatprep.subr.bf16.mxu0 %v2431_v24 }
 0x705   : > { %2094 = vmatpush3.bf16.msra.mxu0 %v2432_v25 }
 0x706   : > { %2095 = vmatprep.subr.bf16.mxu0 %v2433_v26 }
 0x709   : > { %2096 = vmatpush3.bf16.msra.mxu0 %v2434_v27 }
 0x70a   : > { %2097 = vmatprep.subr.bf16.mxu0 %v2435_v28 }
 0x70d   : > { %2098 = vmatpush3.bf16.msra.mxu0 %v2436_v29 }
 0x70e   : > { %2099 = vmatprep.subr.bf16.mxu0 %v2437_v30 }
 0x7c7   : > { %v1362_v33 = vpop.f32.mrb[12].mxu0 }
 0x7c8   : > { %v1363_v31 = vadd.f32 %v2021_v32, %v1362_v33  ;;  %v2165_v34 = vpop.f32.mrb[13].mxu0  ;;  %v1425_v33 = vld [vmem:[#allocation16] sm:$0x3] }
 0x7c9   : > { %v1365_v35 = vpop.f32.mrb[14].mxu0  ;;  %v1434_v34 = vrot.slane %v1425_v33, %v637_v16 }
 0x7ca   : > { %v1366_v36 = vadd.f32 %v2021_v32, %v1365_v35  ;;  %v2166_v37 = vpop.f32.mrb[15].mxu0  ;;  %v1369_v38 = vadd.f32 %v1363_v31, %v3457_v9  ;;  %v2438_v32 = vld [vmem:[#allocation17 + $0x38] sm:$0xff]   ;;  %v1430_v31 = vrot.slane %v1425_v33, %v633_v14 }
 0x7cb   : > { %2100 = vmatpush3.bf16.msra.mxu0 %v2438_v32  ;;  %v2055_v32 = vld [vmem:[#allocation20] ss:$0 sm:$0xff] }
 0x7cc   : > { %v1373_v39 = vsel %vm681_vm0, %v1369_v38, 0.0  ;;  %v1370_v40 = vadd.f32 %v1366_v36, %v3460_v10  ;;  %v2411_v10 = vld [vmem:[#allocation14] ss:$8 sps:$4 sm:$0xff]  }
 0x7cd   : > { %1374 = vadd.xlane.f32.xlu1 %v1373_v39  ;;  %1481 = vmatpush1.bf16.msra.mxu1 %v2411_v10 }
 0x7ce   : > { %v1376_v41 = vsel %vm681_vm0, %v1370_v40, 0.0  ;;  %1482 = vmatprep.subr.bf16.mxu1 %v2416_v52 }
 0x7cf   : > { %1377 = vadd.xlane.f32.xlu0 %v1376_v41 }
 0x7d1   : > { %1483 = vmatpush1.bf16.msra.mxu1 %v2414_v53 }
 0x7d2   : > { %1484 = vmatprep.subr.bf16.mxu1 %v2419_v54 }
 0x7d5   : > { %1485 = vmatpush1.bf16.msra.mxu1 %v2417_v55 }
 0x7d6   : > { %1486 = vmatprep.subr.bf16.mxu1 %v2422_v57 }
 0x7d9   : > { %1487 = vmatpush1.bf16.msra.mxu1 %v2420_v56 }
 0x85a   : > { %v1375_v42 = vpop.xlane.xlu1 %1374 }
 0x85b   : > { %v1380_v43 = vmul.f32 0.015625, %v1375_v42 }
 0x85c   : > { %v1378_v44 = vpop.xlane.xlu0 %1377 }
 0x85d   : > { %v1382_v45 = vsub.f32 %v1369_v38, %v1380_v43  ;;  %v1381_v46 = vmul.f32 0.015625, %v1378_v44 }
 0x85f   : > { %v1383_v47 = vsub.f32 %v1370_v40, %v1381_v46  ;;  %v1384_v48 = vmul.f32 %v1382_v45, %v1382_v45 }
 0x861   : > { %v1386_v49 = vsel %vm681_vm0, %v1384_v48, 0.0  ;;  %v1385_v50 = vmul.f32 %v1383_v47, %v1383_v47 }
 0x862   : > { %1387 = vadd.xlane.f32.xlu0 %v1386_v49 }
 0x863   : > { %v1389_v9 = vsel %vm681_vm0, %v1385_v50, 0.0 }
 0x864   : > { %1390 = vadd.xlane.f32.xlu1 %v1389_v9 }
 0x8ef   : > { %v1388_v62 = vpop.xlane.xlu0 %1387 }
 0x8f0   : > { %v1392_v63 = vmul.f32 0.015625, %v1388_v62 }
 0x8f1   : > { %v1391_v1 = vpop.xlane.xlu1 %1390 }
 0x8f2   : > { %v1394_v0 = vadd.f32 1e-12, %v1392_v63  ;;  %v1393_v2 = vmul.f32 0.015625, %v1391_v1 }
 0x8f4   : > { %2471 = vrsqrt.f32 %v1394_v0  ;;  %v1395_v3 = vadd.f32 1e-12, %v1393_v2 }
 0x8f6   : > { %2473 = vrsqrt.f32 %v1395_v3 }
 0x8fe   : > { %v2472_v4 = vpop.eup %2471 }
 0x8ff   : > { %v1398_v6 = vmul.f32 %v2472_v4, %v1382_v45 }
 0x900   : > { %v2474_v7 = vpop.eup %2473 }
 0x901   : > { %v1406_v8 = vmul.f32 %v2027_v5, %v1398_v6  ;;  %v1399_v11 = vmul.f32 %v2474_v7, %v1383_v47 }
 0x903   : > { %v1407_v15 = vmul.f32 %v2027_v5, %v1399_v11  ;;  %v3560_v18 = vadd.f32 %v2028_v12, %v1406_v8 }
 0x905   : > { %v3562_v19 = vadd.f32 %v2028_v12, %v1407_v15 }
 0x907   : > { %v1416_v20 = vpack.c.bf16 %v3562_v19, %v3560_v18 }
 0x909   : > { %2037 = vmatmul.mubr.msk.bf16.vlgmr.msra.gmra.mrb[24].mxu1 %vm681_vm0, %v1416_v20 }
 0x9dc   : > { %v1514_v35 = vpop.f32.mrb[24].mxu1 }
 0x9dd   : > { %v1515_v36 = vadd.f32 %v1514_v35, %v1430_v31  ;;  %v1516_v37 = vpop.f32.mrb[25].mxu1 }
 0x9de   : > { %v1517_v38 = vadd.f32 %v1516_v37, %v1434_v34  ;;  %v1518_v39 = vpop.f32.mrb[26].mxu1 }
 0x9df   : > { %v1528_v40 = vmul.f32 0.70710677, %v1515_v36  ;;  %v1519_v41 = vadd.f32 %v1518_v39, %v1430_v31  ;;  %v1520_v42 = vpop.f32.mrb[27].mxu1  ;;  %v1523_v50 = vmul.f32 0.5, %v1515_v36 }
 0x9e0   : > { %v1529_v43 = vmul.f32 0.70710677, %v1517_v38  ;;  %v1521_v44 = vadd.f32 %v1520_v42, %v1434_v34  ;;  %v1524_v10 = vmul.f32 0.5, %v1517_v38  ;;  %v2056_v34 = vld [vmem:[#allocation22] ss:$0 sm:$0xff] }
 0x9e1   : > { %2475 = verf.f32 %v1528_v40  ;;  %v1530_v45 = vmul.f32 0.70710677, %v1519_v41  ;;  %v1525_v9 = vmul.f32 0.5, %v1519_v41 }
 0x9e2   : > { %2477 = verf.f32 %v1529_v43  ;;  %v1531_v46 = vmul.f32 0.70710677, %v1521_v44  ;;  %v1526_v52 = vmul.f32 0.5, %v1521_v44 }
 0x9e3   : > { %2479 = verf.f32 %v1530_v45 }
 0x9e4   : > { %2481 = verf.f32 %v1531_v46 }
 0x9eb   : > { %v2476_v14 = vpop.eup %2475 }
 0x9ec   : > { %v2478_v47 = vpop.eup %2477  ;;  %v1536_v13 = vadd.f32 1.0, %v2476_v14 }
 0x9ed   : > { %v2480_v16 = vpop.eup %2479  ;;  %v1537_v48 = vadd.f32 1.0, %v2478_v47 }
 0x9ee   : > { %v2482_v49 = vpop.eup %2481  ;;  %v1538_v51 = vadd.f32 1.0, %v2480_v16  ;;  %v1540_v54 = vmul.f32 %v1536_v13, %v1523_v50 }
 0x9ef   : > { %v1539_v53 = vadd.f32 1.0, %v2482_v49  ;;  %v1541_v56 = vmul.f32 %v1537_v48, %v1524_v10 }
 0x9f0   : > { %v1542_v55 = vmul.f32 %v1538_v51, %v1525_v9 }
 0x9f1   : > { %v1543_v57 = vmul.f32 %v1539_v53, %v1526_v52 }
 0x9f2   : > { %v1544_v58 = vpack.c.bf16 %v1542_v55, %v1540_v54 }
 0x9f3   : > { %v1545_v59 = vpack.c.bf16 %v1543_v57, %v1541_v56 }
 0x9f5   : > { %1713 = vmatprep.mubr.bf16.mxu0 %v1545_v59 }
 0x9f6   : > { %1714 = vmatmul.mubr.bf16.vlgmr.msra.gmra.mrb[16].mxu0 %v1544_v58 }
 0xac9   : > { %v2101_v60 = vpop.f32.mrb[16].mxu0 }
 0xaca   : > { %v2102_v62 = vpop.f32.mrb[17].mxu0 }
 0xacb   : > { %v2103_v63 = vadd.f32 %v2102_v62, %v2101_v60  ;;  %v2104_v1 = vpop.f32.mrb[18].mxu0 }
 0xacc   : > { %v2105_v0 = vpop.f32.mrb[19].mxu0 }
 0xacd   : > { %v1716_v2 = vadd.f32 %v2103_v63, %v2038_v61  ;;  %v2106_v3 = vadd.f32 %v2105_v0, %v2104_v1 }
 0xacf   : > { %v1719_v4 = vadd.f32 %v2106_v3, %v2038_v61  ;;  %v1722_v5 = vadd.f32 %v1716_v2, %v3560_v18 }
 0xad1   : > { %v1726_v6 = vsel %vm681_vm0, %v1722_v5, 0.0  ;;  %v1723_v7 = vadd.f32 %v1719_v4, %v3562_v19 }
 0xad2   : > { %1727 = vadd.xlane.f32.xlu0 %v1726_v6 }
 0xad3   : > { %v1729_v8 = vsel %vm681_vm0, %v1723_v7, 0.0 }
 0xad4   : > { %1730 = vadd.xlane.f32.xlu1 %v1729_v8 }
 0xb5f   : > { %v1728_v11 = vpop.xlane.xlu0 %1727 }
 0xb60   : > { %v1732_v12 = vmul.f32 0.015625, %v1728_v11 }
 0xb61   : > { %v1731_v15 = vpop.xlane.xlu1 %1730 }
 0xb62   : > { %v1734_v20 = vsub.f32 %v1722_v5, %v1732_v12  ;;  %v1733_v21 = vmul.f32 0.015625, %v1731_v15 }
 0xb64   : > { %v1735_v22 = vsub.f32 %v1723_v7, %v1733_v21  ;;  %v1736_v23 = vmul.f32 %v1734_v20, %v1734_v20 }
 0xb66   : > { %v1738_v17 = vsel %vm681_vm0, %v1736_v23, 0.0  ;;  %v1737_v24 = vmul.f32 %v1735_v22, %v1735_v22 }
 0xb67   : > { %1739 = vadd.xlane.f32.xlu0 %v1738_v17 }
 0xb68   : > { %v1741_v18 = vsel %vm681_vm0, %v1737_v24, 0.0 }
 0xb69   : > { %1742 = vadd.xlane.f32.xlu1 %v1741_v18 }
 0xbf4   : > { %v1740_v19 = vpop.xlane.xlu0 %1739 }
 0xbf5   : > { %v1744_v25 = vmul.f32 0.015625, %v1740_v19 }
 0xbf6   : > { %v1743_v26 = vpop.xlane.xlu1 %1742 }
 0xbf7   : > { %v1746_v27 = vadd.f32 1e-12, %v1744_v25  ;;  %v1745_v28 = vmul.f32 0.015625, %v1743_v26 }
 0xbf9   : > { %2483 = vrsqrt.f32 %v1746_v27  ;;  %v1747_v29 = vadd.f32 1e-12, %v1745_v28 }
 0xbfb   : > { %2485 = vrsqrt.f32 %v1747_v29 }
 0xc03   : > { %v2484_v30 = vpop.eup %2483 }
 0xc04   : > { %v1750_v33 = vmul.f32 %v2484_v30, %v1734_v20 }
 0xc05   : > { %v2486_v31 = vpop.eup %2485 }
 0xc06   : > { %v1758_v35 = vmul.f32 %v2055_v32, %v1750_v33  ;;  %v1751_v36 = vmul.f32 %v2486_v31, %v1735_v22 }
 0xc08   : > { %v1766_v37 = vadd.f32 %v2056_v34, %v1758_v35  ;;  %v1759_v38 = vmul.f32 %v2055_v32, %v1751_v36 }
 0xc0a   : > { %v1767_v39 = vadd.f32 %v2056_v34, %v1759_v38  ;;  %1768 = vst.msk [vmem:[%s616_s25] sm:$0xff] %vm681_vm0, %v1766_v37 }
 0xc0c   : > { %1769 = vst.msk [vmem:[%s616_s25 + $0x8] sm:$0xff] %vm681_vm0, %v1767_v39 }
 0xc0d   : > { %2866 = shalt.err (!%p2863_p2)
}
 0xc0e   : > { %s2867_s20 = scalar_lea.hbm %s3583_s15, 256  ;;  %s2871_s16 = scalar_lea.hbm %s3699_s17, 512 }
 0xc0f   : > { %p2868_p6 = scmp.ne.s32.totalorder %s3583_s15, %s2867_s20  ;;  %p2872_p1 = scmp.lt.u32.totalorder %s3583_s15, %s3699_s17 }
 0xc10   : > { %p2873_p11 = scmp.lt.u32.totalorder %s2871_s16, %s2867_s20  ;;  %p2875_p13 = scmp.lt.u32.totalorder %s2867_s20, %s3583_s15 }
 0xc11   : > { %p2869_p5 = pnand %p2868_p6, %p3700_p8 }
 0xc12   : > { %p2874_p12 = por %p2873_p11, %p2872_p1 }
 0xc13   : > { %p2870_p10 = pneg %p2869_p5 }
 0xc14   : > { %p2876_p7 = por %p2875_p13, %p2874_p12 }
 0xc16   : > { %p2877_p9 = pnand %p2876_p7, %p2870_p10 }
 0xc18   : > { %2880 = shalt.err (!%p2877_p9)
}
 0xc19   : > { %s2973_s0 = smov 128   ;;  %s2974_s22 = smov 8  }
 0xc1a   : > { %2217 = dma.vmem_to_hbm [thread:$0]  (%p3700_p8), %s3585_s13, 256, %s3583_s15, %s1771_s23, %s2973_s0, %s2973_s0, %s2974_s22  }
 0xc1b PF: > { %s3701_s25 = sld [smem:[#allocation32_spill]]  ;;  %p3702_p4 = scmp.ne.s32.totalorder %s3680_s3, 0 }
 0xc1c   : > { %p3703_p3 = scmp.ge.s32.totalorder %s2943_s28, 2 }
 0xc1e   : > { %p2261_p0 = pnand %p3703_p3, %p3702_p4 }
 0xc21   : > { %s1799_s24 = sand.u32 1, %s3701_s25  }
 0xc22   : > { %s1800_s20 = scalar_lea.sflag [#allocation4], %s1799_s24 }
 0xc23   : > { %2926 = dma.done.wait (!%p2261_p0), %s1800_s20, 256  }
 0xc24   : > { %2928 = vsyncadd (!%p2261_p0), %s1800_s20, 4294967040  ;;  %p32_p2 = scmp.ge.s32.totalorder %s3337_s18, 4   ;;  %s3704_s25 = smov %s2935_s26 }
 0xc25   : > { %s3705_s26 = smov %s2939_s27  ;;  %s3706_s27 = smov %s3348_s14 }
 0xc26   : > { %s3707_s28 = smov %s3337_s18  ;;  %34 = sbr.rel (!%p32_p2) target bundleno = 16 (0x10), region = 165 }
 0xc2d   :  { %1805 = vsyncpa [#allocation3], 1 }
 0xc2e   :  { %1807 = vsyncpa [#allocation3 + $0x1], 1 }
 0xc2f   :  { %1808 = vsyncpa [#allocation6], 1 }
 0xc30   :  { %1809 = vsyncpa [#allocation9], 1 }
 0xc31   :  { %1810 = vsyncpa [#allocation12], 1 }
 0xc32   :  { %1811 = vsyncpa [#allocation15], 1 }
 0xc33   :  { %1812 = vsyncpa [#allocation18], 1 }
 0xc34   :  { %1813 = vsyncpa [#allocation21], 1 }
 0xc35   :  { %1814 = vsyncpa [#allocation4], 1 }
 0xc36   :  { %1816 = vsyncpa [#allocation4 + $0x1], 1 }

// kernel: tpu_custom_call.1
= control target key start
LH: loop header
LB: loop body
LE: loop exit
PB: predicated region body
PF: predicated region fallthrough
CT: control target
= control target key end

     0   :  { %s3631_s0 = inlined_call_operand.hbm [shape: f32[2,16,64], index: 0, kind: input, shape index: {}]   ;;  %s3632_s1 = inlined_call_operand.hbm [shape: bf16[64,192], index: 1, kind: input, shape index: {}]   ;;  %s3633_s2 = inlined_call_operand.hbm [shape: f32[1,192], index: 2, kind: input, shape index: {}]   ;;  %s3634_s3 = inlined_call_operand.hbm [shape: bf16[64,64], index: 3, kind: input, shape index: {}]   ;;  %s3635_s4 = inlined_call_operand.hbm [shape: f32[1,64], index: 4, kind: input, shape index: {}]   ;;  %s3636_s5 = inlined_call_operand.hbm [shape: f32[1,64], index: 5, kind: input, shape index: {}]   ;;  %s3637_s6 = inlined_call_operand.hbm [shape: f32[1,64], index: 6, kind: input, shape index: {}]   ;;  %s3638_s7 = inlined_call_operand.hbm [shape: bf16[64,256], index: 7, kind: input, shape index: {}]   ;;  %s3639_s8 = inlined_call_operand.hbm [shape: f32[1,256], index: 8, kind: input, shape index: {}]   ;;  %s3640_s9 = inlined_call_operand.hbm [shape: bf16[256,64], index: 9, kind: input, shape index: {}]   ;;  %s3641_s10 = inlined_call_operand.hbm [shape: f32[1,64], index: 10, kind: input, shape index: {}]   ;;  %s3642_s11 = inlined_call_operand.hbm [shape: f32[1,64], index: 11, kind: input, shape index: {}]   ;;  %s3643_s12 = inlined_call_operand.hbm [shape: f32[1,64], index: 12, kind: input, shape index: {}]   ;;  %s3644_s13 = inlined_call_operand.hbm [shape: f32[2,16,64], index: 13, kind: output, shape index: {}]  }
   0x1   :  { %3659 = sst [smem:[#allocation35_spill]] %s3631_s0 }
   0x2   :  { %3660 = sst [smem:[#allocation36_spill]] %s3632_s1 }
   0x3   :  { %3661 = sst [smem:[#allocation37_spill]] %s3634_s3 }
   0x4   :  { %3662 = sst [smem:[#allocation38_spill]] %s3644_s13 }
   0x5   :  { %18 = vsyncpa [#allocation3], 0 }
   0x6   :  { %20 = vsyncpa [#allocation3 + $0x1], 0 }
   0x7   :  { %21 = vsyncpa [#allocation6], 0 }
   0x8   :  { %22 = vsyncpa [#allocation9], 0 }
   0x9   :  { %23 = vsyncpa [#allocation12], 0 }
   0xa   :  { %24 = vsyncpa [#allocation15], 0 }
   0xb   :  { %25 = vsyncpa [#allocation18], 0 }
   0xc   :  { %26 = vsyncpa [#allocation21], 0 }
   0xd   :  { %27 = vsyncpa [#allocation4], 0 }
   0xe   :  { %29 = vsyncpa [#allocation4 + $0x1], 0  ;;  %s3045_s25 = smov 0   ;;  %s3047_s26 = smov 0  }
   0xf   :  { %s3049_s27 = smov 0   ;;  %s3051_s28 = smov 0  }
  0x10 LB: > { %3663 = sst [smem:[#allocation32_spill]] %s2931_s25  ;;  %s2945_s29 = smov [#allocation5]   ;;  %s2943_s28 = sphi %s3051_s28, %s3707_s28   ;;  %s2939_s27 = sphi %s3049_s27, %s3706_s27   ;;  %s2935_s26 = sphi %s3047_s26, %s3705_s26   ;;  %s2931_s25 = sphi %s3045_s25, %s3704_s25  }
  0x11   : > { %s356_s30 = sshll.u32 %s2945_s29, 4  ;;  %s3066_s14 = sadd.s32 4294967295, %s2943_s28   ;;  %s3071_s30 = int_to_ptr.vmem [resolvable:$true] %s356_s30 }
  0x12   : > { %3664 = sst [smem:[#allocation33_spill]] %s3066_s14  ;;  %p1972_p0 = scmp.ge.s32.totalorder %s2943_s28, 1 }
  0x13   : > { %p3653_p1 = scmp.eq.s32.totalorder %s3066_s14, 0  ;;  %p344_p2 = scmp.lt.s32.totalorder %s2943_s28, 3 }
  0x14   : > { %s2946_s16 = smov [#allocation8]   ;;  %s2947_s19 = smov [#allocation11]  }
  0x15   : > { %p3073_p3 = pnand %p1972_p0, %p344_p2  ;;  %s380_s17 = sshll.u32 %s2946_s16, 4  ;;  %s3086_s17 = int_to_ptr.vmem [resolvable:$true] %s380_s17 }
  0x16   : > { %s3088_s20 = sshll.u32 %s2947_s19, 4  ;;  %s3668_s1 = sld [smem:[#allocation36_spill]]  ;;  %s406_s20 = int_to_ptr.vmem [resolvable:$true] %s3088_s20 }
  0x17   : > { %s3665_s15 = scalar_select %p3073_p3, 1, 0 }
  0x18   : > { %p2219_p5 = pneg %p3073_p3 }
  0x19   : > { %3666 = sst [smem:[#allocation34_spill]] %s3665_s15 }
  0x1a   : > { %p3082_p6 = pnand %p2219_p5, %p3653_p1 }
  0x1c   : > { %s2487_s23 = scalar_lea.hbm %s3668_s1, 1024  ;;  %p3098_p8 = pneg %p3082_p6 }
  0x1d   : > { %p2488_p7 = scmp.ne.s32.totalorder %s3668_s1, %s2487_s23  ;;  %p2494_p11 = scmp.lt.u32.totalorder %s2487_s23, %s3668_s1 }
  0x1f   : > { %p2490_p9 = pnand %p3098_p8, %p2488_p7 }
  0x21   : > { %p2491_p10 = pneg %p2490_p9 }
  0x23   : > { %p2496_p12 = pnand %p2494_p11, %p2491_p10 }
  0x25   : > { %2499 = shalt.err (!%p2496_p12)
}
  0x26   : > { %s2500_s21 = scalar_lea.vmem %s3071_s30, 1024  ;;  %p2508_p5 = scmp.lt.s32.totalorder %s3071_s30, %s3071_s30 }
  0x27   : > { %p2501_p13 = scmp.ne.s32.totalorder %s3071_s30, %s2500_s21  ;;  %p2509_p4 = scmp.lt.s32.totalorder %s2500_s21, %s2500_s21 }
  0x29   : > { %p2503_p0 = pnand %p2501_p13, %p3098_p8  ;;  %p2510_p7 = por %p2509_p4, %p2508_p5 }
  0x2b   : > { %p2504_p2 = pneg %p2503_p0 }
  0x2d   : > { %p2511_p9 = pnand %p2510_p7, %p2504_p2 }
  0x2f   : > { %2514 = shalt.err (!%p2511_p9)
}
  0x30   : > { %s3651_s22 = smov 128   ;;  %s3657_s13 = smov 8  }
  0x31   : > { %2222 = dma.hbm_to_vmem [thread:$0]  (!%p3082_p6), %s3668_s1, 1024, %s3071_s30, [#allocation6], %s3651_s22, %s3651_s22, %s3657_s13  }
  0x32   : > { %s3670_s3 = sld [smem:[#allocation37_spill]] }
  0x38   : > { %s2515_s21 = scalar_lea.hbm %s3670_s3, 512 }
  0x39   : > { %p2516_p4 = scmp.ne.s32.totalorder %s3670_s3, %s2515_s21  ;;  %p2522_p12 = scmp.lt.u32.totalorder %s2515_s21, %s3670_s3 }
  0x3b   : > { %p2518_p10 = pnand %p2516_p4, %p3098_p8 }
  0x3d   : > { %p2519_p11 = pneg %p2518_p10 }
  0x3f   : > { %p2524_p13 = pnand %p2522_p12, %p2519_p11 }
  0x41   : > { %2527 = shalt.err (!%p2524_p13)
}
  0x42   : > { %s2528_s30 = scalar_lea.vmem %s3086_s17, 512  ;;  %p2536_p7 = scmp.lt.s32.totalorder %s3086_s17, %s3086_s17 }
  0x43   : > { %p2529_p0 = scmp.ne.s32.totalorder %s3086_s17, %s2528_s30  ;;  %p2537_p9 = scmp.lt.s32.totalorder %s2528_s30, %s2528_s30 }
  0x45   : > { %p2531_p2 = pnand %p2529_p0, %p3098_p8  ;;  %p2538_p4 = por %p2537_p9, %p2536_p7 }
  0x47   : > { %p2532_p5 = pneg %p2531_p2 }
  0x49   : > { %p2539_p10 = pnand %p2538_p4, %p2532_p5 }
  0x4b   : > { %2542 = shalt.err (!%p2539_p10)
}
  0x4c   : > { %s3655_s0 = smov 64   ;;  %s3656_s25 = smov 4  }
  0x4d   : > { %2228 = dma.hbm_to_vmem [thread:$0]  (!%p3082_p6), %s3670_s3, 512, %s3086_s17, [#allocation9], %s3655_s0, %s3655_s0, %s3656_s25  }
  0x4e   : > { %s2543_s29 = scalar_lea.hbm %s3636_s5, 16 }
  0x4f   : > { %p2544_p11 = scmp.ne.s32.totalorder %s3636_s5, %s2543_s29  ;;  %p2550_p0 = scmp.lt.u32.totalorder %s2543_s29, %s3636_s5 }
  0x51   : > { %p2546_p12 = pnand %p2544_p11, %p3098_p8 }
  0x53   : > { %p2547_p13 = pneg %p2546_p12 }
  0x55   : > { %p2552_p2 = pnand %p2550_p0, %p2547_p13 }
  0x57   : > { %2555 = shalt.err (!%p2552_p2)
}
  0x58   : > { %s2556_s14 = scalar_lea.vmem %s406_s20, 16  ;;  %s2563_s17 = scalar_lea.vmem %s406_s20, 32 }
  0x59   : > { %p2557_p5 = scmp.ne.s32.totalorder %s406_s20, %s2556_s14  ;;  %p2564_p4 = scmp.lt.s32.totalorder %s406_s20, %s406_s20 }
  0x5a   : > { %p2565_p10 = scmp.lt.s32.totalorder %s2563_s17, %s2556_s14 }
  0x5b   : > { %p2559_p7 = pnand %p2557_p5, %p3098_p8 }
  0x5c   : > { %p2566_p1 = por %p2565_p10, %p2564_p4 }
  0x5d   : > { %p2560_p9 = pneg %p2559_p7 }
  0x5f   : > { %p2567_p3 = pnand %p2566_p1, %p2560_p9 }
  0x61   : > { %2570 = shalt.err (!%p2567_p3)
}
  0x62   : > { %2234 = dma.hbm_to_vmem [thread:$0]  (!%p3082_p6), %s3636_s5, 16, %s406_s20, [#allocation12]  }
  0x63   : > { %s2952_s22 = smov [#allocation14]   ;;  %s2953_s29 = smov [#allocation17]  }
  0x64   : > { %s426_s24 = sshll.u32 %s2952_s22, 4  ;;  %s450_s19 = sshll.u32 %s2953_s29, 4  ;;  %s427_s24 = int_to_ptr.vmem [resolvable:$true] %s426_s24  ;;  %s451_s19 = int_to_ptr.vmem [resolvable:$true] %s450_s19 }
  0x65   : > { %s2571_s0 = scalar_lea.hbm %s3638_s7, 1024 }
  0x66   : > { %p2572_p1 = scmp.ne.s32.totalorder %s3638_s7, %s2571_s0  ;;  %p2578_p12 = scmp.lt.u32.totalorder %s2571_s0, %s3638_s7 }
  0x68   : > { %p2574_p3 = pnand %p2572_p1, %p3098_p8 }
  0x6a   : > { %p2575_p11 = pneg %p2574_p3 }
  0x6c   : > { %p2580_p13 = pnand %p2578_p12, %p2575_p11 }
  0x6e   : > { %2583 = shalt.err (!%p2580_p13)
}
  0x6f   : > { %s2584_s20 = scalar_lea.vmem %s427_s24, 1024  ;;  %p2592_p7 = scmp.lt.s32.totalorder %s427_s24, %s427_s24 }
  0x70   : > { %p2585_p0 = scmp.ne.s32.totalorder %s427_s24, %s2584_s20  ;;  %p2593_p9 = scmp.lt.s32.totalorder %s2584_s20, %s2584_s20 }
  0x72   : > { %p2587_p2 = pnand %p2585_p0, %p3098_p8  ;;  %p2594_p4 = por %p2593_p9, %p2592_p7 }
  0x74   : > { %p2588_p5 = pneg %p2587_p2 }
  0x76   : > { %p2595_p10 = pnand %p2594_p4, %p2588_p5 }
  0x78   : > { %2598 = shalt.err (!%p2595_p10)
}
  0x79   : > { %s3671_s23 = smov 128   ;;  %s2599_s21 = scalar_lea.hbm %s3640_s9, 2048 }
  0x7a   : > { %2240 = dma.hbm_to_vmem [thread:$0]  (!%p3082_p6), %s3638_s7, 1024, %s427_s24, [#allocation15], %s3671_s23, %s3671_s23, %s3657_s13  }
  0x7b   : > { %p2600_p1 = scmp.ne.s32.totalorder %s3640_s9, %s2599_s21  ;;  %p2606_p12 = scmp.lt.u32.totalorder %s2599_s21, %s3640_s9 }
  0x7d   : > { %p2602_p3 = pnand %p2600_p1, %p3098_p8 }
  0x7f   : > { %p2603_p11 = pneg %p2602_p3 }
  0x81   : > { %p2608_p13 = pnand %p2606_p12, %p2603_p11 }
  0x83   : > { %2611 = shalt.err (!%p2608_p13)
}
  0x84   : > { %s2612_s20 = scalar_lea.vmem %s451_s19, 2048  ;;  %p2620_p7 = scmp.lt.s32.totalorder %s451_s19, %s451_s19 }
  0x85   : > { %p2613_p0 = scmp.ne.s32.totalorder %s451_s19, %s2612_s20  ;;  %p2621_p9 = scmp.lt.s32.totalorder %s2612_s20, %s2612_s20 }
  0x87   : > { %p2615_p2 = pnand %p2613_p0, %p3098_p8  ;;  %p2622_p4 = por %p2621_p9, %p2620_p7 }
  0x89   : > { %p2616_p5 = pneg %p2615_p2 }
  0x8b   : > { %p2623_p10 = pnand %p2622_p4, %p2616_p5 }
  0x8d   : > { %2626 = shalt.err (!%p2623_p10)
}
  0x8e   : > { %s3672_s24 = smov 4   ;;  %s3673_s25 = smov 64  }
  0x8f   : > { %2246 = dma.hbm_to_vmem [thread:$0]  (!%p3082_p6), %s3640_s9, 2048, %s451_s19, [#allocation18], %s3673_s25, %s3673_s25, %s3672_s24  }
  0x90   : > { %s2954_s29 = smov [#allocation20]   ;;  %s2955_s30 = smov [#allocation7]  }
  0x91   : > { %s475_s21 = sshll.u32 %s2954_s29, 4  ;;  %s370_s14 = sshll.u32 %s2955_s30, 4  ;;  %s476_s21 = int_to_ptr.vmem [resolvable:$true] %s475_s21  ;;  %s371_s14 = int_to_ptr.vmem [resolvable:$true] %s370_s14 }
  0x92   : > { %s2627_s20 = scalar_lea.hbm %s3642_s11, 16 }
  0x93   : > { %p2628_p1 = scmp.ne.s32.totalorder %s3642_s11, %s2627_s20  ;;  %p2634_p12 = scmp.lt.u32.totalorder %s2627_s20, %s3642_s11 }
  0x95   : > { %p2630_p3 = pnand %p2628_p1, %p3098_p8 }
  0x97   : > { %p2631_p11 = pneg %p2630_p3 }
  0x99   : > { %p2636_p13 = pnand %p2634_p12, %p2631_p11 }
  0x9b   : > { %2639 = shalt.err (!%p2636_p13)
}
  0x9c   : > { %s2640_s19 = scalar_lea.vmem %s476_s21, 16  ;;  %s2647_s24 = scalar_lea.vmem %s476_s21, 32 }
  0x9d   : > { %p2641_p0 = scmp.ne.s32.totalorder %s476_s21, %s2640_s19  ;;  %p2648_p7 = scmp.lt.s32.totalorder %s476_s21, %s476_s21 }
  0x9e   : > { %p2649_p9 = scmp.lt.s32.totalorder %s2647_s24, %s2640_s19 }
  0x9f   : > { %p2643_p2 = pnand %p2641_p0, %p3098_p8 }
  0xa0   : > { %p2650_p4 = por %p2649_p9, %p2648_p7 }
  0xa1   : > { %p2644_p5 = pneg %p2643_p2 }
  0xa3   : > { %p2651_p10 = pnand %p2650_p4, %p2644_p5 }
  0xa5   : > { %2654 = shalt.err (!%p2651_p10)
}
  0xa6   : > { %2252 = dma.hbm_to_vmem [thread:$0]  (!%p3082_p6), %s3642_s11, 16, %s476_s21, [#allocation21]  }
  0xa7   : > { %s2655_s22 = scalar_lea.hbm %s3633_s2, 32 }
  0xa8   : > { %p2656_p1 = scmp.ne.s32.totalorder %s3633_s2, %s2655_s22  ;;  %p2662_p12 = scmp.lt.u32.totalorder %s2655_s22, %s3633_s2 }
  0xaa   : > { %p2658_p3 = pnand %p2656_p1, %p3098_p8 }
  0xac   : > { %p2659_p11 = pneg %p2658_p3 }
  0xae   : > { %p2664_p13 = pnand %p2662_p12, %p2659_p11 }
  0xb0   : > { %2667 = shalt.err (!%p2664_p13)
}
  0xb1   : > { %s2668_s20 = scalar_lea.vmem %s371_s14, 32  ;;  %p2676_p7 = scmp.lt.s32.totalorder %s371_s14, %s371_s14 }
  0xb2   : > { %p2669_p0 = scmp.ne.s32.totalorder %s371_s14, %s2668_s20  ;;  %p2677_p9 = scmp.lt.s32.totalorder %s2668_s20, %s2668_s20 }
  0xb4   : > { %p2671_p2 = pnand %p2669_p0, %p3098_p8  ;;  %p2678_p4 = por %p2677_p9, %p2676_p7 }
  0xb6   : > { %p2672_p5 = pneg %p2671_p2 }
  0xb8   : > { %p2679_p10 = pnand %p2678_p4, %p2672_p5 }
  0xba   : > { %2682 = shalt.err (!%p2679_p10)
}
  0xbb   : > { %2225 = dma.hbm_to_vmem [thread:$0]  (!%p3082_p6), %s3633_s2, 32, %s371_s14, [#allocation6]  }
  0xbc   : > { %s2956_s19 = smov [#allocation10]   ;;  %s2957_s1 = smov [#allocation13]  }
  0xbd   : > { %s394_s24 = sshll.u32 %s2956_s19, 4  ;;  %s416_s13 = sshll.u32 %s2957_s1, 4  ;;  %s395_s24 = int_to_ptr.vmem [resolvable:$true] %s394_s24  ;;  %s417_s13 = int_to_ptr.vmem [resolvable:$true] %s416_s13 }
  0xbe   : > { %s2683_s22 = scalar_lea.hbm %s3635_s4, 16 }
  0xbf   : > { %p2684_p1 = scmp.ne.s32.totalorder %s3635_s4, %s2683_s22  ;;  %p2690_p12 = scmp.lt.u32.totalorder %s2683_s22, %s3635_s4 }
  0xc1   : > { %p2686_p3 = pnand %p2684_p1, %p3098_p8 }
  0xc3   : > { %p2687_p11 = pneg %p2686_p3 }
  0xc5   : > { %p2692_p13 = pnand %p2690_p12, %p2687_p11 }
  0xc7   : > { %2695 = shalt.err (!%p2692_p13)
}
  0xc8   : > { %s2696_s14 = scalar_lea.vmem %s395_s24, 16  ;;  %s2703_s20 = scalar_lea.vmem %s395_s24, 32 }
  0xc9   : > { %p2697_p0 = scmp.ne.s32.totalorder %s395_s24, %s2696_s14  ;;  %p2704_p7 = scmp.lt.s32.totalorder %s395_s24, %s395_s24 }
  0xca   : > { %p2705_p9 = scmp.lt.s32.totalorder %s2703_s20, %s2696_s14 }
  0xcb   : > { %p2699_p2 = pnand %p2697_p0, %p3098_p8 }
  0xcc   : > { %p2706_p4 = por %p2705_p9, %p2704_p7 }
  0xcd   : > { %p2700_p5 = pneg %p2699_p2 }
  0xcf   : > { %p2707_p10 = pnand %p2706_p4, %p2700_p5 }
  0xd1   : > { %2710 = shalt.err (!%p2707_p10)
}
  0xd2   : > { %2231 = dma.hbm_to_vmem [thread:$0]  (!%p3082_p6), %s3635_s4, 16, %s395_s24, [#allocation9]  }
  0xd3   : > { %s2711_s3 = scalar_lea.hbm %s3637_s6, 16 }
  0xd4   : > { %p2712_p1 = scmp.ne.s32.totalorder %s3637_s6, %s2711_s3  ;;  %p2718_p12 = scmp.lt.u32.totalorder %s2711_s3, %s3637_s6 }
  0xd6   : > { %p2714_p3 = pnand %p2712_p1, %p3098_p8 }
  0xd8   : > { %p2715_p11 = pneg %p2714_p3 }
  0xda   : > { %p2720_p13 = pnand %p2718_p12, %p2715_p11 }
  0xdc   : > { %2723 = shalt.err (!%p2720_p13)
}
  0xdd   : > { %s2724_s17 = scalar_lea.vmem %s417_s13, 16  ;;  %s2731_s24 = scalar_lea.vmem %s417_s13, 32 }
  0xde   : > { %p2725_p0 = scmp.ne.s32.totalorder %s417_s13, %s2724_s17  ;;  %p2732_p7 = scmp.lt.s32.totalorder %s417_s13, %s417_s13 }
  0xdf   : > { %p2733_p9 = scmp.lt.s32.totalorder %s2731_s24, %s2724_s17 }
  0xe0   : > { %p2727_p2 = pnand %p2725_p0, %p3098_p8 }
  0xe1   : > { %p2734_p4 = por %p2733_p9, %p2732_p7 }
  0xe2   : > { %p2728_p5 = pneg %p2727_p2 }
  0xe4   : > { %p2735_p10 = pnand %p2734_p4, %p2728_p5 }
  0xe6   : > { %2738 = shalt.err (!%p2735_p10)
}
  0xe7   : > { %2237 = dma.hbm_to_vmem [thread:$0]  (!%p3082_p6), %s3637_s6, 16, %s417_s13, [#allocation12]  }
  0xe8   : > { %s2958_s20 = smov [#allocation16]   ;;  %s2959_s0 = smov [#allocation19]  }
  0xe9   : > { %s440_s21 = sshll.u32 %s2958_s20, 4  ;;  %s464_s19 = sshll.u32 %s2959_s0, 4  ;;  %s441_s21 = int_to_ptr.vmem [resolvable:$true] %s440_s21  ;;  %s465_s19 = int_to_ptr.vmem [resolvable:$true] %s464_s19 }
  0xea   : > { %s2739_s25 = scalar_lea.hbm %s3639_s8, 32 }
  0xeb   : > { %p2740_p1 = scmp.ne.s32.totalorder %s3639_s8, %s2739_s25  ;;  %p2746_p12 = scmp.lt.u32.totalorder %s2739_s25, %s3639_s8 }
  0xed   : > { %p2742_p3 = pnand %p2740_p1, %p3098_p8 }
  0xef   : > { %p2743_p11 = pneg %p2742_p3 }
  0xf1   : > { %p2748_p13 = pnand %p2746_p12, %p2743_p11 }
  0xf3   : > { %2751 = shalt.err (!%p2748_p13)
}
  0xf4   : > { %s2752_s13 = scalar_lea.vmem %s441_s21, 32  ;;  %p2760_p7 = scmp.lt.s32.totalorder %s441_s21, %s441_s21 }
  0xf5   : > { %p2753_p0 = scmp.ne.s32.totalorder %s441_s21, %s2752_s13  ;;  %p2761_p9 = scmp.lt.s32.totalorder %s2752_s13, %s2752_s13 }
  0xf7   : > { %p2755_p2 = pnand %p2753_p0, %p3098_p8  ;;  %p2762_p4 = por %p2761_p9, %p2760_p7 }
  0xf9   : > { %p2756_p5 = pneg %p2755_p2 }
  0xfb   : > { %p2763_p10 = pnand %p2762_p4, %p2756_p5 }
  0xfd   : > { %2766 = shalt.err (!%p2763_p10)
}
  0xfe   : > { %2243 = dma.hbm_to_vmem [thread:$0]  (!%p3082_p6), %s3639_s8, 32, %s441_s21, [#allocation15]  }
  0xff   : > { %s2767_s0 = scalar_lea.hbm %s3641_s10, 16 }
 0x100   : > { %p2768_p1 = scmp.ne.s32.totalorder %s3641_s10, %s2767_s0  ;;  %p2774_p12 = scmp.lt.u32.totalorder %s2767_s0, %s3641_s10 }
 0x102   : > { %p2770_p3 = pnand %p2768_p1, %p3098_p8 }
 0x104   : > { %p2771_p11 = pneg %p2770_p3 }
 0x106   : > { %p2776_p13 = pnand %p2774_p12, %p2771_p11 }
 0x108   : > { %2779 = shalt.err (!%p2776_p13)
}
 0x109   : > { %s2780_s29 = scalar_lea.vmem %s465_s19, 16  ;;  %s2787_s21 = scalar_lea.vmem %s465_s19, 32 }
 0x10a   : > { %p2781_p0 = scmp.ne.s32.totalorder %s465_s19, %s2780_s29  ;;  %p2788_p7 = scmp.lt.s32.totalorder %s465_s19, %s465_s19 }
 0x10b   : > { %p2789_p9 = scmp.lt.s32.totalorder %s2787_s21, %s2780_s29 }
 0x10c   : > { %p2783_p2 = pnand %p2781_p0, %p3098_p8 }
 0x10d   : > { %p2790_p4 = por %p2789_p9, %p2788_p7 }
 0x10e   : > { %p2784_p5 = pneg %p2783_p2 }
 0x110   : > { %p2791_p10 = pnand %p2790_p4, %p2784_p5 }
 0x112   : > { %2794 = shalt.err (!%p2791_p10)
}
 0x113   : > { %2249 = dma.hbm_to_vmem [thread:$0]  (!%p3082_p6), %s3641_s10, 16, %s465_s19, [#allocation18]  }
 0x114   : > { %s2960_s13 = smov [#allocation22]   ;;  %s2795_s20 = scalar_lea.hbm %s3643_s12, 16 }
 0x115   : > { %s486_s24 = sshll.u32 %s2960_s13, 4  ;;  %p2796_p1 = scmp.ne.s32.totalorder %s3643_s12, %s2795_s20  ;;  %s487_s24 = int_to_ptr.vmem [resolvable:$true] %s486_s24 }
 0x116   : > { %p2802_p12 = scmp.lt.u32.totalorder %s2795_s20, %s3643_s12 }
 0x117   : > { %p2798_p3 = pnand %p2796_p1, %p3098_p8 }
 0x119   : > { %p2799_p11 = pneg %p2798_p3 }
 0x11b   : > { %p2804_p13 = pnand %p2802_p12, %p2799_p11 }
 0x11d   : > { %2807 = shalt.err (!%p2804_p13)
}
 0x11e   : > { %s2808_s19 = scalar_lea.vmem %s487_s24, 16  ;;  %s2815_s22 = scalar_lea.vmem %s487_s24, 32 }
 0x11f   : > { %p2809_p0 = scmp.ne.s32.totalorder %s487_s24, %s2808_s19  ;;  %p2816_p7 = scmp.lt.s32.totalorder %s487_s24, %s487_s24 }
 0x120   : > { %p2817_p9 = scmp.lt.s32.totalorder %s2815_s22, %s2808_s19 }
 0x121   : > { %p2811_p2 = pnand %p2809_p0, %p3098_p8 }
 0x122   : > { %p2818_p4 = por %p2817_p9, %p2816_p7 }
 0x123   : > { %p2812_p5 = pneg %p2811_p2 }
 0x125   : > { %p2819_p10 = pnand %p2818_p4, %p2812_p5 }
 0x127   : > { %2822 = shalt.err (!%p2819_p10)
}
 0x128   : > { %s3674_s16 = sld [smem:[#allocation32_spill]]  ;;  %s3675_s30 = sld [smem:[#allocation33_spill]] }
 0x129   : > { %2255 = dma.hbm_to_vmem [thread:$0]  (!%p3082_p6), %s3643_s12, 16, %s487_s24, [#allocation21]  }
 0x12a   : > { %s1971_s17 = sadd.s32 4294967294, %s2943_s28   ;;  %s3337_s18 = sadd.s32 1, %s2943_s28  }
 0x12b   : > { %s39_s13 = ssub.s32 %s2943_s28, %s3337_s18  ;;  %s42_s15 = sadd.s32 1, %s2939_s27 }
 0x12c   : > { %p40_p8 = scmp.eq.s32.totalorder %s39_s13, 0  ;;  %p49_p1 = scmp.ne.s32.totalorder %s2939_s27, %s2935_s26 }
 0x12d   : > { %p50_p3 = scmp.eq.s32.totalorder %s2943_s28, 0  ;;  %p337_p2 = scmp.eq.s32.totalorder %s1971_s17, 1 }
 0x12e   : > { %p55_p11 = scmp.ne.s32.totalorder %s2935_s26, %s3674_s16  ;;  %p3677_p13 = scmp.eq.s32.totalorder %s3675_s30, 0 }
 0x12f   : > { %s3348_s14 = scalar_select %p40_p8, %s2939_s27, %s42_s15  }
 0x130   : > { %p3350_p12 = por %p50_p3, %p49_p1  ;;  %p3356_p6 = por %p3677_p13, %p55_p11 }
 0x131   : > { %p331_p0 = scmp.eq.s32.totalorder %s3675_s30, 1  ;;  %p2276_p5 = scmp.lt.s32.totalorder %s2943_s28, 2 }
 0x132   : > { %s497_s0 = sand.u32 1, %s2939_s27   ;;  %p3367_p9 = por %p337_p2, %p55_p11 }
 0x133   : > { %p3363_p7 = por %p331_p0, %p49_p1  ;;  %s1986_s25 = sshll.u32 %s497_s0, 4 }
 0x134   : > { %s3680_s3 = scalar_select %p3367_p9, 1, 0 }
 0x135   : > { %s3679_s1 = scalar_select %p3363_p7, 1, 0 }
 0x136   : > { %s2062_s19 = sshll.u32 %s2943_s28, 8  ;;  %s3681_s21 = sld [smem:[#allocation35_spill]] }
 0x137   : > { %s501_s30 = scalar_lea.vmem [#allocation2], %s1986_s25  ;;  %p3381_p4 = pnand %p2276_p5, %p3350_p12 }
 0x138   : > { %s508_s17 = sshll.u32 %s501_s30, 4  ;;  %s3385_s15 = scalar_lea.sflag [#allocation3], %s497_s0  ;;  %s3377_s17 = int_to_ptr.vmem [resolvable:$true] %s508_s17 }
 0x139   : > { %p2825_p8 = pneg %p3381_p4 }
 0x13c   : > { %s3375_s16 = scalar_lea.hbm %s3681_s21, %s2062_s19  ;;  %s2828_s20 = scalar_lea.hbm %s3681_s21, 512 }
 0x13d   : > { %s2823_s22 = scalar_lea.hbm %s3375_s16, 256  ;;  %p2829_p11 = scmp.lt.u32.totalorder %s3375_s16, %s3681_s21 }
 0x13e   : > { %p2824_p10 = scmp.ne.s32.totalorder %s3375_s16, %s2823_s22  ;;  %p2830_p12 = scmp.lt.u32.totalorder %s2828_s20, %s2823_s22 }
 0x13f   : > { %p2832_p0 = scmp.lt.u32.totalorder %s2823_s22, %s3375_s16 }
 0x140   : > { %p2826_p1 = pnand %p2825_p8, %p2824_p10  ;;  %p2831_p13 = por %p2830_p12, %p2829_p11 }
 0x142   : > { %p2827_p3 = pneg %p2826_p1  ;;  %p2833_p2 = por %p2832_p0, %p2831_p13 }
 0x144   : > { %p2834_p5 = pnand %p2833_p2, %p2827_p3 }
 0x146   : > { %2837 = shalt.err (!%p2834_p5)
}
 0x147   : > { %s2838_s0 = scalar_lea.vmem %s3377_s17, 256  ;;  %s2961_s25 = smov [#allocation2]  }
 0x148   : > { %p2839_p10 = scmp.ne.s32.totalorder %s3377_s17, %s2838_s0  ;;  %s2843_s19 = sshll.u32 %s2961_s25, 4  ;;  %s2844_s19 = int_to_ptr.vmem [resolvable:$false] %s2843_s19 }
 0x149   : > { %s2845_s29 = scalar_lea.vmem %s2844_s19, 512  ;;  %p2846_p7 = scmp.lt.s32.totalorder %s3377_s17, %s2844_s19 }
 0x14a   : > { %p2841_p1 = pnand %p2839_p10, %p2825_p8  ;;  %p2847_p11 = scmp.lt.s32.totalorder %s2845_s29, %s2838_s0 }
 0x14c   : > { %p2842_p9 = pneg %p2841_p1  ;;  %p2848_p12 = por %p2847_p11, %p2846_p7 }
 0x14e   : > { %p2849_p13 = pnand %p2848_p12, %p2842_p9 }
 0x150   : > { %2852 = shalt.err (!%p2849_p13)
}
 0x151   : > { %s3683_s22 = smov 8   ;;  %s3684_s20 = sld [smem:[#allocation34_spill]] }
 0x152   : > { %2259 = dma.hbm_to_vmem [thread:$0]  (!%p3381_p4), %s3375_s16, 256, %s3377_s17, %s3385_s15, %s3671_s23, %s3671_s23, %s3683_s22  }
 0x157   : > { %p3685_p8 = scmp.ne.s32.totalorder %s3684_s20, 0 }
 0x158   : > { %s3419_s30 = sand.u32 (!%p3685_p8), 1, %s2935_s26  }
 0x159   : > { %520 = sbr.rel (%p3685_p8) target bundleno = 3099 (0xc1b), region = 72  ;;  %s1990_s0 = sshll.u32 (!%p3685_p8), %s3419_s30, 4 }
 0x15a   : > { %s523_s25 = scalar_lea.sflag (!%p3685_p8), [#allocation3], %s3419_s30  ;;  %s3425_s13 = scalar_lea.vmem (!%p3685_p8), [#allocation2], %s1990_s0 }
 0x160   : > { %2898 = dma.done.wait (%p3356_p6), %s523_s25, 256  }
 0x161   : > { %2900 = vsyncadd (%p3356_p6), %s523_s25, 4294967040  ;;  %s3686_s23 = sld [smem:[#allocation33_spill]] }
 0x167   : > { %p3687_p7 = scmp.eq.s32.totalorder %s3686_s23, 0 }
 0x169   : > { %2902 = dma.done.wait (%p3687_p7), [#allocation6], 1056   ;;  %p3688_p9 = pmov %p3687_p7 }
 0x16a   : > { %p3689_p4 = pmov %p3687_p7 }
 0x16b   : > { %2904 = vsyncadd (%p3688_p9), [#allocation6], 4294966240 }
 0x16c   : > { %2906 = dma.done.wait (%p3689_p4), [#allocation9], 528   ;;  %p3690_p3 = pmov %p3689_p4 }
 0x16e   : > { %2908 = vsyncadd (%p3690_p3), [#allocation9], 4294966768  ;;  %p3691_p0 = pmov %p3690_p3 }
 0x170   : > { %2910 = dma.done.wait (%p3691_p0), [#allocation12], 32   ;;  %p3692_p2 = pmov %p3691_p0 }
 0x171   : > { %p3693_p6 = pmov %p3691_p0 }
 0x172   : > { %2912 = vsyncadd (%p3692_p2), [#allocation12], 4294967264 }
 0x173   : > { %2914 = dma.done.wait (%p3693_p6), [#allocation15], 1056   ;;  %p3694_p5 = pmov %p3691_p0 }
 0x174   : > { %p3695_p10 = pmov %p3691_p0 }
 0x175   : > { %2916 = vsyncadd (%p3694_p5), [#allocation15], 4294966240 }
 0x176   : > { %2918 = dma.done.wait (%p3695_p10), [#allocation18], 2064   ;;  %p3696_p1 = pmov %p3691_p0 }
 0x177   : > { %p3697_p11 = pmov %p3691_p0 }
 0x178   : > { %2920 = vsyncadd (%p3696_p1), [#allocation18], 4294965232 }
 0x179   : > { %2922 = dma.done.wait (%p3697_p11), [#allocation21], 32   ;;  %p3698_p12 = pmov %p3691_p0 }
 0x17a   : > { %v2962_v0 = vmov 0   ;;  %v2395_v1 = vld [vmem:[#allocation5 + $0x4] ss:$8 sps:$4 sm:$0xff]   ;;  %v2397_v2 = vld [vmem:[#allocation5] ss:$8 sps:$4 sm:$0xff]   ;;  %vm681_vm0 = vcmask 523264   ;;  %v631_v12 = vlaneseq }
 0x17b   : > { %2924 = vsyncadd (%p3698_p12), [#allocation21], 4294967264  ;;  %717 = vmatprep.mubr.bf16.mxu1 %v2962_v0  ;;  %685 = vmatprep.subr.bf16.mxu1 %v2395_v1  ;;  %v2398_v3 = vld [vmem:[#allocation5 + $0x14] ss:$8 sps:$4 sm:$0xff]   ;;  %v2400_v4 = vld [vmem:[#allocation5 + $0x10] ss:$8 sps:$4 sm:$0xff]  }
 0x17c   : > { %686 = vmatpush1.bf16.msra.mxu1 %v2397_v2  ;;  %v2401_v5 = vld [vmem:[#allocation5 + $0x24] ss:$8 sps:$4 sm:$0xff]   ;;  %v2403_v6 = vld [vmem:[#allocation5 + $0x20] ss:$8 sps:$4 sm:$0xff]   ;;  %v2404_v7 = vld [vmem:[#allocation5 + $0x34] ss:$8 sps:$4 sm:$0xff]  }
 0x17d   : > { %687 = vmatprep.subr.bf16.mxu1 %v2398_v3  ;;  %v2406_v8 = vld [vmem:[#allocation5 + $0x30] ss:$8 sps:$4 sm:$0xff]   ;;  %v3465_v13 = vshrl.u32 %v631_v12, 7  ;;  %v629_v15 = vld [vmem:[#allocation7] sm:$0x3]  ;;  %v2963_v17 = vmov 0.0  }
 0x17e   : > { %v3457_v9 = vld [vmem:[%s3425_s13] sm:$0xff]  ;;  %v3460_v10 = vld [vmem:[%s3425_s13 + $0x8] sm:$0xff]  ;;  %2119 = vmatprep.subr.bf16.mxu0 %v2963_v17  ;;  %vm2964_vm1 = vmmov 0   ;;  %s2965_s24 = smov 80   ;;  %s2966_s16 = smov 112   ;;  %vm779_vm2 = vcmask 130048  }
 0x17f   : > { %v620_v11 = vpack.c.bf16 %v3460_v10, %v3457_v9  ;;  %v633_v14 = vsub.s32 0, %v3465_v13  ;;  %v637_v16 = vsub.s32 1, %v3465_v13  ;;  %2121 = vmatprep.mubr.msk.bf16.mxu0 %vm2964_vm1, %v2963_v17  ;;  %s2967_s17 = smov 96   ;;  %s2968_s15 = smov 64   ;;  %vm1279_vm3 = vcmask 261120  }
 0x180   : > { %688 = vmatpush1.bf16.msra.mxu1 %v2400_v4  ;;  %s2969_s19 = smov 16   ;;  %s2970_s29 = smov 32   ;;  %vm1282_vm4 = vcmask 392192  }
 0x181   : > { %689 = vmatprep.subr.bf16.mxu1 %v2401_v5  ;;  %v634_v18 = vrot.slane %v629_v15, %v633_v14  ;;  %v638_v20 = vrot.slane %v629_v15, %v637_v16  ;;  %s2971_s22 = smov 48   ;;  %s2063_s20 = sshll.u32 %s3686_s23, 8 }
 0x182   : > { %s616_s25 = scalar_lea.vmem [#allocation23], %s1990_s0  ;;  %s1771_s23 = scalar_lea.sflag [#allocation4], %s3419_s30 }
 0x183   : > { %s1784_s13 = sshll.u32 %s616_s25, 4  ;;  %p3700_p8 = scmp.ne.s32.totalorder %s3679_s1, 0  ;;  %s3585_s13 = int_to_ptr.vmem [resolvable:$true] %s1784_s13 }
 0x184   : > { %690 = vmatpush1.bf16.msra.mxu1 %v2403_v6  ;;  %s2853_s0 = scalar_lea.vmem %s3585_s13, 256 }
 0x185   : > { %691 = vmatprep.subr.bf16.mxu1 %v2404_v7  ;;  %p2854_p13 = scmp.ne.s32.totalorder %s3585_s13, %s2853_s0 }
 0x187   : > { %p2855_p7 = pnand %p2854_p13, %p3700_p8 }
 0x188   : > { %692 = vmatpush1.bf16.msra.mxu1 %v2406_v8 }
 0x189   : > { %2107 = vmatprep.subr.bf16.mxu1 %v2963_v17  ;;  %p2856_p9 = pneg %p2855_p7 }
 0x18b   : > { %2012 = vmatmul.mubr.msk.bf16.vlgmr.msra.gmra.mrb[0].mxu1 %vm681_vm0, %v620_v11 }
 0x18c   : > { %2109 = vmatprep.mubr.msk.bf16.mxu1 %vm2964_vm1, %v2963_v17 }
 0x25e   : > { %v719_v19 = vpop.f32.mrb[0].mxu1 }
 0x25f   : > { %v721_v21 = vpop.f32.mrb[1].mxu1  ;;  %v720_v23 = vadd.f32 %v719_v19, %v634_v18 }
 0x260   : > { %v723_v22 = vpop.f32.mrb[2].mxu1  ;;  %v722_v26 = vadd.f32 %v721_v21, %v638_v20 }
 0x261   : > { %v724_v24 = vadd.f32 %v723_v22, %v634_v18  ;;  %v725_v25 = vpop.f32.mrb[3].mxu1 }
 0x262   : > { %v726_v27 = vadd.f32 %v725_v25, %v638_v20 }
 0x263   : > { %v2360_v28 = vpack.i.bf16 %v724_v24, %v720_v23  ;;  %v748_v29 = vpack.c.bf16 %v724_v24, %v720_v23 }
 0x264   : > { %v772_v30 = vpack.c.bf16 %v726_v27, %v722_v26  ;;  %v3479_v31 = vpack.i.bf16 %v726_v27, %v722_v26 }
 0x265   : > { %2361 = vrot.lane.b32.xlu1 %v2360_v28, %s2965_s24  ;;  %2351 = vrot.lane.b32.xlu0 %v2360_v28, %s2966_s16 }
 0x269   : > { %2356 = vrot.lane.b32.xlu0 %v2360_v28, %s2967_s17  ;;  %777 = vrot.lane.b32.xlu1 %v748_v29, %s2968_s15 }
 0x2d7   : > { %v2362_v32 = vpop.permute.xlu1 %2361  ;;  %v2352_v33 = vpop.permute.xlu0 %2351 }
 0x2d8   : > { %v2354_v34 = vunpack.i.h.bf16 %v2352_v33  ;;  %v2353_v35 = vunpack.i.l.bf16 %v2352_v33  ;;  %v2364_v36 = vunpack.i.h.bf16 %v2362_v32  ;;  %v2363_v37 = vunpack.i.l.bf16 %v2362_v32 }
 0x2da   : > { %v749_v38 = vpack.c.bf16 %v2354_v34, %v2353_v35  ;;  %v751_v44 = vpack.c.bf16 %v2364_v36, %v2363_v37 }
 0x2db   : > { %v2357_v39 = vpop.permute.xlu0 %2356  ;;  %v778_v40 = vpop.permute.xlu1 %777 }
 0x2dc   : > { %v2359_v41 = vunpack.i.h.bf16 %v2357_v39  ;;  %v2358_v42 = vunpack.i.l.bf16 %v2357_v39  ;;  %v784_v43 = vsel %vm779_vm2, %v778_v40, 0  ;;  %828 = vrot.lane.b32.xlu0 %v749_v38, %s2968_s15 }
 0x2dd   : > { %2108 = vmatpush3.bf16.xpose.msra.mxu1 %v784_v43 }
 0x2de   : > { %v750_v45 = vpack.c.bf16 %v2359_v41, %v2358_v42  ;;  %2113 = vmatprep.subr.bf16.mxu1 %v2963_v17 }
 0x2e0   : > { %928 = vrot.lane.b32.xlu0 %v751_v44, %s2968_s15  ;;  %878 = vrot.lane.b32.xlu1 %v750_v45, %s2968_s15 }
 0x2e4   : > { %2110 = vmatmul.mubr.msk.bf16.vlgmr.msra.gmra.mrb[4].mxu1 %vm779_vm2, %v748_v29 }
 0x2e5   : > { %2115 = vmatprep.mubr.msk.bf16.mxu1 %vm2964_vm1, %v2963_v17 }
 0x34e   : > { %v829_v46 = vpop.permute.xlu0 %828 }
 0x34f   : > { %v834_v47 = vsel %vm779_vm2, %v829_v46, 0 }
 0x350   : > { %2114 = vmatpush3.bf16.xpose.msra.mxu1 %v834_v47 }
 0x351   : > { %2125 = vmatprep.subr.bf16.mxu1 %v2963_v17 }
 0x352   : > { %v879_v48 = vpop.permute.xlu1 %878  ;;  %v929_v50 = vpop.permute.xlu0 %928 }
 0x353   : > { %v884_v49 = vsel %vm779_vm2, %v879_v48, 0  ;;  %v934_v51 = vsel %vm779_vm2, %v929_v50, 0 }
 0x354   : > { %2120 = vmatpush3.bf16.xpose.msra.mxu0 %v884_v49 }
 0x355   : > { %2131 = vmatprep.subr.bf16.mxu0 %v2963_v17 }
 0x357   : > { %2116 = vmatmul.mubr.msk.bf16.vlgmr.msra.gmra.mrb[8].mxu1 %vm779_vm2, %v749_v38 }
 0x358   : > { %2126 = vmatpush3.bf16.xpose.msra.mxu1 %v934_v51  ;;  %2127 = vmatprep.mubr.msk.bf16.mxu1 %vm2964_vm1, %v2963_v17 }
 0x359   : > { %2137 = vmatprep.subr.bf16.mxu1 %v2963_v17 }
 0x35b   : > { %2122 = vmatmul.mubr.msk.bf16.vlgmr.msra.gmra.mrb[0].mxu0 %vm779_vm2, %v750_v45 }
 0x35c   : > { %2132 = vmatpush3.bf16.msra.mxu0 %v772_v30  ;;  %2133 = vmatprep.mubr.msk.bf16.mxu0 %vm2964_vm1, %v2963_v17 }
 0x35d   : > { %2143 = vmatprep.subr.bf16.mxu0 %v2963_v17 }
 0x35f   : > { %2128 = vmatmul.mubr.msk.bf16.vlgmr.msra.gmra.mrb[12].mxu1 %vm779_vm2, %v751_v44 }
 0x360   : > { %2139 = vmatprep.mubr.msk.bf16.mxu1 %vm2964_vm1, %v2963_v17 }
 0x3b7   : > { %v820_v52 = vpop.f32.mrb[4].mxu1 }
 0x3b8   : > { %v977_v53 = vmul.f32 0.25, %v820_v52  ;;  %v2111_v54 = vpop.f32.mrb[5].mxu1 }
 0x3b9   : > { %v823_v55 = vpop.f32.mrb[6].mxu1 }
 0x3ba   : > { %v978_v56 = vmul.f32 0.25, %v823_v55  ;;  %v2112_v57 = vpop.f32.mrb[7].mxu1  ;;  %v985_v58 = vsel %vm779_vm2, %v977_v53, -inf }
 0x3bb   : > { %986 = vmax.xlane.f32.xlu1 %v985_v58 }
 0x3bc   : > { %v988_v59 = vsel %vm779_vm2, %v978_v56, -inf }
 0x3bd   : > { %989 = vmax.xlane.f32.xlu0 %v988_v59 }
 0x42a   : > { %v870_v60 = vpop.f32.mrb[8].mxu1 }
 0x42b   : > { %v979_v61 = vmul.f32 0.25, %v870_v60  ;;  %v2117_v62 = vpop.f32.mrb[9].mxu1 }
 0x42c   : > { %v873_v63 = vpop.f32.mrb[10].mxu1 }
 0x42d   : > { %v980_v1 = vmul.f32 0.25, %v873_v63  ;;  %v2118_v2 = vpop.f32.mrb[11].mxu1  ;;  %v991_v3 = vsel %vm779_vm2, %v979_v61, -inf }
 0x42e   : > { %992 = vmax.xlane.f32.xlu0 %v991_v3  ;;  %v920_v4 = vpop.f32.mrb[0].mxu0 }
 0x42f   : > { %v981_v5 = vmul.f32 0.25, %v920_v4  ;;  %v2123_v6 = vpop.f32.mrb[1].mxu0  ;;  %v994_v7 = vsel %vm779_vm2, %v980_v1, -inf }
 0x430   : > { %995 = vmax.xlane.f32.xlu1 %v994_v7  ;;  %v923_v8 = vpop.f32.mrb[2].mxu0 }
 0x431   : > { %v982_v11 = vmul.f32 0.25, %v923_v8  ;;  %v2124_v12 = vpop.f32.mrb[3].mxu0  ;;  %v997_v15 = vsel %vm779_vm2, %v981_v5, -inf }
 0x432   : > { %v970_v18 = vpop.f32.mrb[12].mxu1  ;;  %998 = vmax.xlane.f32.xlu0 %v997_v15 }
 0x433   : > { %v983_v19 = vmul.f32 0.25, %v970_v18  ;;  %v2129_v20 = vpop.f32.mrb[13].mxu1  ;;  %v1000_v21 = vsel %vm779_vm2, %v982_v11, -inf }
 0x434   : > { %v973_v22 = vpop.f32.mrb[14].mxu1  ;;  %1001 = vmax.xlane.f32.xlu1 %v1000_v21 }
 0x435   : > { %v3511_v23 = vmul.f32 0.25, %v973_v22  ;;  %v2130_v24 = vpop.f32.mrb[15].mxu1  ;;  %v1003_v25 = vsel %vm779_vm2, %v983_v19, -inf }
 0x436   : > { %1004 = vmax.xlane.f32.xlu0 %v1003_v25 }
 0x437   : > { %v1006_v26 = vsel %vm779_vm2, %v3511_v23, -inf }
 0x438   : > { %1007 = vmax.xlane.f32.xlu1 %v1006_v26 }
 0x448   : > { %v987_v27 = vpop.xlane.xlu1 %986 }
 0x449   : > { %v1009_v28 = vsub.f32 %v977_v53, %v987_v27 }
 0x44a   : > { %v990_v29 = vpop.xlane.xlu0 %989 }
 0x44b   : > { %v1017_v30 = vmul.f32 1.442695, %v1009_v28  ;;  %v1010_v32 = vsub.f32 %v978_v56, %v990_v29 }
 0x44d   : > { %2439 = vpow2.f32 %v1017_v30  ;;  %v1019_v33 = vmul.f32 1.442695, %v1010_v32 }
 0x44f   : > { %2441 = vpow2.f32 %v1019_v33 }
 0x457   : > { %v2440_v34 = vpop.eup %2439 }
 0x458   : > { %v1033_v35 = vsel %vm779_vm2, %v2440_v34, 0.0 }
 0x459   : > { %v2442_v36 = vpop.eup %2441  ;;  %1034 = vadd.xlane.f32.xlu0 %v1033_v35 }
 0x45a   : > { %v1036_v37 = vsel %vm779_vm2, %v2442_v36, 0.0 }
 0x45b   : > { %1037 = vadd.xlane.f32.xlu1 %v1036_v37 }
 0x4bb   : > { %v993_v38 = vpop.xlane.xlu0 %992 }
 0x4bc   : > { %v1011_v39 = vsub.f32 %v979_v61, %v993_v38 }
 0x4bd   : > { %v996_v40 = vpop.xlane.xlu1 %995 }
 0x4be   : > { %v1021_v41 = vmul.f32 1.442695, %v1011_v39  ;;  %v1012_v42 = vsub.f32 %v980_v1, %v996_v40 }
 0x4bf   : > { %v999_v43 = vpop.xlane.xlu0 %998 }
 0x4c0   : > { %2443 = vpow2.f32 %v1021_v41  ;;  %v1023_v44 = vmul.f32 1.442695, %v1012_v42  ;;  %v1013_v45 = vsub.f32 %v981_v5, %v999_v43 }
 0x4c1   : > { %v1002_v46 = vpop.xlane.xlu1 %1001 }
 0x4c2   : > { %2445 = vpow2.f32 %v1023_v44  ;;  %v1025_v47 = vmul.f32 1.442695, %v1013_v45  ;;  %v1014_v48 = vsub.f32 %v982_v11, %v1002_v46 }
 0x4c3   : > { %v1005_v49 = vpop.xlane.xlu0 %1004 }
 0x4c4   : > { %2447 = vpow2.f32 %v1025_v47  ;;  %v1027_v50 = vmul.f32 1.442695, %v1014_v48  ;;  %v1015_v51 = vsub.f32 %v983_v19, %v1005_v49 }
 0x4c5   : > { %v1008_v63 = vpop.xlane.xlu1 %1007 }
 0x4c6   : > { %2449 = vpow2.f32 %v1027_v50  ;;  %v1029_v52 = vmul.f32 1.442695, %v1015_v51  ;;  %v1016_v4 = vsub.f32 %v3511_v23, %v1008_v63 }
 0x4c8   : > { %2451 = vpow2.f32 %v1029_v52  ;;  %v1031_v8 = vmul.f32 1.442695, %v1016_v4  ;;  %v2410_v4 = vld [vmem:[#allocation8 + $0x18] sm:$0xff]  }
 0x4ca   : > { %v2444_v53 = vpop.eup %2443 }
 0x4cb   : > { %v1039_v54 = vsel %vm779_vm2, %v2444_v53, 0.0 }
 0x4cc   : > { %v2446_v55 = vpop.eup %2445  ;;  %1040 = vadd.xlane.f32.xlu0 %v1039_v54 }
 0x4cd   : > { %v1042_v56 = vsel %vm779_vm2, %v2446_v55, 0.0 }
 0x4ce   : > { %v2448_v57 = vpop.eup %2447  ;;  %1043 = vadd.xlane.f32.xlu1 %v1042_v56  ;;  %v2408_v56 = vld [vmem:[#allocation8 + $0x8] sm:$0xff]  }
 0x4cf   : > { %v1045_v58 = vsel %vm779_vm2, %v2448_v57, 0.0 }
 0x4d0   : > { %v2450_v59 = vpop.eup %2449  ;;  %1046 = vadd.xlane.f32.xlu0 %v1045_v58 }
 0x4d1   : > { %v1048_v60 = vsel %vm779_vm2, %v2450_v59, 0.0 }
 0x4d2   : > { %v3522_v61 = vpop.eup %2451  ;;  %1049 = vadd.xlane.f32.xlu1 %v1048_v60 }
 0x4d3   : > { %v1051_v62 = vsel %vm779_vm2, %v3522_v61, 0.0 }
 0x4d4   : > { %1052 = vadd.xlane.f32.xlu0 %v1051_v62 }
 0x4e3   : > { %2371 = vrot.lane.b32.xlu1 %v3479_v31, %s2967_s17  ;;  %s3699_s17 = sld [smem:[#allocation38_spill]] }
 0x4e6   : > { %v1035_v1 = vpop.xlane.xlu0 %1034 }
 0x4e7   : > { %2453 = vrcp.f32 %v1035_v1 }
 0x4e8   : > { %v1038_v2 = vpop.xlane.xlu1 %1037 }
 0x4e9   : > { %2455 = vrcp.f32 %v1038_v2  ;;  %s3583_s15 = scalar_lea.hbm %s3699_s17, %s2063_s20 }
 0x4ea   : > { %2366 = vrot.lane.b32.xlu0 %v3479_v31, %s2966_s16  ;;  %2457 = vpow2.f32 %v1031_v8 }
 0x4f1   : > { %v2454_v3 = vpop.eup %2453 }
 0x4f2   : > { %v1065_v6 = vmul.f32 %v2454_v3, %v2440_v34 }
 0x4f3   : > { %v2456_v5 = vpop.eup %2455 }
 0x4f4   : > { %v1066_v7 = vmul.f32 %v2456_v5, %v2442_v36  ;;  %v2458_v12 = vpop.eup %2457 }
 0x4f5   : > { %v1054_v15 = vsel %vm779_vm2, %v2458_v12, 0.0 }
 0x4f6   : > { %v1073_v11 = vpack.c.bf16 %v1066_v7, %v1065_v6 }
 0x4f8   : > { %2134 = vmatmul.mubr.msk.bf16.vlgmr.msra.gmra.mrb[4].mxu0 %vm779_vm2, %v1073_v11 }
 0x4f9   : > { %2145 = vmatprep.mubr.msk.bf16.mxu0 %vm2964_vm1, %v2963_v17 }
 0x507   : > { %1055 = vadd.xlane.f32.xlu1 %v1054_v15 }
 0x518   : > { %2376 = vrot.lane.b32.xlu1 %v3479_v31, %s2965_s24 }
 0x559   : > { %v1041_v18 = vpop.xlane.xlu0 %1040 }
 0x55a   : > { %2459 = vrcp.f32 %v1041_v18 }
 0x55b   : > { %v1044_v19 = vpop.xlane.xlu1 %1043 }
 0x55c   : > { %2461 = vrcp.f32 %v1044_v19 }
 0x55d   : > { %v1047_v20 = vpop.xlane.xlu0 %1046 }
 0x55e   : > { %2463 = vrcp.f32 %v1047_v20 }
 0x55f   : > { %v1050_v21 = vpop.xlane.xlu1 %1049 }
 0x560   : > { %2465 = vrcp.f32 %v1050_v21 }
 0x561   : > { %v1053_v22 = vpop.xlane.xlu0 %1052 }
 0x562   : > { %2467 = vrcp.f32 %v1053_v22 }
 0x563   : > { %v2372_v23 = vpop.permute.xlu1 %2371 }
 0x564   : > { %v2374_v24 = vunpack.i.h.bf16 %v2372_v23  ;;  %v2373_v25 = vunpack.i.l.bf16 %v2372_v23  ;;  %v2460_v26 = vpop.eup %2459 }
 0x565   : > { %v2367_v27 = vpop.permute.xlu0 %2366  ;;  %v1067_v35 = vmul.f32 %v2460_v26, %v2444_v53 }
 0x566   : > { %v2462_v28 = vpop.eup %2461  ;;  %v774_v29 = vpack.c.bf16 %v2374_v24, %v2373_v25  ;;  %v2369_v30 = vunpack.i.h.bf16 %v2367_v27  ;;  %v2368_v32 = vunpack.i.l.bf16 %v2367_v27 }
 0x567   : > { %v1068_v33 = vmul.f32 %v2462_v28, %v2446_v55  ;;  %v2407_v55 = vld [vmem:[#allocation8] sm:$0xff]  }
 0x568   : > { %v2464_v31 = vpop.eup %2463  ;;  %v773_v34 = vpack.c.bf16 %v2369_v30, %v2368_v32  ;;  %2144 = vmatpush3.bf16.msra.mxu0 %v774_v29  ;;  %v2021_v32 = vld [vmem:[#allocation10] ss:$0 sm:$0xff] }
 0x569   : > { %2155 = vmatprep.subr.bf16.mxu0 %v2963_v17  ;;  %v1069_v37 = vmul.f32 %v2464_v31, %v2448_v57  ;;  %v1074_v39 = vpack.c.bf16 %v1068_v33, %v1067_v35 }
 0x56a   : > { %v2466_v36 = vpop.eup %2465  ;;  %2138 = vmatpush3.bf16.msra.mxu1 %v773_v34 }
 0x56b   : > { %v1070_v38 = vmul.f32 %v2466_v36, %v2450_v59  ;;  %2149 = vmatprep.subr.bf16.mxu1 %v2963_v17 }
 0x56c   : > { %v2468_v46 = vpop.eup %2467 }
 0x56d   : > { %2140 = vmatmul.mubr.msk.bf16.vlgmr.msra.gmra.mrb[16].mxu1 %vm779_vm2, %v1074_v39  ;;  %v1075_v40 = vpack.c.bf16 %v1070_v38, %v1069_v37  ;;  %v1071_v48 = vmul.f32 %v2468_v46, %v3522_v61  ;;  %v2409_v61 = vld [vmem:[#allocation8 + $0x10] sm:$0xff]  }
 0x56e   : > { %2151 = vmatprep.mubr.msk.bf16.mxu1 %vm2964_vm1, %v2963_v17 }
 0x56f   : > { %2146 = vmatmul.mubr.msk.bf16.vlgmr.msra.gmra.mrb[8].mxu0 %vm779_vm2, %v1075_v40 }
 0x570   : > { %2163 = vmatprep.mubr.msk.bf16.mxu0 %vm2964_vm1, %v2963_v17  ;;  %2156 = vmatpush3.bf16.msra.mxu0 %v2407_v55  ;;  %v2417_v55 = vld [vmem:[#allocation14 + $0x20] ss:$8 sps:$4 sm:$0xff]  }
 0x571   : > { %2157 = vmatprep.subr.bf16.mxu0 %v2963_v17 }
 0x574   : > { %2158 = vmatpush3.bf16.msra.mxu0 %v2408_v56  ;;  %v2420_v56 = vld [vmem:[#allocation14 + $0x30] ss:$8 sps:$4 sm:$0xff]  }
 0x575   : > { %2159 = vmatprep.subr.bf16.mxu0 %v2963_v17 }
 0x578   : > { %2160 = vmatpush3.bf16.msra.mxu0 %v2409_v61  ;;  %v2426_v61 = vld [vmem:[#allocation17 + $0x8] sm:$0xff]  }
 0x579   : > { %2161 = vmatprep.subr.bf16.mxu0 %v2963_v17 }
 0x57c   : > { %2162 = vmatpush3.bf16.msra.mxu0 %v2410_v4 }
 0x594   : > { %v1056_v41 = vpop.xlane.xlu1 %1055 }
 0x595   : > { %2469 = vrcp.f32 %v1056_v41 }
 0x598   : > { %v2377_v42 = vpop.permute.xlu1 %2376 }
 0x599   : > { %v2379_v43 = vunpack.i.h.bf16 %v2377_v42  ;;  %v2378_v44 = vunpack.i.l.bf16 %v2377_v42 }
 0x59b   : > { %v775_v45 = vpack.c.bf16 %v2379_v43, %v2378_v44 }
 0x59d   : > { %2150 = vmatpush3.bf16.msra.mxu1 %v775_v45 }
 0x59f   : > { %v2470_v47 = vpop.eup %2469 }
 0x5a0   : > { %v1072_v49 = vmul.f32 %v2470_v47, %v2458_v12 }
 0x5a2   : > { %v1076_v50 = vpack.c.bf16 %v1072_v49, %v1071_v48 }
 0x5a4   : > { %2152 = vmatmul.mubr.msk.bf16.vlgmr.msra.gmra.mrb[20].mxu1 %vm779_vm2, %v1076_v50 }
 0x5a5   : > { %1512 = vmatprep.mubr.bf16.mxu1 %v2962_v0 }
 0x5cb   : > { %v1114_v51 = vpop.f32.mrb[4].mxu0 }
 0x5cc   : > { %v2135_v52 = vpop.f32.mrb[5].mxu0 }
 0x5cd   : > { %v1117_v53 = vpop.f32.mrb[6].mxu0  ;;  %v2416_v52 = vld [vmem:[#allocation14 + $0x14] ss:$8 sps:$4 sm:$0xff]  }
 0x5ce   : > { %v2136_v54 = vpop.f32.mrb[7].mxu0 }
 0x5cf   : > { %v2419_v54 = vld [vmem:[#allocation14 + $0x24] ss:$8 sps:$4 sm:$0xff]  }
 0x640   : > { %v1158_v57 = vpop.f32.mrb[16].mxu1 }
 0x641   : > { %v2141_v58 = vpop.f32.mrb[17].mxu1 }
 0x642   : > { %v1161_v59 = vpop.f32.mrb[18].mxu1  ;;  %v1202_v60 = vpop.f32.mrb[8].mxu0  ;;  %v2423_v58 = vld [vmem:[#allocation17 + $0x40] sm:$0xff]  }
 0x643   : > { %v2380_v62 = vpack.i.bf16 %v1161_v59, %v1158_v57  ;;  %v2142_v63 = vpop.f32.mrb[19].mxu1  ;;  %v2147_v1 = vpop.f32.mrb[9].mxu0  ;;  %v2422_v57 = vld [vmem:[#allocation14 + $0x34] ss:$8 sps:$4 sm:$0xff]   ;;  %v2424_v59 = vld [vmem:[#allocation17] sm:$0xff]   ;;  %2085 = vmatprep.subr.bf16.mxu0 %v2423_v58 }
 0x644   : > { %v1205_v0 = vpop.f32.mrb[10].mxu0 }
 0x645   : > { %v2385_v2 = vpack.i.bf16 %v1205_v0, %v1202_v60  ;;  %2381 = vrot.lane.b32.xlu0 %v2380_v62, %s2969_s19  ;;  %v2148_v3 = vpop.f32.mrb[11].mxu0  ;;  %v2425_v60 = vld [vmem:[#allocation17 + $0x48] sm:$0xff]   ;;  %s2972_s19 = smov [#allocation23]  }
 0x647   : > { %2386 = vrot.lane.b32.xlu1 %v2385_v2, %s2970_s29  ;;  %s2857_s29 = sshll.u32 %s2972_s19, 4  ;;  %s2858_s29 = int_to_ptr.vmem [resolvable:$false] %s2857_s29 }
 0x648   : > { %p2860_p4 = scmp.lt.s32.totalorder %s3585_s13, %s2858_s29 }
 0x677   : > { %v1246_v5 = vpop.f32.mrb[20].mxu1 }
 0x678   : > { %v2153_v6 = vpop.f32.mrb[21].mxu1 }
 0x679   : > { %v1249_v7 = vpop.f32.mrb[22].mxu1 }
 0x67a   : > { %v2390_v8 = vpack.i.bf16 %v1249_v7, %v1246_v5  ;;  %v2154_v11 = vpop.f32.mrb[23].mxu1  ;;  %v2027_v5 = vld [vmem:[#allocation11] ss:$0 sm:$0xff] }
 0x67c   : > { %2391 = vrot.lane.b32.xlu0 %v2390_v8, %s2971_s22  ;;  %s2859_s22 = scalar_lea.vmem %s2858_s29, 512 }
 0x67d   : > { %p2861_p3 = scmp.lt.s32.totalorder %s2859_s22, %s2853_s0 }
 0x67f   : > { %p2862_p0 = por %p2861_p3, %p2860_p4 }
 0x681   : > { %p2863_p2 = pnand %p2862_p0, %p2856_p9 }
 0x6b7   : > { %v2382_v12 = vpop.permute.xlu0 %2381 }
 0x6b8   : > { %v2384_v15 = vunpack.i.h.bf16 %v2382_v12  ;;  %v2383_v18 = vunpack.i.l.bf16 %v2382_v12  ;;  %v2028_v12 = vld [vmem:[#allocation13] ss:$0 sm:$0xff] }
 0x6b9   : > { %v2387_v19 = vpop.permute.xlu1 %2386 }
 0x6ba   : > { %v2389_v20 = vunpack.i.h.bf16 %v2387_v19  ;;  %v2388_v21 = vunpack.i.l.bf16 %v2387_v19  ;;  %v1278_v22 = vsel %vm779_vm2, %v1117_v53, %v2384_v15  ;;  %v1277_v23 = vsel %vm779_vm2, %v1114_v51, %v2383_v18  ;;  %v2413_v51 = vld [vmem:[#allocation14 + $0x4] ss:$8 sps:$4 sm:$0xff]   ;;  %v2414_v53 = vld [vmem:[#allocation14 + $0x10] ss:$8 sps:$4 sm:$0xff]  }
 0x6bb   : > { %1480 = vmatprep.subr.bf16.mxu1 %v2413_v51 }
 0x6bc   : > { %v1281_v26 = vsel %vm1279_vm3, %v1278_v22, %v2389_v20  ;;  %v1280_v27 = vsel %vm1279_vm3, %v1277_v23, %v2388_v21  ;;  %v2427_v21 = vld [vmem:[#allocation17 + $0x50] sm:$0xff]   ;;  %v2429_v23 = vld [vmem:[#allocation17 + $0x58] sm:$0xff]  }
 0x6bd   : > { %v2428_v22 = vld [vmem:[#allocation17 + $0x10] sm:$0xff]  }
 0x6ee   : > { %v2392_v17 = vpop.permute.xlu0 %2391 }
 0x6ef   : > { %v2394_v24 = vunpack.i.h.bf16 %v2392_v17  ;;  %v2393_v25 = vunpack.i.l.bf16 %v2392_v17  ;;  %v2430_v17 = vld [vmem:[#allocation17 + $0x18] sm:$0xff]  }
 0x6f1   : > { %v1283_v28 = vsel %vm1282_vm4, %v1280_v27, %v2393_v25  ;;  %v1284_v29 = vsel %vm1282_vm4, %v1281_v26, %v2394_v24  ;;  %v2431_v24 = vld [vmem:[#allocation17 + $0x60] sm:$0xff]   ;;  %v2433_v26 = vld [vmem:[#allocation17 + $0x68] sm:$0xff]  }
 0x6f2   : > { %v1285_v30 = vpack.c.bf16 %v1284_v29, %v1283_v28  ;;  %v2432_v25 = vld [vmem:[#allocation17 + $0x20] sm:$0xff]   ;;  %v2434_v27 = vld [vmem:[#allocation17 + $0x28] sm:$0xff]   ;;  %v2435_v28 = vld [vmem:[#allocation17 + $0x70] sm:$0xff]  }
 0x6f3   : > { %v2436_v29 = vld [vmem:[#allocation17 + $0x30] sm:$0xff]  }
 0x6f4   : > { %2164 = vmatmul.mubr.msk.bf16.vlgmr.msra.gmra.mrb[12].mxu0 %vm681_vm0, %v1285_v30  ;;  %v2437_v30 = vld [vmem:[#allocation17 + $0x78] sm:$0xff]  }
 0x6f5   : > { %2086 = vmatpush3.bf16.msra.mxu0 %v2424_v59 }
 0x6f6   : > { %2087 = vmatprep.subr.bf16.mxu0 %v2425_v60 }
 0x6f9   : > { %2088 = vmatpush3.bf16.msra.mxu0 %v2426_v61  ;;  %v2038_v61 = vld [vmem:[#allocation19] ss:$0 sm:$0xff] }
 0x6fa   : > { %2089 = vmatprep.subr.bf16.mxu0 %v2427_v21 }
 0x6fd   : > { %2090 = vmatpush3.bf16.msra.mxu0 %v2428_v22 }
 0x6fe   : > { %2091 = vmatprep.subr.bf16.mxu0 %v2429_v23 }
 0x701   : > { %2092 = vmatpush3.bf16.msra.mxu0 %v2430_v17 }
 0x702   : > { %2093 = vmatprep.subr.bf16.mxu0 %v2431_v24 }
 0x705   : > { %2094 = vmatpush3.bf16.msra.mxu0 %v2432_v25 }
 0x706   : > { %2095 = vmatprep.subr.bf16.mxu0 %v2433_v26 }
 0x709   : > { %2096 = vmatpush3.bf16.msra.mxu0 %v2434_v27 }
 0x70a   : > { %2097 = vmatprep.subr.bf16.mxu0 %v2435_v28 }
 0x70d   : > { %2098 = vmatpush3.bf16.msra.mxu0 %v2436_v29 }
 0x70e   : > { %2099 = vmatprep.subr.bf16.mxu0 %v2437_v30 }
 0x7c7   : > { %v1362_v33 = vpop.f32.mrb[12].mxu0 }
 0x7c8   : > { %v1363_v31 = vadd.f32 %v2021_v32, %v1362_v33  ;;  %v2165_v34 = vpop.f32.mrb[13].mxu0  ;;  %v1425_v33 = vld [vmem:[#allocation16] sm:$0x3] }
 0x7c9   : > { %v1365_v35 = vpop.f32.mrb[14].mxu0  ;;  %v1434_v34 = vrot.slane %v1425_v33, %v637_v16 }
 0x7ca   : > { %v1366_v36 = vadd.f32 %v2021_v32, %v1365_v35  ;;  %v2166_v37 = vpop.f32.mrb[15].mxu0  ;;  %v1369_v38 = vadd.f32 %v1363_v31, %v3457_v9  ;;  %v2438_v32 = vld [vmem:[#allocation17 + $0x38] sm:$0xff]   ;;  %v1430_v31 = vrot.slane %v1425_v33, %v633_v14 }
 0x7cb   : > { %2100 = vmatpush3.bf16.msra.mxu0 %v2438_v32  ;;  %v2055_v32 = vld [vmem:[#allocation20] ss:$0 sm:$0xff] }
 0x7cc   : > { %v1373_v39 = vsel %vm681_vm0, %v1369_v38, 0.0  ;;  %v1370_v40 = vadd.f32 %v1366_v36, %v3460_v10  ;;  %v2411_v10 = vld [vmem:[#allocation14] ss:$8 sps:$4 sm:$0xff]  }
 0x7cd   : > { %1374 = vadd.xlane.f32.xlu1 %v1373_v39  ;;  %1481 = vmatpush1.bf16.msra.mxu1 %v2411_v10 }
 0x7ce   : > { %v1376_v41 = vsel %vm681_vm0, %v1370_v40, 0.0  ;;  %1482 = vmatprep.subr.bf16.mxu1 %v2416_v52 }
 0x7cf   : > { %1377 = vadd.xlane.f32.xlu0 %v1376_v41 }
 0x7d1   : > { %1483 = vmatpush1.bf16.msra.mxu1 %v2414_v53 }
 0x7d2   : > { %1484 = vmatprep.subr.bf16.mxu1 %v2419_v54 }
 0x7d5   : > { %1485 = vmatpush1.bf16.msra.mxu1 %v2417_v55 }
 0x7d6   : > { %1486 = vmatprep.subr.bf16.mxu1 %v2422_v57 }
 0x7d9   : > { %1487 = vmatpush1.bf16.msra.mxu1 %v2420_v56 }
 0x85a   : > { %v1375_v42 = vpop.xlane.xlu1 %1374 }
 0x85b   : > { %v1380_v43 = vmul.f32 0.015625, %v1375_v42 }
 0x85c   : > { %v1378_v44 = vpop.xlane.xlu0 %1377 }
 0x85d   : > { %v1382_v45 = vsub.f32 %v1369_v38, %v1380_v43  ;;  %v1381_v46 = vmul.f32 0.015625, %v1378_v44 }
 0x85f   : > { %v1383_v47 = vsub.f32 %v1370_v40, %v1381_v46  ;;  %v1384_v48 = vmul.f32 %v1382_v45, %v1382_v45 }
 0x861   : > { %v1386_v49 = vsel %vm681_vm0, %v1384_v48, 0.0  ;;  %v1385_v50 = vmul.f32 %v1383_v47, %v1383_v47 }
 0x862   : > { %1387 = vadd.xlane.f32.xlu0 %v1386_v49 }
 0x863   : > { %v1389_v9 = vsel %vm681_vm0, %v1385_v50, 0.0 }
 0x864   : > { %1390 = vadd.xlane.f32.xlu1 %v1389_v9 }
 0x8ef   : > { %v1388_v62 = vpop.xlane.xlu0 %1387 }
 0x8f0   : > { %v1392_v63 = vmul.f32 0.015625, %v1388_v62 }
 0x8f1   : > { %v1391_v1 = vpop.xlane.xlu1 %1390 }
 0x8f2   : > { %v1394_v0 = vadd.f32 1e-12, %v1392_v63  ;;  %v1393_v2 = vmul.f32 0.015625, %v1391_v1 }
 0x8f4   : > { %2471 = vrsqrt.f32 %v1394_v0  ;;  %v1395_v3 = vadd.f32 1e-12, %v1393_v2 }
 0x8f6   : > { %2473 = vrsqrt.f32 %v1395_v3 }
 0x8fe   : > { %v2472_v4 = vpop.eup %2471 }
 0x8ff   : > { %v1398_v6 = vmul.f32 %v2472_v4, %v1382_v45 }
 0x900   : > { %v2474_v7 = vpop.eup %2473 }
 0x901   : > { %v1406_v8 = vmul.f32 %v2027_v5, %v1398_v6  ;;  %v1399_v11 = vmul.f32 %v2474_v7, %v1383_v47 }
 0x903   : > { %v1407_v15 = vmul.f32 %v2027_v5, %v1399_v11  ;;  %v3560_v18 = vadd.f32 %v2028_v12, %v1406_v8 }
 0x905   : > { %v3562_v19 = vadd.f32 %v2028_v12, %v1407_v15 }
 0x907   : > { %v1416_v20 = vpack.c.bf16 %v3562_v19, %v3560_v18 }
 0x909   : > { %2037 = vmatmul.mubr.msk.bf16.vlgmr.msra.gmra.mrb[24].mxu1 %vm681_vm0, %v1416_v20 }
 0x9dc   : > { %v1514_v35 = vpop.f32.mrb[24].mxu1 }
 0x9dd   : > { %v1515_v36 = vadd.f32 %v1514_v35, %v1430_v31  ;;  %v1516_v37 = vpop.f32.mrb[25].mxu1 }
 0x9de   : > { %v1517_v38 = vadd.f32 %v1516_v37, %v1434_v34  ;;  %v1518_v39 = vpop.f32.mrb[26].mxu1 }
 0x9df   : > { %v1528_v40 = vmul.f32 0.70710677, %v1515_v36  ;;  %v1519_v41 = vadd.f32 %v1518_v39, %v1430_v31  ;;  %v1520_v42 = vpop.f32.mrb[27].mxu1  ;;  %v1523_v50 = vmul.f32 0.5, %v1515_v36 }
 0x9e0   : > { %v1529_v43 = vmul.f32 0.70710677, %v1517_v38  ;;  %v1521_v44 = vadd.f32 %v1520_v42, %v1434_v34  ;;  %v1524_v10 = vmul.f32 0.5, %v1517_v38  ;;  %v2056_v34 = vld [vmem:[#allocation22] ss:$0 sm:$0xff] }
 0x9e1   : > { %2475 = verf.f32 %v1528_v40  ;;  %v1530_v45 = vmul.f32 0.70710677, %v1519_v41  ;;  %v1525_v9 = vmul.f32 0.5, %v1519_v41 }
 0x9e2   : > { %2477 = verf.f32 %v1529_v43  ;;  %v1531_v46 = vmul.f32 0.70710677, %v1521_v44  ;;  %v1526_v52 = vmul.f32 0.5, %v1521_v44 }
 0x9e3   : > { %2479 = verf.f32 %v1530_v45 }
 0x9e4   : > { %2481 = verf.f32 %v1531_v46 }
 0x9eb   : > { %v2476_v14 = vpop.eup %2475 }
 0x9ec   : > { %v2478_v47 = vpop.eup %2477  ;;  %v1536_v13 = vadd.f32 1.0, %v2476_v14 }
 0x9ed   : > { %v2480_v16 = vpop.eup %2479  ;;  %v1537_v48 = vadd.f32 1.0, %v2478_v47 }
 0x9ee   : > { %v2482_v49 = vpop.eup %2481  ;;  %v1538_v51 = vadd.f32 1.0, %v2480_v16  ;;  %v1540_v54 = vmul.f32 %v1536_v13, %v1523_v50 }
 0x9ef   : > { %v1539_v53 = vadd.f32 1.0, %v2482_v49  ;;  %v1541_v56 = vmul.f32 %v1537_v48, %v1524_v10 }
 0x9f0   : > { %v1542_v55 = vmul.f32 %v1538_v51, %v1525_v9 }
 0x9f1   : > { %v1543_v57 = vmul.f32 %v1539_v53, %v1526_v52 }
 0x9f2   : > { %v1544_v58 = vpack.c.bf16 %v1542_v55, %v1540_v54 }
 0x9f3   : > { %v1545_v59 = vpack.c.bf16 %v1543_v57, %v1541_v56 }
 0x9f5   : > { %1713 = vmatprep.mubr.bf16.mxu0 %v1545_v59 }
 0x9f6   : > { %1714 = vmatmul.mubr.bf16.vlgmr.msra.gmra.mrb[16].mxu0 %v1544_v58 }
 0xac9   : > { %v2101_v60 = vpop.f32.mrb[16].mxu0 }
 0xaca   : > { %v2102_v62 = vpop.f32.mrb[17].mxu0 }
 0xacb   : > { %v2103_v63 = vadd.f32 %v2102_v62, %v2101_v60  ;;  %v2104_v1 = vpop.f32.mrb[18].mxu0 }
 0xacc   : > { %v2105_v0 = vpop.f32.mrb[19].mxu0 }
 0xacd   : > { %v1716_v2 = vadd.f32 %v2103_v63, %v2038_v61  ;;  %v2106_v3 = vadd.f32 %v2105_v0, %v2104_v1 }
 0xacf   : > { %v1719_v4 = vadd.f32 %v2106_v3, %v2038_v61  ;;  %v1722_v5 = vadd.f32 %v1716_v2, %v3560_v18 }
 0xad1   : > { %v1726_v6 = vsel %vm681_vm0, %v1722_v5, 0.0  ;;  %v1723_v7 = vadd.f32 %v1719_v4, %v3562_v19 }
 0xad2   : > { %1727 = vadd.xlane.f32.xlu0 %v1726_v6 }
 0xad3   : > { %v1729_v8 = vsel %vm681_vm0, %v1723_v7, 0.0 }
 0xad4   : > { %1730 = vadd.xlane.f32.xlu1 %v1729_v8 }
 0xb5f   : > { %v1728_v11 = vpop.xlane.xlu0 %1727 }
 0xb60   : > { %v1732_v12 = vmul.f32 0.015625, %v1728_v11 }
 0xb61   : > { %v1731_v15 = vpop.xlane.xlu1 %1730 }
 0xb62   : > { %v1734_v20 = vsub.f32 %v1722_v5, %v1732_v12  ;;  %v1733_v21 = vmul.f32 0.015625, %v1731_v15 }
 0xb64   : > { %v1735_v22 = vsub.f32 %v1723_v7, %v1733_v21  ;;  %v1736_v23 = vmul.f32 %v1734_v20, %v1734_v20 }
 0xb66   : > { %v1738_v17 = vsel %vm681_vm0, %v1736_v23, 0.0  ;;  %v1737_v24 = vmul.f32 %v1735_v22, %v1735_v22 }
 0xb67   : > { %1739 = vadd.xlane.f32.xlu0 %v1738_v17 }
 0xb68   : > { %v1741_v18 = vsel %vm681_vm0, %v1737_v24, 0.0 }
 0xb69   : > { %1742 = vadd.xlane.f32.xlu1 %v1741_v18 }
 0xbf4   : > { %v1740_v19 = vpop.xlane.xlu0 %1739 }
 0xbf5   : > { %v1744_v25 = vmul.f32 0.015625, %v1740_v19 }
 0xbf6   : > { %v1743_v26 = vpop.xlane.xlu1 %1742 }
 0xbf7   : > { %v1746_v27 = vadd.f32 1e-12, %v1744_v25  ;;  %v1745_v28 = vmul.f32 0.015625, %v1743_v26 }
 0xbf9   : > { %2483 = vrsqrt.f32 %v1746_v27  ;;  %v1747_v29 = vadd.f32 1e-12, %v1745_v28 }
 0xbfb   : > { %2485 = vrsqrt.f32 %v1747_v29 }
 0xc03   : > { %v2484_v30 = vpop.eup %2483 }
 0xc04   : > { %v1750_v33 = vmul.f32 %v2484_v30, %v1734_v20 }
 0xc05   : > { %v2486_v31 = vpop.eup %2485 }
 0xc06   : > { %v1758_v35 = vmul.f32 %v2055_v32, %v1750_v33  ;;  %v1751_v36 = vmul.f32 %v2486_v31, %v1735_v22 }
 0xc08   : > { %v1766_v37 = vadd.f32 %v2056_v34, %v1758_v35  ;;  %v1759_v38 = vmul.f32 %v2055_v32, %v1751_v36 }
 0xc0a   : > { %v1767_v39 = vadd.f32 %v2056_v34, %v1759_v38  ;;  %1768 = vst.msk [vmem:[%s616_s25] sm:$0xff] %vm681_vm0, %v1766_v37 }
 0xc0c   : > { %1769 = vst.msk [vmem:[%s616_s25 + $0x8] sm:$0xff] %vm681_vm0, %v1767_v39 }
 0xc0d   : > { %2866 = shalt.err (!%p2863_p2)
}
 0xc0e   : > { %s2867_s20 = scalar_lea.hbm %s3583_s15, 256  ;;  %s2871_s16 = scalar_lea.hbm %s3699_s17, 512 }
 0xc0f   : > { %p2868_p6 = scmp.ne.s32.totalorder %s3583_s15, %s2867_s20  ;;  %p2872_p1 = scmp.lt.u32.totalorder %s3583_s15, %s3699_s17 }
 0xc10   : > { %p2873_p11 = scmp.lt.u32.totalorder %s2871_s16, %s2867_s20  ;;  %p2875_p13 = scmp.lt.u32.totalorder %s2867_s20, %s3583_s15 }
 0xc11   : > { %p2869_p5 = pnand %p2868_p6, %p3700_p8 }
 0xc12   : > { %p2874_p12 = por %p2873_p11, %p2872_p1 }
 0xc13   : > { %p2870_p10 = pneg %p2869_p5 }
 0xc14   : > { %p2876_p7 = por %p2875_p13, %p2874_p12 }
 0xc16   : > { %p2877_p9 = pnand %p2876_p7, %p2870_p10 }
 0xc18   : > { %2880 = shalt.err (!%p2877_p9)
}
 0xc19   : > { %s2973_s0 = smov 128   ;;  %s2974_s22 = smov 8  }
 0xc1a   : > { %2217 = dma.vmem_to_hbm [thread:$0]  (%p3700_p8), %s3585_s13, 256, %s3583_s15, %s1771_s23, %s2973_s0, %s2973_s0, %s2974_s22  }
 0xc1b PF: > { %s3701_s25 = sld [smem:[#allocation32_spill]]  ;;  %p3702_p4 = scmp.ne.s32.totalorder %s3680_s3, 0 }
 0xc1c   : > { %p3703_p3 = scmp.ge.s32.totalorder %s2943_s28, 2 }
 0xc1e   : > { %p2261_p0 = pnand %p3703_p3, %p3702_p4 }
 0xc21   : > { %s1799_s24 = sand.u32 1, %s3701_s25  }
 0xc22   : > { %s1800_s20 = scalar_lea.sflag [#allocation4], %s1799_s24 }
 0xc23   : > { %2926 = dma.done.wait (!%p2261_p0), %s1800_s20, 256  }
 0xc24   : > { %2928 = vsyncadd (!%p2261_p0), %s1800_s20, 4294967040  ;;  %p32_p2 = scmp.ge.s32.totalorder %s3337_s18, 4   ;;  %s3704_s25 = smov %s2935_s26 }
 0xc25   : > { %s3705_s26 = smov %s2939_s27  ;;  %s3706_s27 = smov %s3348_s14 }
 0xc26   : > { %s3707_s28 = smov %s3337_s18  ;;  %34 = sbr.rel (!%p32_p2) target bundleno = 16 (0x10), region = 165 }
 0xc2d   :  { %1805 = vsyncpa [#allocation3], 1 }
 0xc2e   :  { %1807 = vsyncpa [#allocation3 + $0x1], 1 }
 0xc2f   :  { %1808 = vsyncpa [#allocation6], 1 }
 0xc30   :  { %1809 = vsyncpa [#allocation9], 1 }
 0xc31   :  { %1810 = vsyncpa [#allocation12], 1 }
 0xc32   :  { %1811 = vsyncpa [#allocation15], 1 }
 0xc33   :  { %1812 = vsyncpa [#allocation18], 1 }
 0xc34   :  { %1813 = vsyncpa [#allocation21], 1 }
 0xc35   :  { %1814 = vsyncpa [#allocation4], 1 }
 0xc36   :  { %1816 = vsyncpa [#allocation4 + $0x1], 1 }

</bundles_post_ra>
